<compile_context>
chip_gen: v7x
topology: tpu7x:2x2x1
jax: 0.10.0
libtpu: 0.0.40
codegen_flags: <defaults>
</compile_context>

<pallas_src>
import functools
import math

import jax
import jax.numpy as jnp
from jax.experimental import pallas as pl
from jax.experimental.pallas import tpu as pltpu

_NEG_INF = -1e30  # finite mask fill; safe because every causal row has >=1
                  # valid key (a fully-masked row would give denom ~ TK here).

# Scoped-VMEM budget. Re-derive per generation (v5e/v6e: 128 MiB physical,
# v7x: 64 MiB). 48 MiB leaves double-buffering headroom on every generation;
# actual usage at these tile sizes is far below it.
_VMEM_LIMIT = 48 * 1024 * 1024


# ----------------------- kernel 1: fused QKV projection ----------------------
def _qkv_proj_kernel(x_ref, w_ref, b_ref, o_ref):
    # x_ref: (1, TB, E) bf16   w_ref: (E, 3E) bf16   b_ref: (1, 3E) f32
    acc = jnp.dot(x_ref[0], w_ref[...], preferred_element_type=jnp.float32)
    o_ref[0] = (acc + b_ref[...]).astype(o_ref.dtype)


def _qkv_proj(x, w, b, *, tb):
    B, T, E = x.shape
    E3 = w.shape[1]
    return pl.pallas_call(
        _qkv_proj_kernel,
        out_shape=jax.ShapeDtypeStruct((B, T, E3), jnp.bfloat16),
        grid=(B, T // tb),
        in_specs=[
            pl.BlockSpec((1, tb, E), lambda b_, t: (b_, t, 0)),   # x rows
            pl.BlockSpec((E, E3), lambda b_, t: (0, 0)),          # c_attn.W^T
            pl.BlockSpec((1, E3), lambda b_, t: (0, 0)),          # c_attn.bias
        ],
        out_specs=pl.BlockSpec((1, tb, E3), lambda b_, t: (b_, t, 0)),
        compiler_params=pltpu.CompilerParams(
            dimension_semantics=("parallel", "parallel"),
            vmem_limit_bytes=_VMEM_LIMIT),
    )(x, w, b)


# ----------------------- kernel 2: causal flash attention --------------------
def _flash_kernel(q_ref, k_ref, v_ref, o_ref, m_sc, l_sc, acc_sc, *, tq, tk):
    qi = pl.program_id(2)
    ki = pl.program_id(3)
    n_kb = pl.num_programs(3)

    @pl.when(ki == 0)
    def _init():
        m_sc[...] = jnp.full_like(m_sc, _NEG_INF)
        l_sc[...] = jnp.zeros_like(l_sc)
        acc_sc[...] = jnp.zeros_like(acc_sc)

    # Causal block skipping: this k-block contributes only if its first key
    # position is <= the last query position of the current q-block.
    @pl.when(ki * tk <= qi * tq + (tq - 1))
    def _compute():
        q = q_ref[0, 0]                        # (TQ, D) bf16, scale pre-folded
        k = k_ref[0, 0]                        # (TK, D) bf16
        v = v_ref[0, 0]                        # (TK, D) bf16

        # scores = q @ k^T (contract D) with f32 accumulation on the MXU.
        s = jax.lax.dot_general(q, k, (((1,), (1,)), ((), ())),
                                preferred_element_type=jnp.float32)  # (TQ,TK)

        row = qi * tq + jax.lax.broadcasted_iota(jnp.int32, (tq, tk), 0)
        col = ki * tk + jax.lax.broadcasted_iota(jnp.int32, (tq, tk), 1)
        s = jnp.where(col <= row, s, _NEG_INF)

        m_prev = m_sc[...]
        m_new = jnp.maximum(m_prev, jnp.max(s, axis=-1, keepdims=True))
        alpha = jnp.exp(m_prev - m_new)
        e = jnp.exp(s - m_new)                 # unnormalized probabilities
        l_sc[...] = alpha * l_sc[...] + jnp.sum(e, axis=-1, keepdims=True)
        acc_sc[...] = alpha * acc_sc[...] + jnp.dot(
            e.astype(v.dtype), v, preferred_element_type=jnp.float32)
        m_sc[...] = m_new

    @pl.when(ki == n_kb - 1)
    def _finalize():
        # Deferred normalization: one (TQ, D) multiply with an EUP reciprocal
        # instead of normalizing the (TQ, TK) probability matrix.
        inv = pl.reciprocal(l_sc[...], approx=True)
        o_ref[0, 0] = (acc_sc[...] * inv).astype(o_ref.dtype)


def _flash_attention(q, k, v, *, tq, tk):
    B, H, T, D = q.shape
    kernel = functools.partial(_flash_kernel, tq=tq, tk=tk)
    return pl.pallas_call(
        kernel,
        out_shape=jax.ShapeDtypeStruct((B, H, T, D), jnp.bfloat16),
        grid=(B, H, T // tq, T // tk),
        in_specs=[
            pl.BlockSpec((1, 1, tq, D), lambda b, h, qi, ki: (b, h, qi, 0)),
            pl.BlockSpec((1, 1, tk, D), lambda b, h, qi, ki: (b, h, ki, 0)),
            pl.BlockSpec((1, 1, tk, D), lambda b, h, qi, ki: (b, h, ki, 0)),
        ],
        out_specs=pl.BlockSpec((1, 1, tq, D), lambda b, h, qi, ki: (b, h, qi, 0)),
        scratch_shapes=[
            pltpu.VMEM((tq, 1), jnp.float32),   # running row max m
            pltpu.VMEM((tq, 1), jnp.float32),   # running denominator l
            pltpu.VMEM((tq, D), jnp.float32),   # unnormalized output accum
        ],
        compiler_params=pltpu.CompilerParams(
            dimension_semantics=("parallel", "parallel", "parallel", "arbitrary"),
            vmem_limit_bytes=_VMEM_LIMIT),
    )(q, k, v)


# ----------------------- kernel 3: output projection -------------------------
def _out_proj_kernel(y_ref, w_ref, b_ref, o_ref):
    acc = jnp.dot(y_ref[0], w_ref[...], preferred_element_type=jnp.float32)
    o_ref[0] = (acc + b_ref[...]).astype(o_ref.dtype)


def _out_proj(y, w, b, *, tb):
    B, T, E = y.shape
    return pl.pallas_call(
        _out_proj_kernel,
        out_shape=jax.ShapeDtypeStruct((B, T, E), jnp.float32),
        grid=(B, T // tb),
        in_specs=[
            pl.BlockSpec((1, tb, E), lambda b_, t: (b_, t, 0)),   # merged heads
            pl.BlockSpec((E, E), lambda b_, t: (0, 0)),           # c_proj.W^T
            pl.BlockSpec((1, E), lambda b_, t: (0, 0)),           # c_proj.bias
        ],
        out_specs=pl.BlockSpec((1, tb, E), lambda b_, t: (b_, t, 0)),
        compiler_params=pltpu.CompilerParams(
            dimension_semantics=("parallel", "parallel"),
            vmem_limit_bytes=_VMEM_LIMIT),
    )(y, w, b)


# ----------------------- wrapper ---------------------------------------------
def _pick_tile(n, pref):
    return pref if (n >= pref and n % pref == 0) else n


@functools.partial(jax.jit, static_argnames=("n_head",))
def causal_self_attention(x, w_attn, b_attn, w_proj, b_proj, *, n_head):
    """Forward pass of CausalSelfAttention (eval mode: dropouts are identity).

    x: [B, T, E] float32.  Weights are stored as [in, out] (PyTorch weight^T).
    """
    B, T, E = x.shape
    assert E % n_head == 0
    D = E // n_head
    scale = 1.0 / math.sqrt(D)

    # Fold the 1/sqrt(D) softmax scale into the q columns of c_attn
    # (mathematically exact; removes per-step score scaling entirely).
    col_scale = jnp.concatenate(
        [jnp.full((E,), scale, jnp.float32), jnp.ones((2 * E,), jnp.float32)])
    w_attn = w_attn * col_scale
    b_attn = b_attn * col_scale

    # bf16 operands everywhere (MXU peak dtype); accumulation stays f32.
    x_bf = x.astype(jnp.bfloat16)
    w_attn_bf = w_attn.astype(jnp.bfloat16)
    w_proj_bf = w_proj.astype(jnp.bfloat16)

    tb = _pick_tile(T, 128)
    tq = _pick_tile(T, 128)
    tk = _pick_tile(T, 128)

    # 1) fused qkv projection (bf16 output halves intermediate HBM traffic).
    qkv = _qkv_proj(x_bf, w_attn_bf, b_attn.reshape(1, -1), tb=tb)   # (B,T,3E)

    # 2) head split to (B, H, T, D) as an XLA relayout between kernels so the
    #    attention kernel sees full-D lane-dense blocks (no in-kernel
    #    sub-vreg column slicing / concat).
    qkv = qkv.reshape(B, T, 3, n_head, D)
    q = qkv[:, :, 0].transpose(0, 2, 1, 3)
    k = qkv[:, :, 1].transpose(0, 2, 1, 3)
    v = qkv[:, :, 2].transpose(0, 2, 1, 3)

    # 3) causal flash attention over grid (B, H, Tq-blocks, Tk-blocks).
    y = _flash_attention(q, k, v, tq=tq, tk=tk)                      # (B,H,T,D)

    # 4) head merge + output projection (final output stays f32 for consumer).
    y = y.transpose(0, 2, 1, 3).reshape(B, T, E)
    return _out_proj(y, w_proj_bf, b_proj.reshape(1, -1), tb=tb)


# ----------------------- pure-JAX reference ----------------------------------
def _reference(x, w_attn, b_attn, w_proj, b_proj, n_head):
    B, T, E = x.shape
    D = E // n_head
    qkv = x @ w_attn + b_attn                                        # (B,T,3E)
    q, k, v = jnp.split(qkv, 3, axis=-1)

    def heads(t):
        return t.reshape(B, T, n_head, D).transpose(0, 2, 1, 3)     # (B,H,T,D)

    q, k, v = heads(q), heads(k), heads(v)
    s = jnp.einsum("bhtd,bhsd->bhts", q, k) / math.sqrt(D)
    mask = jnp.tril(jnp.ones((T, T), bool))
    s = jnp.where(mask, s, -jnp.inf)
    p = jax.nn.softmax(s, axis=-1)
    y = jnp.einsum("bhts,bhsd->bhtd", p, v)
    y = y.transpose(0, 2, 1, 3).reshape(B, T, E)
    return y @ w_proj + b_proj


# ----------------------- main -------------------------------------------------
if __name__ == "__main__":
    # Small shapes consistent with the module: n_embd % n_head == 0 and
    # head_dim = 64 (same ratio as the real config 2048/32); T = 256 gives
    # multiple q/k blocks so online softmax + causal block skipping are
    # actually exercised.
    B, T, E, H = 2, 256, 256, 4

    key = jax.random.PRNGKey(0)
    kx, kw1, kb1, kw2, kb2 = jax.random.split(key, 5)

    x = jax.random.normal(kx, (B, T, E), jnp.float32)
    # Weights stored as [in, out] (PyTorch nn.Linear weight transposed).
    w_attn = 0.02 * jax.random.normal(kw1, (E, 3 * E), jnp.float32)
    b_attn = 0.01 * jax.random.normal(kb1, (3 * E,), jnp.float32)
    w_proj = 0.02 * jax.random.normal(kw2, (E, E), jnp.float32)
    b_proj = 0.01 * jax.random.normal(kb2, (E,), jnp.float32)

    out = causal_self_attention(x, w_attn, b_attn, w_proj, b_proj, n_head=H)
    out = jax.block_until_ready(out)

    assert out.shape == (B, T, E), out.shape
    assert bool(jnp.all(jnp.isfinite(out)))

    # Tolerance accounts for bf16 matmul operands + approx reciprocal vs a
    # pure-f32 reference.
    ref = _reference(x, w_attn, b_attn, w_proj, b_proj, H)
    err = float(jnp.max(jnp.abs(out - ref)))
    assert err < 5e-2, err

    print("KERNEL_OK")
</pallas_src>

<mosaic_0001>
module attributes {stable_mosaic.version = 11 : i64} {
  func.func @_qkv_proj_kernel(%arg0: i32, %arg1: i32, %arg2: memref<1x128x256xbf16, #tpu.memory_space<vmem>>, %arg3: memref<256x768xbf16, #tpu.memory_space<vmem>>, %arg4: memref<1x768xf32, #tpu.memory_space<vmem>>, %arg5: memref<1x128x768xbf16, #tpu.memory_space<vmem>>) attributes {dimension_semantics = [#tpu.dimension_semantics<parallel>, #tpu.dimension_semantics<parallel>], iteration_bounds = array<i64: 2, 2>, scalar_prefetch = 0 : i64, scratch_operands = 0 : i64, tpu.core_type = #tpu.core_type<tc>, window_params = [{transform_indices = @transform_0, window_bounds = array<i64: 1, 128, 256>}, {pipeline_mode = #tpu.pipeline_mode<synchronous>, transform_indices = @transform_1, window_bounds = array<i64: 256, 768>}, {pipeline_mode = #tpu.pipeline_mode<synchronous>, transform_indices = @transform_2, window_bounds = array<i64: 1, 768>}, {transform_indices = @transform_3, window_bounds = array<i64: 1, 128, 768>}]} {
    %c0 = arith.constant 0 : index
    %c0_0 = arith.constant 0 : index
    %c0_1 = arith.constant 0 : index
    %0 = vector.load %arg2[%c0, %c0_0, %c0_1] : memref<1x128x256xbf16, #tpu.memory_space<vmem>>, vector<1x128x256xbf16>
    %1 = vector.shape_cast %0 : vector<1x128x256xbf16> to vector<128x256xbf16>
    %c0_2 = arith.constant 0 : index
    %c0_3 = arith.constant 0 : index
    %2 = vector.load %arg3[%c0_2, %c0_3] : memref<256x768xbf16, #tpu.memory_space<vmem>>, vector<256x768xbf16>
    %cst = arith.constant dense<0.000000e+00> : vector<128x768xf32>
    %3 = tpu.matmul %1, %2, %cst {dimension_numbers = #tpu.dot_dimension_numbers<[1], [0], [0], [1], [0, 0, 1, 1], [], []>} : vector<128x256xbf16>, vector<256x768xbf16>, vector<128x768xf32> -> vector<128x768xf32>
    %c0_4 = arith.constant 0 : index
    %c0_5 = arith.constant 0 : index
    %4 = vector.load %arg4[%c0_4, %c0_5] : memref<1x768xf32, #tpu.memory_space<vmem>>, vector<1x768xf32>
    %5 = vector.broadcast %4 : vector<1x768xf32> to vector<128x768xf32>
    %6 = arith.addf %3, %5 : vector<128x768xf32>
    %7 = arith.truncf %6 : vector<128x768xf32> to vector<128x768xbf16>
    %c0_6 = arith.constant 0 : index
    %c0_7 = arith.constant 0 : index
    %c0_8 = arith.constant 0 : index
    %8 = vector.load %arg5[%c0_6, %c0_7, %c0_8] : memref<1x128x768xbf16, #tpu.memory_space<vmem>>, vector<1x128x768xbf16>
    %9 = vector.shape_cast %8 : vector<1x128x768xbf16> to vector<128x768xbf16>
    %10 = vector.shape_cast %7 : vector<128x768xbf16> to vector<1x128x768xbf16>
    tpu.vector_store %arg5[%c0_6, %c0_7, %c0_8], %10 {strides = array<i32>} : memref<1x128x768xbf16, #tpu.memory_space<vmem>>, vector<1x128x768xbf16>,
    return
  }
  func.func @transform_0(%arg0: i32, %arg1: i32) -> (i32, i32, i32) {
    %c0_i32 = arith.constant 0 : i32
    %c0_i32_0 = arith.constant 0 : i32
    return %arg0, %arg1, %c0_i32 : i32, i32, i32
  }
  func.func @transform_1(%arg0: i32, %arg1: i32) -> (i32, i32) {
    %c0_i32 = arith.constant 0 : i32
    %c0_i32_0 = arith.constant 0 : i32
    %c0_i32_1 = arith.constant 0 : i32
    return %c0_i32, %c0_i32_0 : i32, i32
  }
  func.func @transform_2(%arg0: i32, %arg1: i32) -> (i32, i32) {
    %c0_i32 = arith.constant 0 : i32
    %c0_i32_0 = arith.constant 0 : i32
    %c0_i32_1 = arith.constant 0 : i32
    return %c0_i32, %c0_i32_0 : i32, i32
  }
  func.func @transform_3(%arg0: i32, %arg1: i32) -> (i32, i32, i32) {
    %c0_i32 = arith.constant 0 : i32
    %c0_i32_0 = arith.constant 0 : i32
    return %arg0, %arg1, %c0_i32 : i32, i32, i32
  }
}

module attributes {stable_mosaic.version = 11 : i64} {
  func.func @_flash_kernel(%arg0: i32, %arg1: i32, %arg2: i32, %arg3: i32, %arg4: memref<1x1x128x64xbf16, #tpu.memory_space<vmem>>, %arg5: memref<1x1x128x64xbf16, #tpu.memory_space<vmem>>, %arg6: memref<1x1x128x64xbf16, #tpu.memory_space<vmem>>, %arg7: memref<1x1x128x64xbf16, #tpu.memory_space<vmem>>, %arg8: memref<128x1xf32, #tpu.memory_space<vmem>>, %arg9: memref<128x1xf32, #tpu.memory_space<vmem>>, %arg10: memref<128x64xf32, #tpu.memory_space<vmem>>) attributes {dimension_semantics = [#tpu.dimension_semantics<parallel>, #tpu.dimension_semantics<parallel>, #tpu.dimension_semantics<parallel>, #tpu.dimension_semantics<arbitrary>], iteration_bounds = array<i64: 2, 4, 2, 2>, scalar_prefetch = 0 : i64, scratch_operands = 3 : i64, tpu.core_type = #tpu.core_type<tc>, window_params = [{transform_indices = @transform_0, window_bounds = array<i64: 1, 1, 128, 64>}, {transform_indices = @transform_1, window_bounds = array<i64: 1, 1, 128, 64>}, {transform_indices = @transform_2, window_bounds = array<i64: 1, 1, 128, 64>}, {transform_indices = @transform_3, window_bounds = array<i64: 1, 1, 128, 64>}]} {
    %c0_i32 = arith.constant 0 : i32
    %0 = arith.cmpi eq, %arg3, %c0_i32 : i32
    %1 = arith.extui %0 : i1 to i32
    %c0_i32_0 = arith.constant 0 : i32
    %2 = arith.cmpi ne, %1, %c0_i32_0 : i32
    scf.if %2 {
      %cst = arith.constant -1.000000e+30 : f32
      %12 = vector.broadcast %cst : f32 to vector<128x1xf32>
      %c0 = arith.constant 0 : index
      %c0_4 = arith.constant 0 : index
      %13 = vector.load %arg8[%c0, %c0_4] : memref<128x1xf32, #tpu.memory_space<vmem>>, vector<128x1xf32>
      tpu.vector_store %arg8[%c0, %c0_4], %12 {strides = array<i32>} : memref<128x1xf32, #tpu.memory_space<vmem>>, vector<128x1xf32>,
      %cst_5 = arith.constant 0.000000e+00 : f32
      %14 = vector.broadcast %cst_5 : f32 to vector<128x1xf32>
      %c0_6 = arith.constant 0 : index
      %c0_7 = arith.constant 0 : index
      %15 = vector.load %arg9[%c0_6, %c0_7] : memref<128x1xf32, #tpu.memory_space<vmem>>, vector<128x1xf32>
      tpu.vector_store %arg9[%c0_6, %c0_7], %14 {strides = array<i32>} : memref<128x1xf32, #tpu.memory_space<vmem>>, vector<128x1xf32>,
      %cst_8 = arith.constant 0.000000e+00 : f32
      %16 = vector.broadcast %cst_8 : f32 to vector<128x64xf32>
      %c0_9 = arith.constant 0 : index
      %c0_10 = arith.constant 0 : index
      %17 = vector.load %arg10[%c0_9, %c0_10] : memref<128x64xf32, #tpu.memory_space<vmem>>, vector<128x64xf32>
      tpu.vector_store %arg10[%c0_9, %c0_10], %16 {strides = array<i32>} : memref<128x64xf32, #tpu.memory_space<vmem>>, vector<128x64xf32>,
    } else {
    }
    %c128_i32 = arith.constant 128 : i32
    %3 = arith.muli %arg3, %c128_i32 : i32
    %c128_i32_1 = arith.constant 128 : i32
    %4 = arith.muli %arg2, %c128_i32_1 : i32
    %c127_i32 = arith.constant 127 : i32
    %5 = arith.addi %4, %c127_i32 : i32
    %6 = arith.cmpi sle, %3, %5 : i32
    %7 = arith.extui %6 : i1 to i32
    %c0_i32_2 = arith.constant 0 : i32
    %8 = arith.cmpi ne, %7, %c0_i32_2 : i32
    scf.if %8 {
      %c0 = arith.constant 0 : index
      %c0_4 = arith.constant 0 : index
      %c0_5 = arith.constant 0 : index
      %c0_6 = arith.constant 0 : index
      %12 = vector.load %arg4[%c0, %c0_4, %c0_5, %c0_6] : memref<1x1x128x64xbf16, #tpu.memory_space<vmem>>, vector<1x1x128x64xbf16>
      %13 = vector.shape_cast %12 : vector<1x1x128x64xbf16> to vector<128x64xbf16>
      %c0_7 = arith.constant 0 : index
      %c0_8 = arith.constant 0 : index
      %c0_9 = arith.constant 0 : index
      %c0_10 = arith.constant 0 : index
      %14 = vector.load %arg5[%c0_7, %c0_8, %c0_9, %c0_10] : memref<1x1x128x64xbf16, #tpu.memory_space<vmem>>, vector<1x1x128x64xbf16>
      %15 = vector.shape_cast %14 : vector<1x1x128x64xbf16> to vector<128x64xbf16>
      %c0_11 = arith.constant 0 : index
      %c0_12 = arith.constant 0 : index
      %c0_13 = arith.constant 0 : index
      %c0_14 = arith.constant 0 : index
      %16 = vector.load %arg6[%c0_11, %c0_12, %c0_13, %c0_14] : memref<1x1x128x64xbf16, #tpu.memory_space<vmem>>, vector<1x1x128x64xbf16>
      %17 = vector.shape_cast %16 : vector<1x1x128x64xbf16> to vector<128x64xbf16>
      %cst = arith.constant dense<0.000000e+00> : vector<128x128xf32>
      %18 = tpu.matmul %13, %15, %cst {dimension_numbers = #tpu.dot_dimension_numbers<[1], [1], [0], [0], [0, 0, 1, 0], [], []>} : vector<128x64xbf16>, vector<128x64xbf16>, vector<128x128xf32> -> vector<128x128xf32>
      %c128_i32_15 = arith.constant 128 : i32
      %19 = arith.muli %arg2, %c128_i32_15 : i32
      %20 = tpu.iota {dimensions = array<i32: 0>} : vector<128x128xi32>
      %21 = vector.broadcast %19 : i32 to vector<128x128xi32>
      %22 = arith.addi %21, %20 : vector<128x128xi32>
      %c128_i32_16 = arith.constant 128 : i32
      %23 = arith.muli %arg3, %c128_i32_16 : i32
      %24 = tpu.iota {dimensions = array<i32: 1>} : vector<128x128xi32>
      %25 = vector.broadcast %23 : i32 to vector<128x128xi32>
      %26 = arith.addi %25, %24 : vector<128x128xi32>
      %27 = arith.cmpi sle, %26, %22 : vector<128x128xi32>
      %cst_17 = arith.constant -1.000000e+30 : f32
      %28 = vector.broadcast %cst_17 : f32 to vector<128x128xf32>
      %29 = arith.select %27, %18, %28 : vector<128x128xi1>, vector<128x128xf32>
      %c0_18 = arith.constant 0 : index
      %c0_19 = arith.constant 0 : index
      %30 = vector.load %arg8[%c0_18, %c0_19] : memref<128x1xf32, #tpu.memory_space<vmem>>, vector<128x1xf32>
      %cst_20 = arith.constant dense<0xFF800000> : vector<128xf32>
      %31 = vector.multi_reduction <maximumf>, %29, %cst_20 [1] : vector<128x128xf32> to vector<128xf32>
      %32 = vector.shape_cast %31 : vector<128xf32> to vector<128x1xf32>
      %33 = arith.maximumf %30, %32 : vector<128x1xf32>
      %34 = arith.subf %30, %33 : vector<128x1xf32>
      %35 = math.exp %34 : vector<128x1xf32>
      %36 = vector.broadcast %33 : vector<128x1xf32> to vector<128x128xf32>
      %37 = arith.subf %29, %36 : vector<128x128xf32>
      %38 = math.exp %37 : vector<128x128xf32>
      %c0_21 = arith.constant 0 : index
      %c0_22 = arith.constant 0 : index
      %39 = vector.load %arg9[%c0_21, %c0_22] : memref<128x1xf32, #tpu.memory_space<vmem>>, vector<128x1xf32>
      %40 = arith.mulf %35, %39 : vector<128x1xf32>
      %cst_23 = arith.constant dense<0.000000e+00> : vector<128xf32>
      %41 = vector.multi_reduction <add>, %38, %cst_23 [1] : vector<128x128xf32> to vector<128xf32>
      %42 = vector.shape_cast %41 : vector<128xf32> to vector<128x1xf32>
      %43 = arith.addf %40, %42 : vector<128x1xf32>
      %c0_24 = arith.constant 0 : index
      %c0_25 = arith.constant 0 : index
      %44 = vector.load %arg9[%c0_24, %c0_25] : memref<128x1xf32, #tpu.memory_space<vmem>>, vector<128x1xf32>
      tpu.vector_store %arg9[%c0_24, %c0_25], %43 {strides = array<i32>} : memref<128x1xf32, #tpu.memory_space<vmem>>, vector<128x1xf32>,
      %c0_26 = arith.constant 0 : index
      %c0_27 = arith.constant 0 : index
      %45 = vector.load %arg10[%c0_26, %c0_27] : memref<128x64xf32, #tpu.memory_space<vmem>>, vector<128x64xf32>
      %46 = vector.broadcast %35 : vector<128x1xf32> to vector<128x64xf32>
      %47 = arith.mulf %46, %45 : vector<128x64xf32>
      %48 = arith.truncf %38 : vector<128x128xf32> to vector<128x128xbf16>
      %cst_28 = arith.constant dense<0.000000e+00> : vector<128x64xf32>
      %49 = tpu.matmul %48, %17, %cst_28 {dimension_numbers = #tpu.dot_dimension_numbers<[1], [0], [0], [1], [0, 0, 1, 1], [], []>} : vector<128x128xbf16>, vector<128x64xbf16>, vector<128x64xf32> -> vector<128x64xf32>
      %50 = arith.addf %47, %49 : vector<128x64xf32>
      %c0_29 = arith.constant 0 : index
      %c0_30 = arith.constant 0 : index
      %51 = vector.load %arg10[%c0_29, %c0_30] : memref<128x64xf32, #tpu.memory_space<vmem>>, vector<128x64xf32>
      tpu.vector_store %arg10[%c0_29, %c0_30], %50 {strides = array<i32>} : memref<128x64xf32, #tpu.memory_space<vmem>>, vector<128x64xf32>,
      %c0_31 = arith.constant 0 : index
      %c0_32 = arith.constant 0 : index
      %52 = vector.load %arg8[%c0_31, %c0_32] : memref<128x1xf32, #tpu.memory_space<vmem>>, vector<128x1xf32>
      tpu.vector_store %arg8[%c0_31, %c0_32], %33 {strides = array<i32>} : memref<128x1xf32, #tpu.memory_space<vmem>>, vector<128x1xf32>,
    } else {
    }
    %c1_i32 = arith.constant 1 : i32
    %9 = arith.cmpi eq, %arg3, %c1_i32 : i32
    %10 = arith.extui %9 : i1 to i32
    %c0_i32_3 = arith.constant 0 : i32
    %11 = arith.cmpi ne, %10, %c0_i32_3 : i32
    scf.if %11 {
      %c0 = arith.constant 0 : index
      %c0_4 = arith.constant 0 : index
      %12 = vector.load %arg9[%c0, %c0_4] : memref<128x1xf32, #tpu.memory_space<vmem>>, vector<128x1xf32>
      %13 = tpu.reciprocal %12 {approx = true} : vector<128x1xf32> -> vector<128x1xf32>
      %c0_5 = arith.constant 0 : index
      %c0_6 = arith.constant 0 : index
      %14 = vector.load %arg10[%c0_5, %c0_6] : memref<128x64xf32, #tpu.memory_space<vmem>>, vector<128x64xf32>
      %15 = vector.broadcast %13 : vector<128x1xf32> to vector<128x64xf32>
      %16 = arith.mulf %14, %15 : vector<128x64xf32>
      %17 = arith.truncf %16 : vector<128x64xf32> to vector<128x64xbf16>
      %c0_7 = arith.constant 0 : index
      %c0_8 = arith.constant 0 : index
      %c0_9 = arith.constant 0 : index
      %c0_10 = arith.constant 0 : index
      %18 = vector.load %arg7[%c0_7, %c0_8, %c0_9, %c0_10] : memref<1x1x128x64xbf16, #tpu.memory_space<vmem>>, vector<1x1x128x64xbf16>
      %19 = vector.shape_cast %18 : vector<1x1x128x64xbf16> to vector<128x64xbf16>
      %20 = vector.shape_cast %17 : vector<128x64xbf16> to vector<1x1x128x64xbf16>
      tpu.vector_store %arg7[%c0_7, %c0_8, %c0_9, %c0_10], %20 {strides = array<i32>} : memref<1x1x128x64xbf16, #tpu.memory_space<vmem>>, vector<1x1x128x64xbf16>,
    } else {
    }
    return
  }
  func.func @transform_0(%arg0: i32, %arg1: i32, %arg2: i32, %arg3: i32) -> (i32, i32, i32, i32) {
    %c0_i32 = arith.constant 0 : i32
    %c0_i32_0 = arith.constant 0 : i32
    return %arg0, %arg1, %arg2, %c0_i32 : i32, i32, i32, i32
  }
  func.func @transform_1(%arg0: i32, %arg1: i32, %arg2: i32, %arg3: i32) -> (i32, i32, i32, i32) {
    %c0_i32 = arith.constant 0 : i32
    %c0_i32_0 = arith.constant 0 : i32
    return %arg0, %arg1, %arg3, %c0_i32 : i32, i32, i32, i32
  }
  func.func @transform_2(%arg0: i32, %arg1: i32, %arg2: i32, %arg3: i32) -> (i32, i32, i32, i32) {
    %c0_i32 = arith.constant 0 : i32
    %c0_i32_0 = arith.constant 0 : i32
    return %arg0, %arg1, %arg3, %c0_i32 : i32, i32, i32, i32
  }
  func.func @transform_3(%arg0: i32, %arg1: i32, %arg2: i32, %arg3: i32) -> (i32, i32, i32, i32) {
    %c0_i32 = arith.constant 0 : i32
    %c0_i32_0 = arith.constant 0 : i32
    return %arg0, %arg1, %arg2, %c0_i32 : i32, i32, i32, i32
  }
}

module attributes {stable_mosaic.version = 11 : i64} {
  func.func @_out_proj_kernel(%arg0: i32, %arg1: i32, %arg2: memref<1x128x256xbf16, #tpu.memory_space<vmem>>, %arg3: memref<256x256xbf16, #tpu.memory_space<vmem>>, %arg4: memref<1x256xf32, #tpu.memory_space<vmem>>, %arg5: memref<1x128x256xf32, #tpu.memory_space<vmem>>) attributes {dimension_semantics = [#tpu.dimension_semantics<parallel>, #tpu.dimension_semantics<parallel>], iteration_bounds = array<i64: 2, 2>, scalar_prefetch = 0 : i64, scratch_operands = 0 : i64, tpu.core_type = #tpu.core_type<tc>, window_params = [{transform_indices = @transform_0, window_bounds = array<i64: 1, 128, 256>}, {pipeline_mode = #tpu.pipeline_mode<synchronous>, transform_indices = @transform_1, window_bounds = array<i64: 256, 256>}, {pipeline_mode = #tpu.pipeline_mode<synchronous>, transform_indices = @transform_2, window_bounds = array<i64: 1, 256>}, {transform_indices = @transform_3, window_bounds = array<i64: 1, 128, 256>}]} {
    %c0 = arith.constant 0 : index
    %c0_0 = arith.constant 0 : index
    %c0_1 = arith.constant 0 : index
    %0 = vector.load %arg2[%c0, %c0_0, %c0_1] : memref<1x128x256xbf16, #tpu.memory_space<vmem>>, vector<1x128x256xbf16>
    %1 = vector.shape_cast %0 : vector<1x128x256xbf16> to vector<128x256xbf16>
    %c0_2 = arith.constant 0 : index
    %c0_3 = arith.constant 0 : index
    %2 = vector.load %arg3[%c0_2, %c0_3] : memref<256x256xbf16, #tpu.memory_space<vmem>>, vector<256x256xbf16>
    %cst = arith.constant dense<0.000000e+00> : vector<128x256xf32>
    %3 = tpu.matmul %1, %2, %cst {dimension_numbers = #tpu.dot_dimension_numbers<[1], [0], [0], [1], [0, 0, 1, 1], [], []>} : vector<128x256xbf16>, vector<256x256xbf16>, vector<128x256xf32> -> vector<128x256xf32>
    %c0_4 = arith.constant 0 : index
    %c0_5 = arith.constant 0 : index
    %4 = vector.load %arg4[%c0_4, %c0_5] : memref<1x256xf32, #tpu.memory_space<vmem>>, vector<1x256xf32>
    %5 = vector.broadcast %4 : vector<1x256xf32> to vector<128x256xf32>
    %6 = arith.addf %3, %5 : vector<128x256xf32>
    %c0_6 = arith.constant 0 : index
    %c0_7 = arith.constant 0 : index
    %c0_8 = arith.constant 0 : index
    %7 = vector.load %arg5[%c0_6, %c0_7, %c0_8] : memref<1x128x256xf32, #tpu.memory_space<vmem>>, vector<1x128x256xf32>
    %8 = vector.shape_cast %7 : vector<1x128x256xf32> to vector<128x256xf32>
    %9 = vector.shape_cast %6 : vector<128x256xf32> to vector<1x128x256xf32>
    tpu.vector_store %arg5[%c0_6, %c0_7, %c0_8], %9 {strides = array<i32>} : memref<1x128x256xf32, #tpu.memory_space<vmem>>, vector<1x128x256xf32>,
    return
  }
  func.func @transform_0(%arg0: i32, %arg1: i32) -> (i32, i32, i32) {
    %c0_i32 = arith.constant 0 : i32
    %c0_i32_0 = arith.constant 0 : i32
    return %arg0, %arg1, %c0_i32 : i32, i32, i32
  }
  func.func @transform_1(%arg0: i32, %arg1: i32) -> (i32, i32) {
    %c0_i32 = arith.constant 0 : i32
    %c0_i32_0 = arith.constant 0 : i32
    %c0_i32_1 = arith.constant 0 : i32
    return %c0_i32, %c0_i32_0 : i32, i32
  }
  func.func @transform_2(%arg0: i32, %arg1: i32) -> (i32, i32) {
    %c0_i32 = arith.constant 0 : i32
    %c0_i32_0 = arith.constant 0 : i32
    %c0_i32_1 = arith.constant 0 : i32
    return %c0_i32, %c0_i32_0 : i32, i32
  }
  func.func @transform_3(%arg0: i32, %arg1: i32) -> (i32, i32, i32) {
    %c0_i32 = arith.constant 0 : i32
    %c0_i32_0 = arith.constant 0 : i32
    return %arg0, %arg1, %c0_i32 : i32, i32, i32
  }
}

</mosaic_0001>

<bundles_post_ra>
// kernel: mul.9
= control target key start
LH: loop header
LB: loop body
LE: loop exit
PB: predicated region body
PF: predicated region fallthrough
CT: control target
= control target key end

     0   :  { %s34_s0 = inlined_call_operand.vmem [shape: f32[768], index: 0, kind: input, shape index: {}]   ;;  %s35_s1 = inlined_call_operand.vmem [shape: f32[768], index: 1, kind: input, shape index: {}]   ;;  %s36_s2 = inlined_call_operand.vmem [shape: f32[768], index: 2, kind: output, shape index: {}]  }
   0x1   :  { %v3_v0 = vld [vmem:[%s34_s0] sm:$0x3f] }
   0x2   :  { %v4_v1 = vld [vmem:[%s35_s1] sm:$0x3f] }
   0x3   :  { %v7_v2 = vmul.f32 %v4_v1, %v3_v0 }
   0x5   :  { %9 = vst [vmem:[%s36_s2] sm:$0xff] %v7_v2 }

// kernel: causal_self_attention.3
= control target key start
LH: loop header
LB: loop body
LE: loop exit
PB: predicated region body
PF: predicated region fallthrough
CT: control target
= control target key end

     0   :  { %s2216_s12 = smov 0   ;;  %s2218_s13 = smov 0   ;;  %s2804_s0 = inlined_call_operand.vmem [shape: bf16[2,256,256], index: 0, kind: input, shape index: {}]   ;;  %s2805_s1 = inlined_call_operand.vmem [shape: bf16[256,768], index: 1, kind: input, shape index: {}]   ;;  %s2806_s2 = inlined_call_operand.vmem [shape: f32[1,768], index: 2, kind: input, shape index: {}]   ;;  %s2807_s3 = inlined_call_operand.vmem [shape: bf16[2,256,768], index: 3, kind: output, shape index: {}]  }
   0x1   :  { %s2220_s14 = smov 0   ;;  %s2222_s15 = smov 0  }
   0x2   :  { %s2224_s16 = smov 0  }
   0x3 LB: > { %s22_s17 = sadd.s32 1, %s2186_s14  ;;  %s25_s18 = sadd.s32 1, %s2190_s15  ;;  %s2194_s16 = sphi %s2224_s16, %s13_s16   ;;  %s2190_s15 = sphi %s2222_s15, %s2811_s15   ;;  %s2186_s14 = sphi %s2220_s14, %s2810_s14   ;;  %s2182_s13 = sphi %s2218_s13, %s2809_s13   ;;  %s2178_s12 = sphi %s2216_s12, %s2808_s12  }
   0x4   : > { %p23_p0 = scmp.ge.s32.totalorder %s22_s17, 2  ;;  %p1697_p1 = scmp.ge.s32.totalorder %s2194_s16, 1 }
   0x5   : > { %p159_p2 = scmp.lt.s32.totalorder %s2194_s16, 5 }
   0x6   : > { %s2813_s17 = smov (%p23_p0, %s22_s17), 0  ;;  %s2815_s18 = smov (!%p23_p0, %s25_s18), %s2190_s15 }
   0x7   : > { %p160_p3 = pnand %p1697_p1, %p159_p2  ;;  %p27_p4 = scmp.ge.s32.totalorder %s2815_s18, 2 }
   0x8   : > { %v1988_v0 = vld [vmem:[%s2805_s1 + $0x4] ss:$24 sps:$4 sm:$0xff] (!%p160_p3)   ;;  %s1698_s21 = sshll.u32 (!%p160_p3), %s2178_s12, 4  ;;  %p194_p5 = scmp.lt.s32.totalorder (!%p160_p3), %s2182_s13, 1  ;;  %v1992_v2 = vld [vmem:[%s2805_s1] ss:$24 sps:$4 sm:$0xff] (!%p160_p3)  }
   0x9   : > { %s2817_s18 = smov (%p27_p4, %s2815_s18), 0  ;;  %163 = sbr.rel (%p160_p3) target bundleno = 383 (0x17f), region = 32 }
   0xa   : > { %v1990_v1 = vld [vmem:[%s2805_s1 + $0xc] ss:$24 sps:$4 sm:$0xff] (!%p160_p3)   ;;  %p196_p6 = scmp.lt.s32.totalorder (!%p160_p3), %s1698_s21, 31  ;;  %919 = vmatprep.subr.bf16.mxu0 (!%p160_p3), %v1988_v0  ;;  %v1993_v3 = vld [vmem:[%s2805_s1 + $0x8] ss:$24 sps:$4 sm:$0xff] (!%p160_p3)  }
   0xb   : > { %1032 = vmatprep.subr.bf16.mxu1 (!%p160_p3), %v1990_v1  ;;  %v1994_v4 = vld [vmem:[%s2805_s1 + $0x34] ss:$24 sps:$4 sm:$0xff] (!%p160_p3)   ;;  %920 = vmatpush1.bf16.msra.mxu0 (!%p160_p3), %v1992_v2  ;;  %v1998_v6 = vld [vmem:[%s2805_s1 + $0x30] ss:$24 sps:$4 sm:$0xff] (!%p160_p3)   ;;  %v2000_v8 = vld [vmem:[%s2805_s1 + $0x64] ss:$24 sps:$4 sm:$0xff] (!%p160_p3)  }
   0xc   : > { %1033 = vmatpush1.bf16.msra.mxu1 (!%p160_p3), %v1993_v3  ;;  %v1996_v5 = vld [vmem:[%s2805_s1 + $0x3c] ss:$24 sps:$4 sm:$0xff] (!%p160_p3)   ;;  %921 = vmatprep.subr.bf16.mxu0 (!%p160_p3), %v1994_v4  ;;  %v1999_v7 = vld [vmem:[%s2805_s1 + $0x38] ss:$24 sps:$4 sm:$0xff] (!%p160_p3)   ;;  %v2002_v9 = vld [vmem:[%s2805_s1 + $0x6c] ss:$24 sps:$4 sm:$0xff] (!%p160_p3)  }
   0xd   : > { %1034 = vmatprep.subr.bf16.mxu1 (!%p160_p3), %v1996_v5  ;;  %v2004_v10 = vld [vmem:[%s2805_s1 + $0x60] ss:$24 sps:$4 sm:$0xff] (!%p160_p3)   ;;  %v2006_v12 = vld [vmem:[%s2805_s1 + $0x94] ss:$24 sps:$4 sm:$0xff] (!%p160_p3)   ;;  %v2010_v14 = vld [vmem:[%s2805_s1 + $0x90] ss:$24 sps:$4 sm:$0xff] (!%p160_p3)  }
   0xe   : > { %v2005_v11 = vld [vmem:[%s2805_s1 + $0x68] ss:$24 sps:$4 sm:$0xff] (!%p160_p3)   ;;  %v2008_v13 = vld [vmem:[%s2805_s1 + $0x9c] ss:$24 sps:$4 sm:$0xff] (!%p160_p3)   ;;  %v2011_v15 = vld [vmem:[%s2805_s1 + $0x98] ss:$24 sps:$4 sm:$0xff] (!%p160_p3)  }
   0xf   : > { %922 = vmatpush1.bf16.msra.mxu0 (!%p160_p3), %v1998_v6  ;;  %v2012_v16 = vld [vmem:[%s2805_s1 + $0xc4] ss:$24 sps:$4 sm:$0xff] (!%p160_p3)   ;;  %v2016_v18 = vld [vmem:[%s2805_s1 + $0xc0] ss:$24 sps:$4 sm:$0xff] (!%p160_p3)   ;;  %v2018_v20 = vld [vmem:[%s2805_s1 + $0xf4] ss:$24 sps:$4 sm:$0xff] (!%p160_p3)  }
  0x10   : > { %s2819_s21 = smov (!%p196_p6, %s1698_s21), 31  ;;  %s2821_s13 = smov (!%p194_p5, %s2182_s13), 1  ;;  %1035 = vmatpush1.bf16.msra.mxu1 %v1999_v7  ;;  %923 = vmatprep.subr.bf16.mxu0 %v2000_v8  ;;  %v2014_v17 = vld [vmem:[%s2805_s1 + $0xcc] ss:$24 sps:$4 sm:$0xff]   ;;  %v2017_v19 = vld [vmem:[%s2805_s1 + $0xc8] ss:$24 sps:$4 sm:$0xff]  }
  0x11   : > { %s1946_s9 = smul.u32 6, %s2819_s21  ;;  %1036 = vmatprep.subr.bf16.mxu1 %v2002_v9  ;;  %v2020_v21 = vld [vmem:[%s2805_s1 + $0xfc] ss:$24 sps:$4 sm:$0xff]   ;;  %v2022_v22 = vld [vmem:[%s2805_s1 + $0xf0] ss:$24 sps:$4 sm:$0xff]   ;;  %s1700_s11 = sshll.u32 %s2821_s13, 6 }
  0x12   : > { %s1947_s12 = smul.u32 192, %s2821_s13  ;;  %v2023_v23 = vld [vmem:[%s2805_s1 + $0xf8] ss:$24 sps:$4 sm:$0xff]   ;;  %v2024_v24 = vld [vmem:[%s2805_s1 + $0x124] ss:$24 sps:$4 sm:$0xff]  }
  0x13   : > { %924 = vmatpush1.bf16.msra.mxu0 %v2004_v10  ;;  %v2026_v25 = vld [vmem:[%s2805_s1 + $0x12c] ss:$24 sps:$4 sm:$0xff]   ;;  %v2028_v26 = vld [vmem:[%s2805_s1 + $0x120] ss:$24 sps:$4 sm:$0xff]   ;;  %v2032_v29 = vld [vmem:[%s2805_s1 + $0x15c] ss:$24 sps:$4 sm:$0xff]  }
  0x14   : > { %s2295_s28 = sadd.s32 %s1947_s12, %s1946_s9  ;;  %1037 = vmatpush1.bf16.msra.mxu1 %v2005_v11  ;;  %925 = vmatprep.subr.bf16.mxu0 %v2006_v12  ;;  %v2029_v27 = vld [vmem:[%s2805_s1 + $0x128] ss:$24 sps:$4 sm:$0xff]   ;;  %v2030_v28 = vld [vmem:[%s2805_s1 + $0x154] ss:$24 sps:$4 sm:$0xff]   ;;  %v2035_v31 = vld [vmem:[%s2805_s1 + $0x158] ss:$24 sps:$4 sm:$0xff]  }
  0x15   : > { %1038 = vmatprep.subr.bf16.mxu1 %v2008_v13  ;;  %v2034_v30 = vld [vmem:[%s2805_s1 + $0x150] ss:$24 sps:$4 sm:$0xff]   ;;  %v2036_v32 = vld [vmem:[%s2805_s1 + $0x184] ss:$24 sps:$4 sm:$0xff]   ;;  %v2040_v34 = vld [vmem:[%s2805_s1 + $0x180] ss:$24 sps:$4 sm:$0xff]  }
  0x16   : > { %v2038_v33 = vld [vmem:[%s2805_s1 + $0x18c] ss:$24 sps:$4 sm:$0xff]   ;;  %v2041_v35 = vld [vmem:[%s2805_s1 + $0x188] ss:$24 sps:$4 sm:$0xff]   ;;  %s1699_s9 = sshll.u32 %s2819_s21, 1  ;;  %s1703_s24 = sshll.u32 %s2295_s28, 2 }
  0x17   : > { %926 = vmatpush1.bf16.msra.mxu0 %v2010_v14  ;;  %v2042_v36 = vld [vmem:[%s2805_s1 + $0x1b4] ss:$24 sps:$4 sm:$0xff]   ;;  %s200_s23 = sadd.s32 %s1700_s11, %s1699_s9  ;;  %v2046_v38 = vld [vmem:[%s2805_s1 + $0x1b0] ss:$24 sps:$4 sm:$0xff]   ;;  %v2048_v40 = vld [vmem:[%s2805_s1 + $0x1e4] ss:$24 sps:$4 sm:$0xff]   ;;  %s2647_s21 = scalar_lea.vmem %s2807_s3, %s1703_s24 }
  0x18   : > { %1039 = vmatpush1.bf16.msra.mxu1 %v2011_v15  ;;  %927 = vmatprep.subr.bf16.mxu0 %v2012_v16  ;;  %v2044_v37 = vld [vmem:[%s2805_s1 + $0x1bc] ss:$24 sps:$4 sm:$0xff]   ;;  %v2047_v39 = vld [vmem:[%s2805_s1 + $0x1b8] ss:$24 sps:$4 sm:$0xff]   ;;  %v2050_v41 = vld [vmem:[%s2805_s1 + $0x1ec] ss:$24 sps:$4 sm:$0xff]  }
  0x19   : > { %1040 = vmatprep.subr.bf16.mxu1 %v2014_v17  ;;  %s1701_s4 = sshll.u32 %s200_s23, 2  ;;  %v2052_v42 = vld [vmem:[%s2805_s1 + $0x1e0] ss:$24 sps:$4 sm:$0xff]   ;;  %v2054_v44 = vld [vmem:[%s2805_s1 + $0x214] ss:$24 sps:$4 sm:$0xff]  }
  0x1a   : > { %v2053_v43 = vld [vmem:[%s2805_s1 + $0x1e8] ss:$24 sps:$4 sm:$0xff]   ;;  %s2398_s19 = scalar_lea.vmem %s2804_s0, %s1701_s4  ;;  %v2056_v45 = vld [vmem:[%s2805_s1 + $0x21c] ss:$24 sps:$4 sm:$0xff]   ;;  %v2059_v47 = vld [vmem:[%s2805_s1 + $0x218] ss:$24 sps:$4 sm:$0xff]  }
  0x1b   : > { %928 = vmatpush1.bf16.msra.mxu0 %v2016_v18  ;;  %v2058_v46 = vld [vmem:[%s2805_s1 + $0x210] ss:$24 sps:$4 sm:$0xff]   ;;  %v2410_v48 = vld [vmem:[%s2398_s19 + $0x4] ss:$8 sps:$4 sm:$0xff]   ;;  %v2064_v51 = vld [vmem:[%s2805_s1 + $0x240] ss:$24 sps:$4 sm:$0xff]  }
  0x1c   : > { %1041 = vmatpush1.bf16.msra.mxu1 %v2017_v19  ;;  %929 = vmatprep.subr.bf16.mxu0 %v2018_v20  ;;  %v2060_v49 = vld [vmem:[%s2805_s1 + $0x244] ss:$24 sps:$4 sm:$0xff]   ;;  %v2065_v52 = vld [vmem:[%s2805_s1 + $0x248] ss:$24 sps:$4 sm:$0xff]   ;;  %v2066_v53 = vld [vmem:[%s2805_s1 + $0x274] ss:$24 sps:$4 sm:$0xff]  }
  0x1d   : > { %1042 = vmatprep.subr.bf16.mxu1 %v2020_v21  ;;  %v2062_v50 = vld [vmem:[%s2805_s1 + $0x24c] ss:$24 sps:$4 sm:$0xff]   ;;  %951 = vmatprep.mubr.bf16.mxu0 %v2410_v48  ;;  %v2068_v54 = vld [vmem:[%s2805_s1 + $0x27c] ss:$24 sps:$4 sm:$0xff]   ;;  %v2070_v55 = vld [vmem:[%s2805_s1 + $0x270] ss:$24 sps:$4 sm:$0xff]  }
  0x1e   : > { %1064 = vmatprep.mubr.bf16.mxu1 %v2410_v48  ;;  %v2071_v56 = vld [vmem:[%s2805_s1 + $0x278] ss:$24 sps:$4 sm:$0xff]   ;;  %v2072_v57 = vld [vmem:[%s2805_s1 + $0x2a4] ss:$24 sps:$4 sm:$0xff]   ;;  %v2077_v60 = vld [vmem:[%s2805_s1 + $0x2a8] ss:$24 sps:$4 sm:$0xff]  }
  0x1f   : > { %930 = vmatpush1.bf16.msra.mxu0 %v2022_v22  ;;  %v2074_v58 = vld [vmem:[%s2805_s1 + $0x2ac] ss:$24 sps:$4 sm:$0xff]   ;;  %v2076_v59 = vld [vmem:[%s2805_s1 + $0x2a0] ss:$24 sps:$4 sm:$0xff]   ;;  %v2080_v62 = vld [vmem:[%s2805_s1 + $0x2dc] ss:$24 sps:$4 sm:$0xff]  }
  0x20   : > { %1043 = vmatpush1.bf16.msra.mxu1 %v2023_v23  ;;  %931 = vmatprep.subr.bf16.mxu0 %v2024_v24  ;;  %v2078_v61 = vld [vmem:[%s2805_s1 + $0x2d4] ss:$24 sps:$4 sm:$0xff]   ;;  %v2082_v63 = vld [vmem:[%s2805_s1 + $0x2d0] ss:$24 sps:$4 sm:$0xff]   ;;  %v2092_v4 = vld [vmem:[%s2805_s1 + $0x44] ss:$24 sps:$4 sm:$0xff]  }
  0x21   : > { %1044 = vmatprep.subr.bf16.mxu1 %v2026_v25  ;;  %v2083_v0 = vld [vmem:[%s2805_s1 + $0x2d8] ss:$24 sps:$4 sm:$0xff]   ;;  %v2089_v1 = vld [vmem:[%s2805_s1 + $0x14] ss:$24 sps:$4 sm:$0xff]   ;;  %v2466_v2 = vld [vmem:[%s2398_s19] ss:$8 sps:$4 sm:$0xff]  }
  0x22   : > { %v2087_v3 = vld [vmem:[%s2805_s1 + $0x10] ss:$24 sps:$4 sm:$0xff]   ;;  %v2475_v5 = vld [vmem:[%s2398_s19 + $0x14] ss:$8 sps:$4 sm:$0xff]   ;;  %v2090_v6 = vld [vmem:[%s2805_s1 + $0x40] ss:$24 sps:$4 sm:$0xff]  }
  0x23   : > { %932 = vmatpush1.bf16.msra.mxu0 %v2028_v26  ;;  %v2098_v7 = vld [vmem:[%s2805_s1 + $0x74] ss:$24 sps:$4 sm:$0xff]   ;;  %v2488_v8 = vld [vmem:[%s2398_s19 + $0x10] ss:$8 sps:$4 sm:$0xff]   ;;  %v2101_v10 = vld [vmem:[%s2805_s1 + $0xa4] ss:$24 sps:$4 sm:$0xff]  }
  0x24   : > { %1045 = vmatpush1.bf16.msra.mxu1 %v2029_v27  ;;  %933 = vmatprep.subr.bf16.mxu0 %v2030_v28  ;;  %v2096_v9 = vld [vmem:[%s2805_s1 + $0x70] ss:$24 sps:$4 sm:$0xff]   ;;  %v2497_v11 = vld [vmem:[%s2398_s19 + $0x24] ss:$8 sps:$4 sm:$0xff]   ;;  %v2099_v12 = vld [vmem:[%s2805_s1 + $0xa0] ss:$24 sps:$4 sm:$0xff]  }
  0x25   : > { %1046 = vmatprep.subr.bf16.mxu1 %v2032_v29  ;;  %v2107_v13 = vld [vmem:[%s2805_s1 + $0xd4] ss:$24 sps:$4 sm:$0xff]   ;;  %v2510_v14 = vld [vmem:[%s2398_s19 + $0x20] ss:$8 sps:$4 sm:$0xff]   ;;  %v2110_v16 = vld [vmem:[%s2805_s1 + $0x104] ss:$24 sps:$4 sm:$0xff]  }
  0x26   : > { %v2105_v15 = vld [vmem:[%s2805_s1 + $0xd0] ss:$24 sps:$4 sm:$0xff]   ;;  %v2519_v17 = vld [vmem:[%s2398_s19 + $0x34] ss:$8 sps:$4 sm:$0xff]   ;;  %v2108_v18 = vld [vmem:[%s2805_s1 + $0x100] ss:$24 sps:$4 sm:$0xff]  }
  0x27   : > { %934 = vmatpush1.bf16.msra.mxu0 %v2034_v30  ;;  %v2116_v19 = vld [vmem:[%s2805_s1 + $0x134] ss:$24 sps:$4 sm:$0xff]   ;;  %v2532_v20 = vld [vmem:[%s2398_s19 + $0x30] ss:$8 sps:$4 sm:$0xff]   ;;  %v2119_v22 = vld [vmem:[%s2805_s1 + $0x164] ss:$24 sps:$4 sm:$0xff]  }
  0x28   : > { %1047 = vmatpush1.bf16.msra.mxu1 %v2035_v31  ;;  %935 = vmatprep.subr.bf16.mxu0 %v2036_v32  ;;  %v2114_v21 = vld [vmem:[%s2805_s1 + $0x130] ss:$24 sps:$4 sm:$0xff]   ;;  %v2541_v23 = vld [vmem:[%s2398_s19 + $0x44] ss:$8 sps:$4 sm:$0xff]   ;;  %v2117_v24 = vld [vmem:[%s2805_s1 + $0x160] ss:$24 sps:$4 sm:$0xff]  }
  0x29   : > { %1048 = vmatprep.subr.bf16.mxu1 %v2038_v33  ;;  %v2125_v25 = vld [vmem:[%s2805_s1 + $0x194] ss:$24 sps:$4 sm:$0xff]   ;;  %v2554_v26 = vld [vmem:[%s2398_s19 + $0x40] ss:$8 sps:$4 sm:$0xff]   ;;  %v2128_v28 = vld [vmem:[%s2805_s1 + $0x1c4] ss:$24 sps:$4 sm:$0xff]  }
  0x2a   : > { %v2123_v27 = vld [vmem:[%s2805_s1 + $0x190] ss:$24 sps:$4 sm:$0xff]   ;;  %v2563_v29 = vld [vmem:[%s2398_s19 + $0x54] ss:$8 sps:$4 sm:$0xff]   ;;  %v2126_v30 = vld [vmem:[%s2805_s1 + $0x1c0] ss:$24 sps:$4 sm:$0xff]  }
  0x2b   : > { %936 = vmatpush1.bf16.msra.mxu0 %v2040_v34  ;;  %v2134_v31 = vld [vmem:[%s2805_s1 + $0x1f4] ss:$24 sps:$4 sm:$0xff]   ;;  %v2131_v32 = vld [vmem:[%s2398_s19 + $0x50] ss:$8 sps:$4 sm:$0xff]   ;;  %v2137_v34 = vld [vmem:[%s2805_s1 + $0x224] ss:$24 sps:$4 sm:$0xff]  }
  0x2c   : > { %1049 = vmatpush1.bf16.msra.mxu1 %v2041_v35  ;;  %937 = vmatprep.subr.bf16.mxu0 %v2042_v36  ;;  %v2132_v33 = vld [vmem:[%s2805_s1 + $0x1f0] ss:$24 sps:$4 sm:$0xff]   ;;  %v2138_v35 = vld [vmem:[%s2398_s19 + $0x64] ss:$8 sps:$4 sm:$0xff]   ;;  %v2135_v36 = vld [vmem:[%s2805_s1 + $0x220] ss:$24 sps:$4 sm:$0xff]  }
  0x2d   : > { %1050 = vmatprep.subr.bf16.mxu1 %v2044_v37  ;;  %v2143_v37 = vld [vmem:[%s2805_s1 + $0x254] ss:$24 sps:$4 sm:$0xff]  }
  0x2f   : > { %938 = vmatpush1.bf16.msra.mxu0 %v2046_v38  ;;  %v2140_v38 = vld [vmem:[%s2398_s19 + $0x60] ss:$8 sps:$4 sm:$0xff]  }
  0x30   : > { %1051 = vmatpush1.bf16.msra.mxu1 %v2047_v39  ;;  %939 = vmatprep.subr.bf16.mxu0 %v2048_v40  ;;  %v2141_v39 = vld [vmem:[%s2805_s1 + $0x250] ss:$24 sps:$4 sm:$0xff]   ;;  %v2146_v40 = vld [vmem:[%s2805_s1 + $0x284] ss:$24 sps:$4 sm:$0xff]  }
  0x31   : > { %1052 = vmatprep.subr.bf16.mxu1 %v2050_v41  ;;  %v2147_v41 = vld [vmem:[%s2398_s19 + $0x74] ss:$8 sps:$4 sm:$0xff]  }
  0x33   : > { %940 = vmatpush1.bf16.msra.mxu0 %v2052_v42  ;;  %v2144_v42 = vld [vmem:[%s2805_s1 + $0x280] ss:$24 sps:$4 sm:$0xff]  }
  0x34   : > { %1053 = vmatpush1.bf16.msra.mxu1 %v2053_v43  ;;  %941 = vmatprep.subr.bf16.mxu0 %v2054_v44  ;;  %v2152_v43 = vld [vmem:[%s2805_s1 + $0x2b4] ss:$24 sps:$4 sm:$0xff]   ;;  %v2149_v44 = vld [vmem:[%s2398_s19 + $0x70] ss:$8 sps:$4 sm:$0xff]  }
  0x35   : > { %1054 = vmatprep.subr.bf16.mxu1 %v2056_v45  ;;  %v2150_v45 = vld [vmem:[%s2805_s1 + $0x2b0] ss:$24 sps:$4 sm:$0xff]  }
  0x37   : > { %942 = vmatpush1.bf16.msra.mxu0 %v2058_v46  ;;  %v2155_v46 = vld [vmem:[%s2805_s1 + $0x2e4] ss:$24 sps:$4 sm:$0xff]  }
  0x38   : > { %1055 = vmatpush1.bf16.msra.mxu1 %v2059_v47  ;;  %943 = vmatprep.subr.bf16.mxu0 %v2060_v49  ;;  %v2153_v47 = vld [vmem:[%s2805_s1 + $0x2e0] ss:$24 sps:$4 sm:$0xff]  }
  0x39   : > { %1056 = vmatprep.subr.bf16.mxu1 %v2062_v50 }
  0x3b   : > { %944 = vmatpush1.bf16.msra.mxu0 %v2064_v51  ;;  %v327_v51 = vld [vmem:[%s2806_s2] sm:$0x3f] }
  0x3c   : > { %1057 = vmatpush1.bf16.msra.mxu1 %v2065_v52  ;;  %945 = vmatprep.subr.bf16.mxu0 %v2066_v53 }
  0x3d   : > { %1058 = vmatprep.subr.bf16.mxu1 %v2068_v54 }
  0x3f   : > { %946 = vmatpush1.bf16.msra.mxu0 %v2070_v55 }
  0x40   : > { %1059 = vmatpush1.bf16.msra.mxu1 %v2071_v56  ;;  %947 = vmatprep.subr.bf16.mxu0 %v2072_v57 }
  0x41   : > { %1060 = vmatprep.subr.bf16.mxu1 %v2074_v58 }
  0x43   : > { %948 = vmatpush1.bf16.msra.mxu0 %v2076_v59 }
  0x44   : > { %1061 = vmatpush1.bf16.msra.mxu1 %v2077_v60  ;;  %949 = vmatprep.subr.bf16.mxu0 %v2078_v61 }
  0x45   : > { %1062 = vmatprep.subr.bf16.mxu1 %v2080_v62 }
  0x47   : > { %950 = vmatpush1.bf16.msra.mxu0 %v2082_v63 }
  0x48   : > { %1063 = vmatpush1.bf16.msra.mxu1 %v2083_v0  ;;  %1145 = vmatprep.subr.bf16.mxu0 %v2089_v1 }
  0x49   : > { %1914 = vmatprep.subr.bf16.mxu1 %v2089_v1 }
  0x4a   : > { %952 = vmatmul.mubr.bf16.vlgmr.msra.gmra.mrb[0].mxu0 %v2466_v2 }
  0x4b   : > { %1065 = vmatmul.mubr.bf16.vlgmr.msra.gmra.mrb[0].mxu1 %v2466_v2  ;;  %1146 = vmatpush1.bf16.msra.mxu0 %v2087_v3 }
  0x4c   : > { %1930 = vmatpush1.bf16.msra.mxu1 %v2087_v3  ;;  %1147 = vmatprep.subr.bf16.mxu0 %v2092_v4 }
  0x4d   : > { %1915 = vmatprep.subr.bf16.mxu1 %v2092_v4  ;;  %961 = vmatprep.mubr.bf16.mxu0 %v2475_v5 }
  0x4e   : > { %1074 = vmatprep.mubr.bf16.mxu1 %v2475_v5 }
  0x4f   : > { %1148 = vmatpush1.bf16.msra.mxu0 %v2090_v6 }
  0x50   : > { %1931 = vmatpush1.bf16.msra.mxu1 %v2090_v6  ;;  %1149 = vmatprep.subr.bf16.mxu0 %v2098_v7 }
  0x51   : > { %1916 = vmatprep.subr.bf16.mxu1 %v2098_v7 }
  0x52   : > { %962 = vmatmul.mubr.bf16.gmra.mrb[4].mxu0 %v2488_v8 }
  0x53   : > { %1075 = vmatmul.mubr.bf16.gmra.mrb[4].mxu1 %v2488_v8  ;;  %1150 = vmatpush1.bf16.msra.mxu0 %v2096_v9 }
  0x54   : > { %1932 = vmatpush1.bf16.msra.mxu1 %v2096_v9  ;;  %1151 = vmatprep.subr.bf16.mxu0 %v2101_v10 }
  0x55   : > { %1917 = vmatprep.subr.bf16.mxu1 %v2101_v10  ;;  %971 = vmatprep.mubr.bf16.mxu0 %v2497_v11 }
  0x56   : > { %1084 = vmatprep.mubr.bf16.mxu1 %v2497_v11 }
  0x57   : > { %1152 = vmatpush1.bf16.msra.mxu0 %v2099_v12 }
  0x58   : > { %1933 = vmatpush1.bf16.msra.mxu1 %v2099_v12  ;;  %1153 = vmatprep.subr.bf16.mxu0 %v2107_v13 }
  0x59   : > { %1918 = vmatprep.subr.bf16.mxu1 %v2107_v13 }
  0x5a   : > { %972 = vmatmul.mubr.bf16.gmra.mrb[8].mxu0 %v2510_v14 }
  0x5b   : > { %1085 = vmatmul.mubr.bf16.gmra.mrb[8].mxu1 %v2510_v14  ;;  %1154 = vmatpush1.bf16.msra.mxu0 %v2105_v15 }
  0x5c   : > { %1934 = vmatpush1.bf16.msra.mxu1 %v2105_v15  ;;  %1155 = vmatprep.subr.bf16.mxu0 %v2110_v16 }
  0x5d   : > { %1919 = vmatprep.subr.bf16.mxu1 %v2110_v16  ;;  %981 = vmatprep.mubr.bf16.mxu0 %v2519_v17 }
  0x5e   : > { %1094 = vmatprep.mubr.bf16.mxu1 %v2519_v17 }
  0x5f   : > { %1156 = vmatpush1.bf16.msra.mxu0 %v2108_v18 }
  0x60   : > { %1935 = vmatpush1.bf16.msra.mxu1 %v2108_v18  ;;  %1157 = vmatprep.subr.bf16.mxu0 %v2116_v19 }
  0x61   : > { %1920 = vmatprep.subr.bf16.mxu1 %v2116_v19 }
  0x62   : > { %982 = vmatmul.mubr.bf16.gmra.mrb[12].mxu0 %v2532_v20 }
  0x63   : > { %1095 = vmatmul.mubr.bf16.gmra.mrb[12].mxu1 %v2532_v20  ;;  %1158 = vmatpush1.bf16.msra.mxu0 %v2114_v21 }
  0x64   : > { %1936 = vmatpush1.bf16.msra.mxu1 %v2114_v21  ;;  %1159 = vmatprep.subr.bf16.mxu0 %v2119_v22 }
  0x65   : > { %1921 = vmatprep.subr.bf16.mxu1 %v2119_v22  ;;  %991 = vmatprep.mubr.bf16.mxu0 %v2541_v23 }
  0x66   : > { %1104 = vmatprep.mubr.bf16.mxu1 %v2541_v23 }
  0x67   : > { %1160 = vmatpush1.bf16.msra.mxu0 %v2117_v24 }
  0x68   : > { %1937 = vmatpush1.bf16.msra.mxu1 %v2117_v24  ;;  %1161 = vmatprep.subr.bf16.mxu0 %v2125_v25 }
  0x69   : > { %1922 = vmatprep.subr.bf16.mxu1 %v2125_v25 }
  0x6a   : > { %992 = vmatmul.mubr.bf16.gmra.mrb[16].mxu0 %v2554_v26 }
  0x6b   : > { %1105 = vmatmul.mubr.bf16.gmra.mrb[16].mxu1 %v2554_v26  ;;  %1162 = vmatpush1.bf16.msra.mxu0 %v2123_v27 }
  0x6c   : > { %1938 = vmatpush1.bf16.msra.mxu1 %v2123_v27  ;;  %1163 = vmatprep.subr.bf16.mxu0 %v2128_v28 }
  0x6d   : > { %1923 = vmatprep.subr.bf16.mxu1 %v2128_v28  ;;  %1001 = vmatprep.mubr.bf16.mxu0 %v2563_v29 }
  0x6e   : > { %1114 = vmatprep.mubr.bf16.mxu1 %v2563_v29 }
  0x6f   : > { %1164 = vmatpush1.bf16.msra.mxu0 %v2126_v30 }
  0x70   : > { %1939 = vmatpush1.bf16.msra.mxu1 %v2126_v30  ;;  %1165 = vmatprep.subr.bf16.mxu0 %v2134_v31 }
  0x71   : > { %1924 = vmatprep.subr.bf16.mxu1 %v2134_v31 }
  0x72   : > { %1002 = vmatmul.mubr.bf16.gmra.mrb[20].mxu0 %v2131_v32 }
  0x73   : > { %1115 = vmatmul.mubr.bf16.gmra.mrb[20].mxu1 %v2131_v32  ;;  %1166 = vmatpush1.bf16.msra.mxu0 %v2132_v33 }
  0x74   : > { %1940 = vmatpush1.bf16.msra.mxu1 %v2132_v33  ;;  %1167 = vmatprep.subr.bf16.mxu0 %v2137_v34 }
  0x75   : > { %1925 = vmatprep.subr.bf16.mxu1 %v2137_v34  ;;  %1011 = vmatprep.mubr.bf16.mxu0 %v2138_v35 }
  0x76   : > { %1124 = vmatprep.mubr.bf16.mxu1 %v2138_v35 }
  0x77   : > { %1168 = vmatpush1.bf16.msra.mxu0 %v2135_v36 }
  0x78   : > { %1941 = vmatpush1.bf16.msra.mxu1 %v2135_v36  ;;  %1169 = vmatprep.subr.bf16.mxu0 %v2143_v37 }
  0x79   : > { %1926 = vmatprep.subr.bf16.mxu1 %v2143_v37 }
  0x7a   : > { %1012 = vmatmul.mubr.bf16.gmra.mrb[24].mxu0 %v2140_v38 }
  0x7b   : > { %1125 = vmatmul.mubr.bf16.gmra.mrb[24].mxu1 %v2140_v38  ;;  %1170 = vmatpush1.bf16.msra.mxu0 %v2141_v39 }
  0x7c   : > { %1942 = vmatpush1.bf16.msra.mxu1 %v2141_v39  ;;  %1171 = vmatprep.subr.bf16.mxu0 %v2146_v40 }
  0x7d   : > { %1927 = vmatprep.subr.bf16.mxu1 %v2146_v40  ;;  %1021 = vmatprep.mubr.bf16.mxu0 %v2147_v41 }
  0x7e   : > { %1134 = vmatprep.mubr.bf16.mxu1 %v2147_v41 }
  0x7f   : > { %1172 = vmatpush1.bf16.msra.mxu0 %v2144_v42 }
  0x80   : > { %1943 = vmatpush1.bf16.msra.mxu1 %v2144_v42  ;;  %1173 = vmatprep.subr.bf16.mxu0 %v2152_v43 }
  0x81   : > { %1928 = vmatprep.subr.bf16.mxu1 %v2152_v43 }
  0x82   : > { %1022 = vmatmul.mubr.bf16.gmra.mrb[28].mxu0 %v2149_v44 }
  0x83   : > { %1135 = vmatmul.mubr.bf16.gmra.mrb[28].mxu1 %v2149_v44  ;;  %1174 = vmatpush1.bf16.msra.mxu0 %v2150_v45 }
  0x84   : > { %1944 = vmatpush1.bf16.msra.mxu1 %v2150_v45  ;;  %1175 = vmatprep.subr.bf16.mxu0 %v2155_v46 }
  0x85   : > { %1929 = vmatprep.subr.bf16.mxu1 %v2155_v46  ;;  %1177 = vmatprep.mubr.bf16.mxu0 %v2410_v48  ;;  %v329_v48 = vlaneseq }
  0x86   : > { %1217 = vmatprep.mubr.bf16.mxu1 %v2541_v23 }
  0x87   : > { %1176 = vmatpush1.bf16.msra.mxu0 %v2153_v47  ;;  %v330_v49 = vshrl.u32 %v329_v48, 7 }
  0x88   : > { %1945 = vmatpush1.bf16.msra.mxu1 %v2153_v47 }
  0x89   : > { %v347_v50 = vsub.s32 4, %v330_v49  ;;  %v351_v52 = vsub.s32 5, %v330_v49  ;;  %v331_v55 = vsub.s32 0, %v330_v49  ;;  %v339_v56 = vsub.s32 2, %v330_v49 }
  0x8a   : > { %1178 = vmatmul.mubr.bf16.vlgmr.msra.gmra.mrb[32].mxu0 %v2466_v2  ;;  %v335_v57 = vsub.s32 1, %v330_v49  ;;  %v343_v58 = vsub.s32 3, %v330_v49 }
  0x8b   : > { %1218 = vmatmul.mubr.bf16.vlgmr.msra.gmra.mrb[32].mxu1 %v2554_v26  ;;  %1187 = vmatprep.mubr.bf16.mxu0 %v2475_v5  ;;  %v2627_v53 = vrot.slane %v327_v51, %v347_v50  ;;  %v2629_v54 = vrot.slane %v327_v51, %v351_v52  ;;  %v2631_v59 = vrot.slane %v327_v51, %v331_v55 }
  0x8c   : > { %1227 = vmatprep.mubr.bf16.mxu1 %v2563_v29  ;;  %v2633_v60 = vrot.slane %v327_v51, %v339_v56  ;;  %v2635_v61 = vrot.slane %v327_v51, %v335_v57  ;;  %v2637_v62 = vrot.slane %v327_v51, %v343_v58 }
  0x92   : > { %1188 = vmatmul.mubr.bf16.gmra.mrb[36].mxu0 %v2488_v8 }
  0x93   : > { %1228 = vmatmul.mubr.bf16.gmra.mrb[36].mxu1 %v2131_v32  ;;  %1197 = vmatprep.mubr.bf16.mxu0 %v2497_v11 }
  0x94   : > { %1237 = vmatprep.mubr.bf16.mxu1 %v2138_v35 }
  0x9a   : > { %1198 = vmatmul.mubr.bf16.gmra.mrb[40].mxu0 %v2510_v14 }
  0x9b   : > { %1238 = vmatmul.mubr.bf16.gmra.mrb[40].mxu1 %v2140_v38  ;;  %1207 = vmatprep.mubr.bf16.mxu0 %v2519_v17 }
  0x9c   : > { %1247 = vmatprep.mubr.bf16.mxu1 %v2147_v41 }
  0xa2   : > { %1208 = vmatmul.mubr.bf16.gmra.mrb[44].mxu0 %v2532_v20 }
  0xa3   : > { %1248 = vmatmul.mubr.bf16.gmra.mrb[44].mxu1 %v2149_v44 }
 0x11d   : > { %v953_v63 = vpop.f32.mrb[0].mxu0 }
 0x11e   : > { %v1066_v0 = vpop.f32.mrb[0].mxu1  ;;  %v954_v1 = vadd.f32 %v953_v63, %v2631_v59  ;;  %v955_v3 = vpop.f32.mrb[1].mxu0 }
 0x11f   : > { %v1067_v2 = vadd.f32 %v1066_v0, %v2633_v60  ;;  %v1068_v4 = vpop.f32.mrb[1].mxu1  ;;  %v956_v5 = vadd.f32 %v955_v3, %v2635_v61  ;;  %v957_v7 = vpop.f32.mrb[2].mxu0 }
 0x120   : > { %v1069_v6 = vadd.f32 %v1068_v4, %v2637_v62  ;;  %v1070_v8 = vpop.f32.mrb[2].mxu1  ;;  %v958_v9 = vadd.f32 %v957_v7, %v2631_v59  ;;  %v959_v11 = vpop.f32.mrb[3].mxu0 }
 0x121   : > { %v1071_v10 = vadd.f32 %v1070_v8, %v2633_v60  ;;  %v1072_v12 = vpop.f32.mrb[3].mxu1  ;;  %v1866_v13 = vpack.c.bf16 %v956_v5, %v954_v1  ;;  %v960_v15 = vadd.f32 %v959_v11, %v2635_v61 }
 0x122   : > { %v1867_v14 = vpack.c.bf16 %v1069_v6, %v1067_v2  ;;  %v1073_v16 = vadd.f32 %v1072_v12, %v2637_v62 }
 0x123   : > { %1546 = vst [vmem:[%s2647_s21] sm:$0xff] %v1866_v13  ;;  %v1869_v17 = vpack.c.bf16 %v960_v15, %v958_v9 }
 0x124   : > { %1547 = vst [vmem:[%s2647_s21 + $0x8] sm:$0xff] %v1867_v14  ;;  %v1870_v18 = vpack.c.bf16 %v1073_v16, %v1071_v10 }
 0x125   : > { %1549 = vst [vmem:[%s2647_s21 + $0x18] sm:$0xff] %v1869_v17  ;;  %v963_v19 = vpop.f32.mrb[4].mxu0 }
 0x126   : > { %1550 = vst [vmem:[%s2647_s21 + $0x20] sm:$0xff] %v1870_v18  ;;  %v1076_v20 = vpop.f32.mrb[4].mxu1  ;;  %v964_v21 = vadd.f32 %v963_v19, %v2631_v59  ;;  %v965_v23 = vpop.f32.mrb[5].mxu0 }
 0x127   : > { %v1077_v22 = vadd.f32 %v1076_v20, %v2633_v60  ;;  %v1078_v24 = vpop.f32.mrb[5].mxu1  ;;  %v966_v25 = vadd.f32 %v965_v23, %v2635_v61  ;;  %v967_v27 = vpop.f32.mrb[6].mxu0 }
 0x128   : > { %v1079_v26 = vadd.f32 %v1078_v24, %v2637_v62  ;;  %v1080_v28 = vpop.f32.mrb[6].mxu1  ;;  %v968_v29 = vadd.f32 %v967_v27, %v2631_v59  ;;  %v969_v31 = vpop.f32.mrb[7].mxu0 }
 0x129   : > { %v1081_v30 = vadd.f32 %v1080_v28, %v2633_v60  ;;  %v1082_v32 = vpop.f32.mrb[7].mxu1  ;;  %v1872_v33 = vpack.c.bf16 %v966_v25, %v964_v21  ;;  %v970_v35 = vadd.f32 %v969_v31, %v2635_v61 }
 0x12a   : > { %v1873_v34 = vpack.c.bf16 %v1079_v26, %v1077_v22  ;;  %v1083_v36 = vadd.f32 %v1082_v32, %v2637_v62 }
 0x12b   : > { %1552 = vst [vmem:[%s2647_s21 + $0x30] sm:$0xff] %v1872_v33  ;;  %v1875_v37 = vpack.c.bf16 %v970_v35, %v968_v29 }
 0x12c   : > { %1553 = vst [vmem:[%s2647_s21 + $0x38] sm:$0xff] %v1873_v34  ;;  %v1876_v38 = vpack.c.bf16 %v1083_v36, %v1081_v30 }
 0x12d   : > { %1555 = vst [vmem:[%s2647_s21 + $0x48] sm:$0xff] %v1875_v37  ;;  %v973_v39 = vpop.f32.mrb[8].mxu0 }
 0x12e   : > { %1556 = vst [vmem:[%s2647_s21 + $0x50] sm:$0xff] %v1876_v38  ;;  %v1086_v40 = vpop.f32.mrb[8].mxu1  ;;  %v974_v41 = vadd.f32 %v973_v39, %v2631_v59  ;;  %v975_v43 = vpop.f32.mrb[9].mxu0 }
 0x12f   : > { %v1087_v42 = vadd.f32 %v1086_v40, %v2633_v60  ;;  %v1088_v44 = vpop.f32.mrb[9].mxu1  ;;  %v976_v45 = vadd.f32 %v975_v43, %v2635_v61  ;;  %v977_v47 = vpop.f32.mrb[10].mxu0 }
 0x130   : > { %v1089_v46 = vadd.f32 %v1088_v44, %v2637_v62  ;;  %v1090_v48 = vpop.f32.mrb[10].mxu1  ;;  %v978_v49 = vadd.f32 %v977_v47, %v2631_v59  ;;  %v979_v51 = vpop.f32.mrb[11].mxu0 }
 0x131   : > { %v1091_v50 = vadd.f32 %v1090_v48, %v2633_v60  ;;  %v1092_v52 = vpop.f32.mrb[11].mxu1  ;;  %v1878_v55 = vpack.c.bf16 %v976_v45, %v974_v41  ;;  %v980_v57 = vadd.f32 %v979_v51, %v2635_v61 }
 0x132   : > { %v1879_v56 = vpack.c.bf16 %v1089_v46, %v1087_v42  ;;  %v1093_v58 = vadd.f32 %v1092_v52, %v2637_v62 }
 0x133   : > { %1558 = vst [vmem:[%s2647_s21 + $0x60] sm:$0xff] %v1878_v55  ;;  %v1881_v63 = vpack.c.bf16 %v980_v57, %v978_v49 }
 0x134   : > { %1559 = vst [vmem:[%s2647_s21 + $0x68] sm:$0xff] %v1879_v56  ;;  %v1882_v0 = vpack.c.bf16 %v1093_v58, %v1091_v50 }
 0x135   : > { %1561 = vst [vmem:[%s2647_s21 + $0x78] sm:$0xff] %v1881_v63  ;;  %v983_v1 = vpop.f32.mrb[12].mxu0 }
 0x136   : > { %1562 = vst [vmem:[%s2647_s21 + $0x80] sm:$0xff] %v1882_v0  ;;  %v1096_v2 = vpop.f32.mrb[12].mxu1  ;;  %v984_v3 = vadd.f32 %v983_v1, %v2631_v59  ;;  %v985_v5 = vpop.f32.mrb[13].mxu0 }
 0x137   : > { %v1097_v4 = vadd.f32 %v1096_v2, %v2633_v60  ;;  %v1098_v6 = vpop.f32.mrb[13].mxu1  ;;  %v986_v7 = vadd.f32 %v985_v5, %v2635_v61  ;;  %v987_v9 = vpop.f32.mrb[14].mxu0 }
 0x138   : > { %v1099_v8 = vadd.f32 %v1098_v6, %v2637_v62  ;;  %v1100_v10 = vpop.f32.mrb[14].mxu1  ;;  %v988_v11 = vadd.f32 %v987_v9, %v2631_v59  ;;  %v989_v13 = vpop.f32.mrb[15].mxu0 }
 0x139   : > { %v1101_v12 = vadd.f32 %v1100_v10, %v2633_v60  ;;  %v1102_v14 = vpop.f32.mrb[15].mxu1  ;;  %v1884_v15 = vpack.c.bf16 %v986_v7, %v984_v3  ;;  %v990_v17 = vadd.f32 %v989_v13, %v2635_v61 }
 0x13a   : > { %v1885_v16 = vpack.c.bf16 %v1099_v8, %v1097_v4  ;;  %v1103_v18 = vadd.f32 %v1102_v14, %v2637_v62 }
 0x13b   : > { %1564 = vst [vmem:[%s2647_s21 + $0x90] sm:$0xff] %v1884_v15  ;;  %v1887_v19 = vpack.c.bf16 %v990_v17, %v988_v11 }
 0x13c   : > { %1565 = vst [vmem:[%s2647_s21 + $0x98] sm:$0xff] %v1885_v16  ;;  %v1888_v20 = vpack.c.bf16 %v1103_v18, %v1101_v12 }
 0x13d   : > { %1567 = vst [vmem:[%s2647_s21 + $0xa8] sm:$0xff] %v1887_v19  ;;  %v993_v21 = vpop.f32.mrb[16].mxu0 }
 0x13e   : > { %1568 = vst [vmem:[%s2647_s21 + $0xb0] sm:$0xff] %v1888_v20  ;;  %v1106_v22 = vpop.f32.mrb[16].mxu1  ;;  %v994_v23 = vadd.f32 %v993_v21, %v2631_v59  ;;  %v995_v25 = vpop.f32.mrb[17].mxu0 }
 0x13f   : > { %v1107_v24 = vadd.f32 %v1106_v22, %v2633_v60  ;;  %v1108_v26 = vpop.f32.mrb[17].mxu1  ;;  %v996_v27 = vadd.f32 %v995_v25, %v2635_v61  ;;  %v997_v29 = vpop.f32.mrb[18].mxu0 }
 0x140   : > { %v1109_v28 = vadd.f32 %v1108_v26, %v2637_v62  ;;  %v1110_v30 = vpop.f32.mrb[18].mxu1  ;;  %v998_v31 = vadd.f32 %v997_v29, %v2631_v59  ;;  %v999_v33 = vpop.f32.mrb[19].mxu0 }
 0x141   : > { %v1111_v32 = vadd.f32 %v1110_v30, %v2633_v60  ;;  %v1112_v34 = vpop.f32.mrb[19].mxu1  ;;  %v1890_v35 = vpack.c.bf16 %v996_v27, %v994_v23  ;;  %v1000_v37 = vadd.f32 %v999_v33, %v2635_v61 }
 0x142   : > { %v1891_v36 = vpack.c.bf16 %v1109_v28, %v1107_v24  ;;  %v1113_v38 = vadd.f32 %v1112_v34, %v2637_v62 }
 0x143   : > { %1570 = vst [vmem:[%s2647_s21 + $0xc0] sm:$0xff] %v1890_v35  ;;  %v1893_v39 = vpack.c.bf16 %v1000_v37, %v998_v31 }
 0x144   : > { %1571 = vst [vmem:[%s2647_s21 + $0xc8] sm:$0xff] %v1891_v36  ;;  %v1894_v40 = vpack.c.bf16 %v1113_v38, %v1111_v32 }
 0x145   : > { %1573 = vst [vmem:[%s2647_s21 + $0xd8] sm:$0xff] %v1893_v39  ;;  %v1003_v41 = vpop.f32.mrb[20].mxu0 }
 0x146   : > { %1574 = vst [vmem:[%s2647_s21 + $0xe0] sm:$0xff] %v1894_v40  ;;  %v1116_v42 = vpop.f32.mrb[20].mxu1  ;;  %v1004_v43 = vadd.f32 %v1003_v41, %v2631_v59  ;;  %v1005_v45 = vpop.f32.mrb[21].mxu0 }
 0x147   : > { %v1117_v44 = vadd.f32 %v1116_v42, %v2633_v60  ;;  %v1118_v46 = vpop.f32.mrb[21].mxu1  ;;  %v1006_v47 = vadd.f32 %v1005_v45, %v2635_v61  ;;  %v1007_v49 = vpop.f32.mrb[22].mxu0 }
 0x148   : > { %v1119_v48 = vadd.f32 %v1118_v46, %v2637_v62  ;;  %v1120_v50 = vpop.f32.mrb[22].mxu1  ;;  %v1008_v51 = vadd.f32 %v1007_v49, %v2631_v59  ;;  %v1009_v55 = vpop.f32.mrb[23].mxu0 }
 0x149   : > { %v1121_v52 = vadd.f32 %v1120_v50, %v2633_v60  ;;  %v1122_v56 = vpop.f32.mrb[23].mxu1  ;;  %v1896_v57 = vpack.c.bf16 %v1006_v47, %v1004_v43  ;;  %v1010_v63 = vadd.f32 %v1009_v55, %v2635_v61 }
 0x14a   : > { %v1897_v58 = vpack.c.bf16 %v1119_v48, %v1117_v44  ;;  %v1123_v0 = vadd.f32 %v1122_v56, %v2637_v62 }
 0x14b   : > { %1576 = vst [vmem:[%s2647_s21 + $0xf0] sm:$0xff] %v1896_v57  ;;  %v1899_v1 = vpack.c.bf16 %v1010_v63, %v1008_v51 }
 0x14c   : > { %1577 = vst [vmem:[%s2647_s21 + $0xf8] sm:$0xff] %v1897_v58  ;;  %v1900_v2 = vpack.c.bf16 %v1123_v0, %v1121_v52 }
 0x14d   : > { %1579 = vst [vmem:[%s2647_s21 + $0x108] sm:$0xff] %v1899_v1  ;;  %v1013_v3 = vpop.f32.mrb[24].mxu0 }
 0x14e   : > { %1580 = vst [vmem:[%s2647_s21 + $0x110] sm:$0xff] %v1900_v2  ;;  %v1126_v4 = vpop.f32.mrb[24].mxu1  ;;  %v1014_v5 = vadd.f32 %v1013_v3, %v2631_v59  ;;  %v1015_v7 = vpop.f32.mrb[25].mxu0 }
 0x14f   : > { %v1127_v6 = vadd.f32 %v1126_v4, %v2633_v60  ;;  %v1128_v8 = vpop.f32.mrb[25].mxu1  ;;  %v1016_v9 = vadd.f32 %v1015_v7, %v2635_v61  ;;  %v1017_v11 = vpop.f32.mrb[26].mxu0 }
 0x150   : > { %v1129_v10 = vadd.f32 %v1128_v8, %v2637_v62  ;;  %v1130_v12 = vpop.f32.mrb[26].mxu1  ;;  %v1018_v13 = vadd.f32 %v1017_v11, %v2631_v59  ;;  %v1019_v15 = vpop.f32.mrb[27].mxu0 }
 0x151   : > { %v1131_v14 = vadd.f32 %v1130_v12, %v2633_v60  ;;  %v1132_v16 = vpop.f32.mrb[27].mxu1  ;;  %v1902_v17 = vpack.c.bf16 %v1016_v9, %v1014_v5  ;;  %v1020_v19 = vadd.f32 %v1019_v15, %v2635_v61 }
 0x152   : > { %v1903_v18 = vpack.c.bf16 %v1129_v10, %v1127_v6  ;;  %v1133_v20 = vadd.f32 %v1132_v16, %v2637_v62 }
 0x153   : > { %1582 = vst [vmem:[%s2647_s21 + $0x120] sm:$0xff] %v1902_v17  ;;  %v1905_v21 = vpack.c.bf16 %v1020_v19, %v1018_v13 }
 0x154   : > { %1583 = vst [vmem:[%s2647_s21 + $0x128] sm:$0xff] %v1903_v18  ;;  %v1906_v22 = vpack.c.bf16 %v1133_v20, %v1131_v14 }
 0x155   : > { %1585 = vst [vmem:[%s2647_s21 + $0x138] sm:$0xff] %v1905_v21  ;;  %v1023_v23 = vpop.f32.mrb[28].mxu0 }
 0x156   : > { %1586 = vst [vmem:[%s2647_s21 + $0x140] sm:$0xff] %v1906_v22  ;;  %v1136_v24 = vpop.f32.mrb[28].mxu1  ;;  %v1024_v25 = vadd.f32 %v1023_v23, %v2631_v59  ;;  %v1025_v27 = vpop.f32.mrb[29].mxu0 }
 0x157   : > { %v1137_v26 = vadd.f32 %v1136_v24, %v2633_v60  ;;  %v1138_v28 = vpop.f32.mrb[29].mxu1  ;;  %v1026_v29 = vadd.f32 %v1025_v27, %v2635_v61  ;;  %v1027_v31 = vpop.f32.mrb[30].mxu0 }
 0x158   : > { %v1139_v30 = vadd.f32 %v1138_v28, %v2637_v62  ;;  %v1140_v32 = vpop.f32.mrb[30].mxu1  ;;  %v1028_v33 = vadd.f32 %v1027_v31, %v2631_v59  ;;  %v1029_v35 = vpop.f32.mrb[31].mxu0 }
 0x159   : > { %v1141_v34 = vadd.f32 %v1140_v32, %v2633_v60  ;;  %v1142_v36 = vpop.f32.mrb[31].mxu1  ;;  %v1908_v37 = vpack.c.bf16 %v1026_v29, %v1024_v25  ;;  %v1030_v39 = vadd.f32 %v1029_v35, %v2635_v61 }
 0x15a   : > { %v1909_v38 = vpack.c.bf16 %v1139_v30, %v1137_v26  ;;  %v1143_v40 = vadd.f32 %v1142_v36, %v2637_v62 }
 0x15b   : > { %1588 = vst [vmem:[%s2647_s21 + $0x150] sm:$0xff] %v1908_v37  ;;  %v1911_v41 = vpack.c.bf16 %v1030_v39, %v1028_v33 }
 0x15c   : > { %1589 = vst [vmem:[%s2647_s21 + $0x158] sm:$0xff] %v1909_v38  ;;  %v1912_v42 = vpack.c.bf16 %v1143_v40, %v1141_v34 }
 0x15d   : > { %1591 = vst [vmem:[%s2647_s21 + $0x168] sm:$0xff] %v1911_v41  ;;  %v1179_v43 = vpop.f32.mrb[32].mxu0 }
 0x15e   : > { %1592 = vst [vmem:[%s2647_s21 + $0x170] sm:$0xff] %v1912_v42  ;;  %v1219_v44 = vpop.f32.mrb[32].mxu1  ;;  %v1180_v59 = vadd.f32 %v1179_v43, %v2627_v53  ;;  %v1181_v45 = vpop.f32.mrb[33].mxu0 }
 0x15f   : > { %v1220_v60 = vadd.f32 %v1219_v44, %v2627_v53  ;;  %v1221_v46 = vpop.f32.mrb[33].mxu1  ;;  %v1182_v61 = vadd.f32 %v1181_v45, %v2629_v54  ;;  %v1183_v47 = vpop.f32.mrb[34].mxu0 }
 0x160   : > { %v1222_v62 = vadd.f32 %v1221_v46, %v2629_v54  ;;  %v1223_v48 = vpop.f32.mrb[34].mxu1  ;;  %v1184_v49 = vadd.f32 %v1183_v47, %v2627_v53  ;;  %v1185_v51 = vpop.f32.mrb[35].mxu0 }
 0x161   : > { %v1224_v50 = vadd.f32 %v1223_v48, %v2627_v53  ;;  %v1225_v52 = vpop.f32.mrb[35].mxu1  ;;  %v1868_v55 = vpack.c.bf16 %v1182_v61, %v1180_v59  ;;  %v1186_v57 = vadd.f32 %v1185_v51, %v2629_v54 }
 0x162   : > { %v1892_v56 = vpack.c.bf16 %v1222_v62, %v1220_v60  ;;  %v1226_v58 = vadd.f32 %v1225_v52, %v2629_v54 }
 0x163   : > { %1548 = vst [vmem:[%s2647_s21 + $0x10] sm:$0xff] %v1868_v55  ;;  %v1871_v63 = vpack.c.bf16 %v1186_v57, %v1184_v49 }
 0x164   : > { %1572 = vst [vmem:[%s2647_s21 + $0xd0] sm:$0xff] %v1892_v56  ;;  %v1895_v0 = vpack.c.bf16 %v1226_v58, %v1224_v50 }
 0x165   : > { %1551 = vst [vmem:[%s2647_s21 + $0x28] sm:$0xff] %v1871_v63  ;;  %v1189_v1 = vpop.f32.mrb[36].mxu0 }
 0x166   : > { %1575 = vst [vmem:[%s2647_s21 + $0xe8] sm:$0xff] %v1895_v0  ;;  %v1229_v2 = vpop.f32.mrb[36].mxu1  ;;  %v1190_v3 = vadd.f32 %v1189_v1, %v2627_v53  ;;  %v1191_v5 = vpop.f32.mrb[37].mxu0 }
 0x167   : > { %v1230_v4 = vadd.f32 %v1229_v2, %v2627_v53  ;;  %v1231_v6 = vpop.f32.mrb[37].mxu1  ;;  %v1192_v7 = vadd.f32 %v1191_v5, %v2629_v54  ;;  %v1193_v9 = vpop.f32.mrb[38].mxu0 }
 0x168   : > { %v1232_v8 = vadd.f32 %v1231_v6, %v2629_v54  ;;  %v1233_v10 = vpop.f32.mrb[38].mxu1  ;;  %v1194_v11 = vadd.f32 %v1193_v9, %v2627_v53  ;;  %v1195_v13 = vpop.f32.mrb[39].mxu0 }
 0x169   : > { %v1234_v12 = vadd.f32 %v1233_v10, %v2627_v53  ;;  %v1235_v14 = vpop.f32.mrb[39].mxu1  ;;  %v1874_v15 = vpack.c.bf16 %v1192_v7, %v1190_v3  ;;  %v1196_v17 = vadd.f32 %v1195_v13, %v2629_v54 }
 0x16a   : > { %v1898_v16 = vpack.c.bf16 %v1232_v8, %v1230_v4  ;;  %v1236_v18 = vadd.f32 %v1235_v14, %v2629_v54 }
 0x16b   : > { %1554 = vst [vmem:[%s2647_s21 + $0x40] sm:$0xff] %v1874_v15  ;;  %v1877_v19 = vpack.c.bf16 %v1196_v17, %v1194_v11 }
 0x16c   : > { %1578 = vst [vmem:[%s2647_s21 + $0x100] sm:$0xff] %v1898_v16  ;;  %v1901_v20 = vpack.c.bf16 %v1236_v18, %v1234_v12 }
 0x16d   : > { %1557 = vst [vmem:[%s2647_s21 + $0x58] sm:$0xff] %v1877_v19  ;;  %v1199_v21 = vpop.f32.mrb[40].mxu0 }
 0x16e   : > { %1581 = vst [vmem:[%s2647_s21 + $0x118] sm:$0xff] %v1901_v20  ;;  %v1239_v22 = vpop.f32.mrb[40].mxu1  ;;  %v1200_v23 = vadd.f32 %v1199_v21, %v2627_v53  ;;  %v1201_v25 = vpop.f32.mrb[41].mxu0 }
 0x16f   : > { %v1240_v24 = vadd.f32 %v1239_v22, %v2627_v53  ;;  %v1241_v26 = vpop.f32.mrb[41].mxu1  ;;  %v1202_v27 = vadd.f32 %v1201_v25, %v2629_v54  ;;  %v1203_v29 = vpop.f32.mrb[42].mxu0 }
 0x170   : > { %v1242_v28 = vadd.f32 %v1241_v26, %v2629_v54  ;;  %v1243_v30 = vpop.f32.mrb[42].mxu1  ;;  %v1204_v31 = vadd.f32 %v1203_v29, %v2627_v53  ;;  %v1205_v33 = vpop.f32.mrb[43].mxu0 }
 0x171   : > { %v1244_v32 = vadd.f32 %v1243_v30, %v2627_v53  ;;  %v1245_v34 = vpop.f32.mrb[43].mxu1  ;;  %v1880_v35 = vpack.c.bf16 %v1202_v27, %v1200_v23  ;;  %v1206_v37 = vadd.f32 %v1205_v33, %v2629_v54 }
 0x172   : > { %v1904_v36 = vpack.c.bf16 %v1242_v28, %v1240_v24  ;;  %v1246_v38 = vadd.f32 %v1245_v34, %v2629_v54 }
 0x173   : > { %1560 = vst [vmem:[%s2647_s21 + $0x70] sm:$0xff] %v1880_v35  ;;  %v1883_v39 = vpack.c.bf16 %v1206_v37, %v1204_v31 }
 0x174   : > { %1584 = vst [vmem:[%s2647_s21 + $0x130] sm:$0xff] %v1904_v36  ;;  %v1907_v40 = vpack.c.bf16 %v1246_v38, %v1244_v32 }
 0x175   : > { %1563 = vst [vmem:[%s2647_s21 + $0x88] sm:$0xff] %v1883_v39  ;;  %v1209_v41 = vpop.f32.mrb[44].mxu0 }
 0x176   : > { %1587 = vst [vmem:[%s2647_s21 + $0x148] sm:$0xff] %v1907_v40  ;;  %v1249_v42 = vpop.f32.mrb[44].mxu1  ;;  %v1210_v43 = vadd.f32 %v1209_v41, %v2627_v53  ;;  %v1211_v59 = vpop.f32.mrb[45].mxu0 }
 0x177   : > { %v1250_v44 = vadd.f32 %v1249_v42, %v2627_v53  ;;  %v1251_v60 = vpop.f32.mrb[45].mxu1  ;;  %v1212_v45 = vadd.f32 %v1211_v59, %v2629_v54  ;;  %v1213_v61 = vpop.f32.mrb[46].mxu0 }
 0x178   : > { %v1252_v46 = vadd.f32 %v1251_v60, %v2629_v54  ;;  %v1253_v62 = vpop.f32.mrb[46].mxu1  ;;  %v1214_v47 = vadd.f32 %v1213_v61, %v2627_v53  ;;  %v1215_v49 = vpop.f32.mrb[47].mxu0 }
 0x179   : > { %v1254_v48 = vadd.f32 %v1253_v62, %v2627_v53  ;;  %v1255_v50 = vpop.f32.mrb[47].mxu1  ;;  %v1886_v51 = vpack.c.bf16 %v1212_v45, %v1210_v43  ;;  %v1216_v55 = vadd.f32 %v1215_v49, %v2629_v54 }
 0x17a   : > { %v1910_v52 = vpack.c.bf16 %v1252_v46, %v1250_v44  ;;  %v1256_v56 = vadd.f32 %v1255_v50, %v2629_v54 }
 0x17b   : > { %1566 = vst [vmem:[%s2647_s21 + $0xa0] sm:$0xff] %v1886_v51  ;;  %v1889_v57 = vpack.c.bf16 %v1216_v55, %v1214_v47 }
 0x17c   : > { %1590 = vst [vmem:[%s2647_s21 + $0x160] sm:$0xff] %v1910_v52  ;;  %v1913_v58 = vpack.c.bf16 %v1256_v56, %v1254_v48 }
 0x17d   : > { %1569 = vst [vmem:[%s2647_s21 + $0xb8] sm:$0xff] %v1889_v57 }
 0x17e   : > { %1593 = vst [vmem:[%s2647_s21 + $0x178] sm:$0xff] %v1913_v58 }
 0x17f PF: > { %s13_s16 = sadd.s32 1, %s2194_s16   ;;  %s2808_s12 = smov %s2186_s14 }
 0x180   : > { %p10_p7 = scmp.ge.s32.totalorder %s13_s16, 6   ;;  %s2809_s13 = smov %s2190_s15 }
 0x181   : > { %s2810_s14 = smov %s2813_s17  ;;  %s2811_s15 = smov %s2817_s18 }
 0x182   :  { %12 = sbr.rel (!%p10_p7) target bundleno = 3 (0x3), region = 62 }

// kernel: causal_self_attention.5
= control target key start
LH: loop header
LB: loop body
LE: loop exit
PB: predicated region body
PF: predicated region fallthrough
CT: control target
= control target key end

     0   :  { %8 = vsyncpa [#allocation3], 0  ;;  %s1443_s0 = inlined_call_operand.vmem [shape: bf16[2,256,256], index: 0, kind: input, shape index: {}]   ;;  %s1444_s1 = inlined_call_operand.vmem [shape: bf16[256,256], index: 1, kind: input, shape index: {}]   ;;  %s1445_s2 = inlined_call_operand.vmem [shape: f32[1,256], index: 2, kind: input, shape index: {}]   ;;  %s1446_s3 = inlined_call_operand.hbm [shape: f32[2,256,256], index: 3, kind: output, shape index: {}]  }
   0x1   :  { %10 = vsyncpa [#allocation3 + $0x1], 0  ;;  %s1112_s12 = smov 0   ;;  %s1114_s13 = smov 0  }
   0x2   :  { %s1116_s14 = smov 0   ;;  %s1118_s15 = smov 0  }
   0x3   :  { %s1120_s16 = smov 0   ;;  %s1122_s17 = smov 0  }
   0x4   :  { %s1124_s18 = smov 0   ;;  %s1126_s19 = smov 0  }
   0x5 LB: > { %s750_s20 = sadd.s32 4294967295, %s1087_s19   ;;  %s751_s21 = sadd.s32 4294967294, %s1087_s19   ;;  %s1087_s19 = sphi %s1126_s19, %s16_s19   ;;  %s1083_s18 = sphi %s1124_s18, %s1455_s18   ;;  %s1079_s17 = sphi %s1122_s17, %s1454_s17   ;;  %s1075_s16 = sphi %s1120_s16, %s1453_s16   ;;  %s1071_s15 = sphi %s1118_s15, %s1452_s15   ;;  %s1067_s14 = sphi %s1116_s14, %s1451_s14   ;;  %s1063_s13 = sphi %s1114_s13, %s1450_s13   ;;  %s1059_s12 = sphi %s1112_s12, %s1449_s12  }
   0x6   : > { %s25_s22 = sadd.s32 1, %s1079_s17  ;;  %s28_s23 = sadd.s32 1, %s1083_s18 }
   0x7   : > { %p26_p0 = scmp.ge.s32.totalorder %s25_s22, 2  ;;  %p117_p1 = scmp.ne.s32.totalorder %s1067_s14, %s1063_s13 }
   0x8   : > { %p118_p2 = scmp.eq.s32.totalorder %s750_s20, 3  ;;  %p123_p5 = scmp.ne.s32.totalorder %s1063_s13, %s1059_s12 }
   0x9   : > { %s1457_s22 = smov (%p26_p0, %s25_s22), 0  ;;  %s1459_s23 = smov (!%p26_p0, %s28_s23), %s1083_s18 }
   0xa   : > { %s103_s24 = ssub.s32 %s1079_s17, %s1457_s22  ;;  %p1163_p3 = por %p118_p2, %p117_p1 }
   0xb   : > { %p30_p4 = scmp.ge.s32.totalorder %s1459_s23, 2  ;;  %p124_p6 = scmp.eq.s32.totalorder %s751_s21, 3 }
   0xc   : > { %p754_p7 = scmp.ge.s32.totalorder %s1087_s19, 1  ;;  %p162_p9 = scmp.lt.s32.totalorder %s1087_s19, 5 }
   0xd   : > { %s1461_s23 = smov (%p30_p4, %s1459_s23), 0  ;;  %p1172_p8 = por %p124_p6, %p123_p5 }
   0xe   : > { %s102_s27 = ssub.s32 %s1083_s18, %s1461_s23  ;;  %s107_s28 = sadd.s32 1, %s1067_s14 }
   0xf   : > { %s104_s29 = sor.u32 %s103_s24, %s102_s27  ;;  %p163_p10 = pnand %p754_p7, %p162_p9 }
  0x10   : > { %p105_p11 = scmp.eq.s32.totalorder %s104_s29, 0  ;;  %v921_v0 = vld [vmem:[%s1444_s1 + $0x4] ss:$8 sps:$4 sm:$0xff] (!%p163_p10)   ;;  %s756_s6 = sshll.u32 (!%p163_p10), %s1071_s15, 4  ;;  %v923_v1 = vld [vmem:[%s1444_s1] ss:$8 sps:$4 sm:$0xff] (!%p163_p10)   ;;  %v253_v48 = vlaneseq (!%p163_p10) }
  0x11   : > { %166 = sbr.rel (%p163_p10) target bundleno = 338 (0x152), region = 32  ;;  %p192_p12 = scmp.lt.s32.totalorder (!%p163_p10), %s1075_s16, 1  ;;  %503 = vmatprep.subr.bf16.mxu0 (!%p163_p10), %v921_v0  ;;  %816 = vmatprep.subr.bf16.mxu1 (!%p163_p10), %v921_v0  ;;  %v924_v2 = vld [vmem:[%s1444_s1 + $0x14] ss:$8 sps:$4 sm:$0xff] (!%p163_p10)   ;;  %v926_v3 = vld [vmem:[%s1444_s1 + $0x10] ss:$8 sps:$4 sm:$0xff] (!%p163_p10)  }
  0x12   : > { %s1181_s30 = scalar_select %p105_p11, %s1067_s14, %s107_s28  }
  0x13   : > { %p194_p13 = scmp.lt.s32.totalorder (!%p163_p10), %s756_s6, 31  ;;  %504 = vmatpush1.bf16.msra.mxu0 (!%p163_p10), %v923_v1  ;;  %832 = vmatpush1.bf16.msra.mxu1 (!%p163_p10), %v923_v1  ;;  %v927_v4 = vld [vmem:[%s1444_s1 + $0x24] ss:$8 sps:$4 sm:$0xff] (!%p163_p10)   ;;  %v929_v5 = vld [vmem:[%s1444_s1 + $0x20] ss:$8 sps:$4 sm:$0xff] (!%p163_p10)   ;;  %v254_v49 = vshrl.u32 (!%p163_p10), %v253_v48, 7 }
  0x14   : > { %505 = vmatprep.subr.bf16.mxu0 (!%p163_p10), %v924_v2  ;;  %817 = vmatprep.subr.bf16.mxu1 (!%p163_p10), %v924_v2  ;;  %v930_v6 = vld [vmem:[%s1444_s1 + $0x34] ss:$8 sps:$4 sm:$0xff] (!%p163_p10)   ;;  %v932_v7 = vld [vmem:[%s1444_s1 + $0x30] ss:$8 sps:$4 sm:$0xff] (!%p163_p10)   ;;  %v933_v8 = vld [vmem:[%s1444_s1 + $0x44] ss:$8 sps:$4 sm:$0xff] (!%p163_p10)  }
  0x15   : > { %v935_v9 = vld [vmem:[%s1444_s1 + $0x40] ss:$8 sps:$4 sm:$0xff] (!%p163_p10)   ;;  %v936_v10 = vld [vmem:[%s1444_s1 + $0x54] ss:$8 sps:$4 sm:$0xff] (!%p163_p10)   ;;  %v938_v11 = vld [vmem:[%s1444_s1 + $0x50] ss:$8 sps:$4 sm:$0xff] (!%p163_p10)  }
  0x16   : > { %v939_v12 = vld [vmem:[%s1444_s1 + $0x64] ss:$8 sps:$4 sm:$0xff] (!%p163_p10)   ;;  %v941_v14 = vld [vmem:[%s1444_s1 + $0x60] ss:$8 sps:$4 sm:$0xff] (!%p163_p10)   ;;  %v942_v16 = vld [vmem:[%s1444_s1 + $0x74] ss:$8 sps:$4 sm:$0xff] (!%p163_p10)  }
  0x17   : > { %506 = vmatpush1.bf16.msra.mxu0 (!%p163_p10), %v926_v3  ;;  %833 = vmatpush1.bf16.msra.mxu1 (!%p163_p10), %v926_v3  ;;  %v944_v17 = vld [vmem:[%s1444_s1 + $0x70] ss:$8 sps:$4 sm:$0xff] (!%p163_p10)   ;;  %v945_v18 = vld [vmem:[%s1444_s1 + $0x84] ss:$8 sps:$4 sm:$0xff] (!%p163_p10)   ;;  %v947_v19 = vld [vmem:[%s1444_s1 + $0x80] ss:$8 sps:$4 sm:$0xff] (!%p163_p10)  }
  0x18   : > { %s193_s27 = scalar_select %p192_p12, %s1075_s16, 1  ;;  %507 = vmatprep.subr.bf16.mxu0 %v927_v4  ;;  %818 = vmatprep.subr.bf16.mxu1 %v927_v4  ;;  %v948_v20 = vld [vmem:[%s1444_s1 + $0x94] ss:$8 sps:$4 sm:$0xff]   ;;  %v950_v21 = vld [vmem:[%s1444_s1 + $0x90] ss:$8 sps:$4 sm:$0xff]   ;;  %v255_v50 = vsub.s32 0, %v254_v49 }
  0x19   : > { %s1463_s6 = smov (!%p194_p13, %s756_s6), 31  ;;  %v951_v22 = vld [vmem:[%s1444_s1 + $0xa4] ss:$8 sps:$4 sm:$0xff]   ;;  %v953_v23 = vld [vmem:[%s1444_s1 + $0xa0] ss:$8 sps:$4 sm:$0xff]   ;;  %s188_s11 = sand.u32 1, %s1063_s13  }
  0x1a   : > { %s757_s7 = sshll.u32 %s1463_s6, 1  ;;  %s758_s8 = sshll.u32 %s193_s27, 6  ;;  %v954_v24 = vld [vmem:[%s1444_s1 + $0xb4] ss:$8 sps:$4 sm:$0xff]   ;;  %v956_v25 = vld [vmem:[%s1444_s1 + $0xb0] ss:$8 sps:$4 sm:$0xff]  }
  0x1b   : > { %508 = vmatpush1.bf16.msra.mxu0 %v929_v5  ;;  %834 = vmatpush1.bf16.msra.mxu1 %v929_v5  ;;  %s198_s21 = sadd.s32 %s758_s8, %s757_s7  ;;  %v957_v26 = vld [vmem:[%s1444_s1 + $0xc4] ss:$8 sps:$4 sm:$0xff]   ;;  %v959_v27 = vld [vmem:[%s1444_s1 + $0xc0] ss:$8 sps:$4 sm:$0xff]   ;;  %v960_v28 = vld [vmem:[%s1444_s1 + $0xd4] ss:$8 sps:$4 sm:$0xff]  }
  0x1c   : > { %509 = vmatprep.subr.bf16.mxu0 %v930_v6  ;;  %819 = vmatprep.subr.bf16.mxu1 %v930_v6  ;;  %s759_s29 = sshll.u32 %s198_s21, 2  ;;  %v962_v29 = vld [vmem:[%s1444_s1 + $0xd0] ss:$8 sps:$4 sm:$0xff]   ;;  %v963_v30 = vld [vmem:[%s1444_s1 + $0xe4] ss:$8 sps:$4 sm:$0xff]   ;;  %v259_v52 = vsub.s32 1, %v254_v49 }
  0x1d   : > { %s1225_s9 = scalar_lea.vmem %s1443_s0, %s759_s29  ;;  %v965_v31 = vld [vmem:[%s1444_s1 + $0xe0] ss:$8 sps:$4 sm:$0xff]   ;;  %v966_v32 = vld [vmem:[%s1444_s1 + $0xf4] ss:$8 sps:$4 sm:$0xff]   ;;  %v968_v33 = vld [vmem:[%s1444_s1 + $0xf0] ss:$8 sps:$4 sm:$0xff]  }
  0x1e   : > { %v971_v13 = vld [vmem:[%s1225_s9 + $0x4] ss:$8 sps:$4 sm:$0xff]   ;;  %v969_v34 = vld [vmem:[%s1225_s9] ss:$8 sps:$4 sm:$0xff]   ;;  %v975_v36 = vld [vmem:[%s1225_s9 + $0x14] ss:$8 sps:$4 sm:$0xff]  }
  0x1f   : > { %510 = vmatpush1.bf16.msra.mxu0 %v932_v7  ;;  %835 = vmatpush1.bf16.msra.mxu1 %v932_v7  ;;  %v974_v15 = vld [vmem:[%s1225_s9 + $0x44] ss:$8 sps:$4 sm:$0xff]   ;;  %v972_v35 = vld [vmem:[%s1225_s9 + $0x40] ss:$8 sps:$4 sm:$0xff]   ;;  %v977_v37 = vld [vmem:[%s1225_s9 + $0x54] ss:$8 sps:$4 sm:$0xff]  }
  0x20   : > { %511 = vmatprep.subr.bf16.mxu0 %v933_v8  ;;  %820 = vmatprep.subr.bf16.mxu1 %v933_v8  ;;  %v979_v38 = vld [vmem:[%s1225_s9 + $0x10] ss:$8 sps:$4 sm:$0xff]   ;;  %v981_v40 = vld [vmem:[%s1225_s9 + $0x24] ss:$8 sps:$4 sm:$0xff]   ;;  %v985_v42 = vld [vmem:[%s1225_s9 + $0x20] ss:$8 sps:$4 sm:$0xff]  }
  0x21   : > { %535 = vmatprep.mubr.bf16.mxu0 %v971_v13  ;;  %575 = vmatprep.mubr.bf16.mxu1 %v974_v15  ;;  %v980_v39 = vld [vmem:[%s1225_s9 + $0x50] ss:$8 sps:$4 sm:$0xff]   ;;  %v983_v41 = vld [vmem:[%s1225_s9 + $0x64] ss:$8 sps:$4 sm:$0xff]   ;;  %v986_v43 = vld [vmem:[%s1225_s9 + $0x60] ss:$8 sps:$4 sm:$0xff]  }
  0x22   : > { %v987_v44 = vld [vmem:[%s1225_s9 + $0x34] ss:$8 sps:$4 sm:$0xff]   ;;  %v991_v46 = vld [vmem:[%s1225_s9 + $0x30] ss:$8 sps:$4 sm:$0xff]   ;;  %v251_v51 = vld [vmem:[%s1445_s2] sm:$0x3] }
  0x23   : > { %512 = vmatpush1.bf16.msra.mxu0 %v935_v9  ;;  %836 = vmatpush1.bf16.msra.mxu1 %v935_v9  ;;  %v989_v45 = vld [vmem:[%s1225_s9 + $0x74] ss:$8 sps:$4 sm:$0xff]   ;;  %v992_v47 = vld [vmem:[%s1225_s9 + $0x70] ss:$8 sps:$4 sm:$0xff]   ;;  %s755_s24 = sshll.u32 %s188_s11, 8  ;;  %v1309_v53 = vrot.slane %v251_v51, %v255_v50  ;;  %v1311_v54 = vrot.slane %v251_v51, %v259_v52  ;;  %s815_s28 = sshll.u32 %s1071_s15, 5 }
  0x24   : > { %513 = vmatprep.subr.bf16.mxu0 %v936_v10  ;;  %821 = vmatprep.subr.bf16.mxu1 %v936_v10  ;;  %s1317_s9 = scalar_lea.vmem [#allocation2], %s755_s24  ;;  %s811_s6 = sshll.u32 %s1075_s16, 6 }
  0x25   : > { %s662_s15 = sadd.s32 %s815_s28, %s811_s6  ;;  %s665_s27 = sshll.u32 %s1317_s9, 4  ;;  %s1379_s27 = int_to_ptr.vmem [resolvable:$true] %s665_s27 }
  0x26   : > { %s812_s16 = sshll.u32 %s662_s15, 7  ;;  %s1391_s7 = scalar_lea.sflag [#allocation3], %s188_s11 }
  0x27   : > { %514 = vmatpush1.bf16.msra.mxu0 %v938_v11  ;;  %837 = vmatpush1.bf16.msra.mxu1 %v938_v11  ;;  %s1377_s5 = scalar_lea.hbm %s1446_s3, %s812_s16  ;;  %s993_s8 = scalar_lea.vmem %s1379_s27, 4096 }
  0x28   : > { %515 = vmatprep.subr.bf16.mxu0 %v939_v12  ;;  %822 = vmatprep.subr.bf16.mxu1 %v939_v12  ;;  %p994_p0 = scmp.ne.s32.totalorder %s1379_s27, %s993_s8  ;;  %s1089_s10 = smov [#allocation2]  }
  0x29   : > { %s997_s20 = sshll.u32 %s1089_s10, 4  ;;  %s998_s20 = int_to_ptr.vmem [resolvable:$false] %s997_s20 }
  0x2a   : > { %p995_p1 = pnand %p994_p0, %p1163_p3  ;;  %s999_s21 = scalar_lea.vmem %s998_s20, 8192 }
  0x2b   : > { %516 = vmatpush1.bf16.msra.mxu0 %v941_v14  ;;  %838 = vmatpush1.bf16.msra.mxu1 %v941_v14  ;;  %p1000_p4 = scmp.lt.s32.totalorder %s1379_s27, %s998_s20  ;;  %p1001_p5 = scmp.lt.s32.totalorder %s999_s21, %s993_s8 }
  0x2c   : > { %517 = vmatprep.subr.bf16.mxu0 %v942_v16  ;;  %823 = vmatprep.subr.bf16.mxu1 %v942_v16  ;;  %p996_p2 = pneg %p995_p1 }
  0x2d   : > { %p1002_p6 = por %p1001_p5, %p1000_p4 }
  0x2f   : > { %518 = vmatpush1.bf16.msra.mxu0 %v944_v17  ;;  %839 = vmatpush1.bf16.msra.mxu1 %v944_v17  ;;  %p1003_p7 = pnand %p1002_p6, %p996_p2 }
  0x30   : > { %519 = vmatprep.subr.bf16.mxu0 %v945_v18  ;;  %824 = vmatprep.subr.bf16.mxu1 %v945_v18 }
  0x33   : > { %520 = vmatpush1.bf16.msra.mxu0 %v947_v19  ;;  %840 = vmatpush1.bf16.msra.mxu1 %v947_v19 }
  0x34   : > { %521 = vmatprep.subr.bf16.mxu0 %v948_v20  ;;  %825 = vmatprep.subr.bf16.mxu1 %v948_v20 }
  0x37   : > { %522 = vmatpush1.bf16.msra.mxu0 %v950_v21  ;;  %841 = vmatpush1.bf16.msra.mxu1 %v950_v21 }
  0x38   : > { %523 = vmatprep.subr.bf16.mxu0 %v951_v22  ;;  %826 = vmatprep.subr.bf16.mxu1 %v951_v22 }
  0x3b   : > { %524 = vmatpush1.bf16.msra.mxu0 %v953_v23  ;;  %842 = vmatpush1.bf16.msra.mxu1 %v953_v23 }
  0x3c   : > { %525 = vmatprep.subr.bf16.mxu0 %v954_v24  ;;  %827 = vmatprep.subr.bf16.mxu1 %v954_v24 }
  0x3f   : > { %526 = vmatpush1.bf16.msra.mxu0 %v956_v25  ;;  %843 = vmatpush1.bf16.msra.mxu1 %v956_v25 }
  0x40   : > { %527 = vmatprep.subr.bf16.mxu0 %v957_v26  ;;  %828 = vmatprep.subr.bf16.mxu1 %v957_v26 }
  0x43   : > { %528 = vmatpush1.bf16.msra.mxu0 %v959_v27  ;;  %844 = vmatpush1.bf16.msra.mxu1 %v959_v27 }
  0x44   : > { %529 = vmatprep.subr.bf16.mxu0 %v960_v28  ;;  %829 = vmatprep.subr.bf16.mxu1 %v960_v28 }
  0x47   : > { %530 = vmatpush1.bf16.msra.mxu0 %v962_v29  ;;  %845 = vmatpush1.bf16.msra.mxu1 %v962_v29 }
  0x48   : > { %531 = vmatprep.subr.bf16.mxu0 %v963_v30  ;;  %830 = vmatprep.subr.bf16.mxu1 %v963_v30 }
  0x4b   : > { %532 = vmatpush1.bf16.msra.mxu0 %v965_v31  ;;  %846 = vmatpush1.bf16.msra.mxu1 %v965_v31 }
  0x4c   : > { %533 = vmatprep.subr.bf16.mxu0 %v966_v32  ;;  %831 = vmatprep.subr.bf16.mxu1 %v966_v32 }
  0x4f   : > { %534 = vmatpush1.bf16.msra.mxu0 %v968_v33  ;;  %847 = vmatpush1.bf16.msra.mxu1 %v968_v33 }
  0x52   : > { %536 = vmatmul.mubr.bf16.vlgmr.msra.gmra.mrb[0].mxu0 %v969_v34  ;;  %576 = vmatmul.mubr.bf16.vlgmr.msra.gmra.mrb[0].mxu1 %v972_v35 }
  0x53   : > { %545 = vmatprep.mubr.bf16.mxu0 %v975_v36  ;;  %585 = vmatprep.mubr.bf16.mxu1 %v977_v37 }
  0x5a   : > { %546 = vmatmul.mubr.bf16.gmra.mrb[4].mxu0 %v979_v38  ;;  %586 = vmatmul.mubr.bf16.gmra.mrb[4].mxu1 %v980_v39 }
  0x5b   : > { %555 = vmatprep.mubr.bf16.mxu0 %v981_v40  ;;  %595 = vmatprep.mubr.bf16.mxu1 %v983_v41 }
  0x62   : > { %556 = vmatmul.mubr.bf16.gmra.mrb[8].mxu0 %v985_v42  ;;  %596 = vmatmul.mubr.bf16.gmra.mrb[8].mxu1 %v986_v43 }
  0x63   : > { %565 = vmatprep.mubr.bf16.mxu0 %v987_v44  ;;  %605 = vmatprep.mubr.bf16.mxu1 %v989_v45 }
  0x6a   : > { %566 = vmatmul.mubr.bf16.gmra.mrb[12].mxu0 %v991_v46  ;;  %606 = vmatmul.mubr.bf16.gmra.mrb[12].mxu1 %v992_v47 }
 0x125   : > { %v537_v55 = vpop.f32.mrb[0].mxu0  ;;  %v577_v56 = vpop.f32.mrb[0].mxu1 }
 0x126   : > { %v538_v57 = vadd.f32 %v537_v55, %v1309_v53  ;;  %v578_v58 = vadd.f32 %v577_v56, %v1309_v53  ;;  %v539_v59 = vpop.f32.mrb[1].mxu0  ;;  %v579_v60 = vpop.f32.mrb[1].mxu1 }
 0x127   : > { %v540_v61 = vadd.f32 %v539_v59, %v1311_v54  ;;  %v580_v62 = vadd.f32 %v579_v60, %v1311_v54  ;;  %v541_v63 = vpop.f32.mrb[2].mxu0  ;;  %v581_v0 = vpop.f32.mrb[2].mxu1 }
 0x128   : > { %616 = vst [vmem:[%s1317_s9] sm:$0xff] %v538_v57  ;;  %632 = vst [vmem:[%s1317_s9 + $0x80] sm:$0xff] %v578_v58  ;;  %v542_v1 = vadd.f32 %v541_v63, %v1309_v53  ;;  %v582_v2 = vadd.f32 %v581_v0, %v1309_v53  ;;  %v543_v3 = vpop.f32.mrb[3].mxu0  ;;  %v583_v4 = vpop.f32.mrb[3].mxu1 }
 0x129   : > { %617 = vst [vmem:[%s1317_s9 + $0x8] sm:$0xff] %v540_v61  ;;  %633 = vst [vmem:[%s1317_s9 + $0x88] sm:$0xff] %v580_v62  ;;  %v544_v5 = vadd.f32 %v543_v3, %v1311_v54  ;;  %v584_v6 = vadd.f32 %v583_v4, %v1311_v54 }
 0x12a   : > { %618 = vst [vmem:[%s1317_s9 + $0x10] sm:$0xff] %v542_v1  ;;  %634 = vst [vmem:[%s1317_s9 + $0x90] sm:$0xff] %v582_v2 }
 0x12b   : > { %619 = vst [vmem:[%s1317_s9 + $0x18] sm:$0xff] %v544_v5  ;;  %635 = vst [vmem:[%s1317_s9 + $0x98] sm:$0xff] %v584_v6 }
 0x12d   : > { %v547_v7 = vpop.f32.mrb[4].mxu0  ;;  %v587_v8 = vpop.f32.mrb[4].mxu1 }
 0x12e   : > { %v548_v9 = vadd.f32 %v547_v7, %v1309_v53  ;;  %v588_v10 = vadd.f32 %v587_v8, %v1309_v53  ;;  %v549_v11 = vpop.f32.mrb[5].mxu0  ;;  %v589_v12 = vpop.f32.mrb[5].mxu1 }
 0x12f   : > { %v550_v13 = vadd.f32 %v549_v11, %v1311_v54  ;;  %v590_v14 = vadd.f32 %v589_v12, %v1311_v54  ;;  %v551_v15 = vpop.f32.mrb[6].mxu0  ;;  %v591_v16 = vpop.f32.mrb[6].mxu1 }
 0x130   : > { %620 = vst [vmem:[%s1317_s9 + $0x20] sm:$0xff] %v548_v9  ;;  %636 = vst [vmem:[%s1317_s9 + $0xa0] sm:$0xff] %v588_v10  ;;  %v552_v17 = vadd.f32 %v551_v15, %v1309_v53  ;;  %v592_v18 = vadd.f32 %v591_v16, %v1309_v53  ;;  %v553_v19 = vpop.f32.mrb[7].mxu0  ;;  %v593_v20 = vpop.f32.mrb[7].mxu1 }
 0x131   : > { %621 = vst [vmem:[%s1317_s9 + $0x28] sm:$0xff] %v550_v13  ;;  %637 = vst [vmem:[%s1317_s9 + $0xa8] sm:$0xff] %v590_v14  ;;  %v554_v21 = vadd.f32 %v553_v19, %v1311_v54  ;;  %v594_v22 = vadd.f32 %v593_v20, %v1311_v54 }
 0x132   : > { %622 = vst [vmem:[%s1317_s9 + $0x30] sm:$0xff] %v552_v17  ;;  %638 = vst [vmem:[%s1317_s9 + $0xb0] sm:$0xff] %v592_v18 }
 0x133   : > { %623 = vst [vmem:[%s1317_s9 + $0x38] sm:$0xff] %v554_v21  ;;  %639 = vst [vmem:[%s1317_s9 + $0xb8] sm:$0xff] %v594_v22 }
 0x135   : > { %v557_v23 = vpop.f32.mrb[8].mxu0  ;;  %v597_v24 = vpop.f32.mrb[8].mxu1 }
 0x136   : > { %v558_v25 = vadd.f32 %v557_v23, %v1309_v53  ;;  %v598_v26 = vadd.f32 %v597_v24, %v1309_v53  ;;  %v559_v27 = vpop.f32.mrb[9].mxu0  ;;  %v599_v28 = vpop.f32.mrb[9].mxu1 }
 0x137   : > { %v560_v29 = vadd.f32 %v559_v27, %v1311_v54  ;;  %v600_v30 = vadd.f32 %v599_v28, %v1311_v54  ;;  %v561_v31 = vpop.f32.mrb[10].mxu0  ;;  %v601_v32 = vpop.f32.mrb[10].mxu1 }
 0x138   : > { %624 = vst [vmem:[%s1317_s9 + $0x40] sm:$0xff] %v558_v25  ;;  %640 = vst [vmem:[%s1317_s9 + $0xc0] sm:$0xff] %v598_v26  ;;  %v562_v33 = vadd.f32 %v561_v31, %v1309_v53  ;;  %v602_v34 = vadd.f32 %v601_v32, %v1309_v53  ;;  %v563_v35 = vpop.f32.mrb[11].mxu0  ;;  %v603_v36 = vpop.f32.mrb[11].mxu1 }
 0x139   : > { %625 = vst [vmem:[%s1317_s9 + $0x48] sm:$0xff] %v560_v29  ;;  %641 = vst [vmem:[%s1317_s9 + $0xc8] sm:$0xff] %v600_v30  ;;  %v564_v37 = vadd.f32 %v563_v35, %v1311_v54  ;;  %v604_v38 = vadd.f32 %v603_v36, %v1311_v54 }
 0x13a   : > { %626 = vst [vmem:[%s1317_s9 + $0x50] sm:$0xff] %v562_v33  ;;  %642 = vst [vmem:[%s1317_s9 + $0xd0] sm:$0xff] %v602_v34 }
 0x13b   : > { %627 = vst [vmem:[%s1317_s9 + $0x58] sm:$0xff] %v564_v37  ;;  %643 = vst [vmem:[%s1317_s9 + $0xd8] sm:$0xff] %v604_v38 }
 0x13d   : > { %v567_v39 = vpop.f32.mrb[12].mxu0  ;;  %v607_v40 = vpop.f32.mrb[12].mxu1 }
 0x13e   : > { %v568_v41 = vadd.f32 %v567_v39, %v1309_v53  ;;  %v608_v42 = vadd.f32 %v607_v40, %v1309_v53  ;;  %v569_v43 = vpop.f32.mrb[13].mxu0  ;;  %v609_v44 = vpop.f32.mrb[13].mxu1 }
 0x13f   : > { %v570_v45 = vadd.f32 %v569_v43, %v1311_v54  ;;  %v610_v46 = vadd.f32 %v609_v44, %v1311_v54  ;;  %v571_v47 = vpop.f32.mrb[14].mxu0  ;;  %v611_v48 = vpop.f32.mrb[14].mxu1 }
 0x140   : > { %628 = vst [vmem:[%s1317_s9 + $0x60] sm:$0xff] %v568_v41  ;;  %644 = vst [vmem:[%s1317_s9 + $0xe0] sm:$0xff] %v608_v42  ;;  %v572_v49 = vadd.f32 %v571_v47, %v1309_v53  ;;  %v612_v50 = vadd.f32 %v611_v48, %v1309_v53  ;;  %v573_v51 = vpop.f32.mrb[15].mxu0  ;;  %v613_v52 = vpop.f32.mrb[15].mxu1 }
 0x141   : > { %629 = vst [vmem:[%s1317_s9 + $0x68] sm:$0xff] %v570_v45  ;;  %645 = vst [vmem:[%s1317_s9 + $0xe8] sm:$0xff] %v610_v46  ;;  %v574_v55 = vadd.f32 %v573_v51, %v1311_v54  ;;  %v614_v56 = vadd.f32 %v613_v52, %v1311_v54 }
 0x142   : > { %630 = vst [vmem:[%s1317_s9 + $0x70] sm:$0xff] %v572_v49  ;;  %646 = vst [vmem:[%s1317_s9 + $0xf0] sm:$0xff] %v612_v50 }
 0x143   : > { %631 = vst [vmem:[%s1317_s9 + $0x78] sm:$0xff] %v574_v55  ;;  %647 = vst [vmem:[%s1317_s9 + $0xf8] sm:$0xff] %v614_v56 }
 0x144   : > { %1006 = shalt.err (!%p1003_p7)
}
 0x145   : > { %s1007_s11 = scalar_lea.hbm %s1377_s5, 4096  ;;  %s1011_s28 = scalar_lea.hbm %s1446_s3, 16384 }
 0x146   : > { %p1008_p9 = scmp.ne.s32.totalorder %s1377_s5, %s1007_s11  ;;  %p1012_p12 = scmp.lt.u32.totalorder %s1377_s5, %s1446_s3 }
 0x147   : > { %p1013_p13 = scmp.lt.u32.totalorder %s1011_s28, %s1007_s11  ;;  %p1015_p1 = scmp.lt.u32.totalorder %s1007_s11, %s1377_s5 }
 0x148   : > { %p1009_p10 = pnand %p1008_p9, %p1163_p3 }
 0x149   : > { %p1014_p0 = por %p1013_p13, %p1012_p12 }
 0x14a   : > { %p1010_p11 = pneg %p1009_p10 }
 0x14b   : > { %p1016_p2 = por %p1015_p1, %p1014_p0 }
 0x14d   : > { %p1017_p4 = pnand %p1016_p2, %p1010_p11 }
 0x14f   : > { %1020 = shalt.err (!%p1017_p4)
}
 0x150   : > { %s1090_s16 = smov 256   ;;  %s1091_s29 = smov 16  }
 0x151   : > { %848 = dma.vmem_to_hbm [thread:$0]  (%p1163_p3), %s1379_s27, 4096, %s1377_s5, %s1391_s7, %s1090_s16, %s1090_s16, %s1091_s29  }
 0x152 PF: > { %p854_p5 = scmp.ge.s32.totalorder %s1087_s19, 2  ;;  %s680_s4 = sand.u32 1, %s1059_s12  }
 0x153   : > { %s681_s8 = scalar_lea.sflag [#allocation3], %s680_s4 }
 0x154   : > { %p851_p6 = pnand %p854_p5, %p1172_p8 }
 0x156   : > { %1054 = dma.done.wait (!%p851_p6), %s681_s8, 4096  }
 0x157   : > { %1056 = vsyncadd (!%p851_p6), %s681_s8, 4294963200  ;;  %s16_s19 = sadd.s32 1, %s1087_s19   ;;  %s1449_s12 = smov %s1063_s13 }
 0x158   : > { %p13_p7 = scmp.ge.s32.totalorder %s16_s19, 6   ;;  %s1450_s13 = smov %s1067_s14 }
 0x159   : > { %s1451_s14 = smov %s1181_s30  ;;  %s1452_s15 = smov %s1079_s17 }
 0x15a   : > { %s1453_s16 = smov %s1083_s18  ;;  %s1454_s17 = smov %s1457_s22 }
 0x15b   : > { %s1455_s18 = smov %s1461_s23  ;;  %15 = sbr.rel (!%p13_p7) target bundleno = 5 (0x5), region = 67 }
 0x162   :  { %686 = vsyncpa [#allocation3], 1 }
 0x163   :  { %688 = vsyncpa [#allocation3 + $0x1], 1 }

// kernel: causal_self_attention.4
= control target key start
LH: loop header
LB: loop body
LE: loop exit
PB: predicated region body
PF: predicated region fallthrough
CT: control target
= control target key end

     0   :  { %s2297_s12 = smov 0   ;;  %s2299_s13 = smov 0   ;;  %s2961_s0 = inlined_call_operand.vmem [shape: bf16[2,4,256,64], index: 0, kind: input, shape index: {}]   ;;  %s2962_s1 = inlined_call_operand.vmem [shape: bf16[2,4,256,64], index: 1, kind: input, shape index: {}]   ;;  %s2963_s2 = inlined_call_operand.vmem [shape: bf16[2,4,256,64], index: 2, kind: input, shape index: {}]   ;;  %s2964_s3 = inlined_call_operand.vmem [shape: bf16[2,4,256,64], index: 3, kind: output, shape index: {}]  }
   0x1   :  { %s2301_s14 = smov 0   ;;  %s2303_s15 = smov 0  }
   0x2   :  { %s2305_s16 = smov 0   ;;  %s2307_s17 = smov 0  }
   0x3   :  { %s2309_s18 = smov 0   ;;  %s2311_s19 = smov 0  }
   0x4   :  { %s2313_s20 = smov 0  }
   0x5 LB: > { %s28_s21 = sadd.s32 1, %s2255_s16  ;;  %s31_s22 = sadd.s32 1, %s2259_s17  ;;  %s2271_s20 = sphi %s2313_s20, %s13_s20   ;;  %s2267_s19 = sphi %s2311_s19, %s2976_s19   ;;  %s2263_s18 = sphi %s2309_s18, %s2975_s18   ;;  %s2259_s17 = sphi %s2307_s17, %s2974_s17   ;;  %s2255_s16 = sphi %s2305_s16, %s2973_s16   ;;  %s2251_s15 = sphi %s2303_s15, %s2972_s15   ;;  %s2247_s14 = sphi %s2301_s14, %s2971_s14   ;;  %s2243_s13 = sphi %s2299_s13, %s2970_s13   ;;  %s2239_s12 = sphi %s2297_s12, %s2969_s12  }
   0x6   : > { %p29_p0 = scmp.ge.s32.totalorder %s28_s21, 2  ;;  %p1809_p1 = scmp.ge.s32.totalorder %s2271_s20, 1 }
   0x7   : > { %p226_p2 = scmp.lt.s32.totalorder %s2271_s20, 33  ;;  %s35_s23 = sadd.s32 1, %s2263_s18 }
   0x8   : > { %s2978_s21 = smov (%p29_p0, %s28_s21), 0  ;;  %s2980_s22 = smov (!%p29_p0, %s31_s22), %s2259_s17 }
   0x9   : > { %p33_p3 = scmp.ge.s32.totalorder %s2980_s22, 2  ;;  %p227_p4 = pnand %p1809_p1, %p226_p2 }
   0xa   : > { %s39_s24 = sadd.s32 1, %s2267_s19  ;;  %s1810_s25 = sshll.u32 (!%p227_p4), %s2243_s13, 4 }
   0xb   : > { %s2982_s22 = smov (%p33_p3, %s2980_s22), 0  ;;  %s2984_s23 = smov (!%p33_p3, %s35_s23), %s2263_s18 }
   0xc   : > { %p37_p5 = scmp.ge.s32.totalorder %s2984_s23, 4  ;;  %230 = sbr.rel (%p227_p4) target bundleno = 1049 (0x419), region = 32 }
   0xd   : > { %p293_p7 = scmp.lt.s32.totalorder (!%p227_p4), %s2251_s15, 1  ;;  %p295_p8 = scmp.lt.s32.totalorder (!%p227_p4), %s2247_s14, 3 }
   0xe   : > { %s2986_s23 = smov (%p37_p5, %s2984_s23), 0  ;;  %s2988_s24 = smov (!%p37_p5, %s39_s24), %s2267_s19 }
   0xf   : > { %2965 = sst [smem:[#allocation5_spill]] %s2986_s23  ;;  %p41_p6 = scmp.ge.s32.totalorder %s2988_s24, 2 }
  0x10   : > { %p297_p9 = scmp.lt.s32.totalorder (!%p227_p4), %s1810_s25, 31  ;;  %s1814_s29 = sshll.u32 (!%p227_p4), %s2239_s12, 4 }
  0x11   : > { %s2990_s24 = smov (%p41_p6, %s2988_s24), 0  ;;  %p311_p10 = scmp.lt.s32.totalorder (!%p227_p4), %s1814_s29, 31 }
  0x12   : > { %2966 = sst [smem:[#allocation6_spill]] %s2990_s24  ;;  %p1826_p11 = scmp.ne.s32.totalorder (!%p227_p4), %s2239_s12, 0 }
  0x13   : > { %s2992_s15 = smov (!%p293_p7, %s2251_s15), 1  ;;  %s2994_s14 = smov (!%p295_p8, %s2247_s14), 3 }
  0x14   : > { %s2996_s25 = smov (!%p297_p9, %s1810_s25), 31  ;;  %s1811_s26 = sshll.u32 %s2994_s14, 5  ;;  %vm353_vm0 = vcmask (!%p1826_p11), 7168   ;;  %vm386_vm1 = vcmask (!%p1826_p11), 523264   ;;  %v2273_v0 = vmov (!%p1826_p11), -1e+30  }
  0x15   : > { %s1812_s27 = sshll.u32 %s2992_s15, 7  ;;  %s300_s28 = sadd.s32 %s1811_s26, %s2996_s25  ;;  %354 = vst.msk [vmem:[#allocation2] sm:$0xff] (!%p1826_p11), %vm353_vm0, %v2273_v0  ;;  %355 = vst.msk [vmem:[#allocation2 + $0x8] sm:$0xff] (!%p1826_p11), %vm353_vm0, %v2273_v0  ;;  %v2274_v1 = vmov (!%p1826_p11), 0.0  }
  0x16   : > { %s302_s30 = sadd.s32 %s1812_s27, %s300_s28  ;;  %s2998_s29 = smov (!%p311_p10, %s1814_s29), 31  ;;  %356 = vst.msk [vmem:[#allocation2 + $0x10] sm:$0xff] (!%p1826_p11), %vm353_vm0, %v2273_v0  ;;  %357 = vst.msk [vmem:[#allocation2 + $0x18] sm:$0xff] (!%p1826_p11), %vm353_vm0, %v2273_v0 }
  0x17   : > { %s1813_s4 = sshll.u32 %s302_s30, 2  ;;  %s314_s11 = sadd.s32 %s1811_s26, %s2998_s29  ;;  %358 = vst.msk [vmem:[#allocation2 + $0x20] sm:$0xff] (!%p1826_p11), %vm353_vm0, %v2273_v0  ;;  %359 = vst.msk [vmem:[#allocation2 + $0x28] sm:$0xff] (!%p1826_p11), %vm353_vm0, %v2273_v0 }
  0x18   : > { %s2364_s7 = scalar_lea.vmem %s2961_s0, %s1813_s4  ;;  %s2369_s10 = scalar_lea.vmem %s2964_s3, %s1813_s4  ;;  %360 = vst.msk [vmem:[#allocation2 + $0x30] sm:$0xff] (!%p1826_p11), %vm353_vm0, %v2273_v0  ;;  %361 = vst.msk [vmem:[#allocation2 + $0x38] sm:$0xff] (!%p1826_p11), %vm353_vm0, %v2273_v0 }
  0x19   : > { %s316_s24 = sadd.s32 %s1812_s27, %s314_s11  ;;  %352 = sbr.rel (%p1826_p11) target bundleno = 45 (0x2d), region = 36  ;;  %362 = vst.msk [vmem:[#allocation2 + $0x40] sm:$0xff] (!%p1826_p11), %vm353_vm0, %v2273_v0  ;;  %363 = vst.msk [vmem:[#allocation2 + $0x48] sm:$0xff] (!%p1826_p11), %vm353_vm0, %v2273_v0 }
  0x1a   : > { %s1817_s14 = sshll.u32 %s316_s24, 2  ;;  %364 = vst.msk [vmem:[#allocation2 + $0x50] sm:$0xff] (!%p1826_p11), %vm353_vm0, %v2273_v0  ;;  %365 = vst.msk [vmem:[#allocation2 + $0x58] sm:$0xff] (!%p1826_p11), %vm353_vm0, %v2273_v0 }
  0x1b   : > { %s2374_s28 = scalar_lea.vmem %s2962_s1, %s1817_s14  ;;  %s2379_s5 = scalar_lea.vmem %s2963_s2, %s1817_s14  ;;  %366 = vst.msk [vmem:[#allocation2 + $0x60] sm:$0xff] (!%p1826_p11), %vm353_vm0, %v2273_v0  ;;  %367 = vst.msk [vmem:[#allocation2 + $0x68] sm:$0xff] (!%p1826_p11), %vm353_vm0, %v2273_v0 }
  0x1c   : > { %368 = vst.msk [vmem:[#allocation2 + $0x70] sm:$0xff] (!%p1826_p11), %vm353_vm0, %v2273_v0  ;;  %369 = vst.msk [vmem:[#allocation2 + $0x78] sm:$0xff] (!%p1826_p11), %vm353_vm0, %v2273_v0 }
  0x1d   : > { %370 = vst.msk [vmem:[#allocation3] sm:$0xff] (!%p1826_p11), %vm353_vm0, %v2274_v1  ;;  %371 = vst.msk [vmem:[#allocation3 + $0x8] sm:$0xff] (!%p1826_p11), %vm353_vm0, %v2274_v1 }
  0x1e   : > { %372 = vst.msk [vmem:[#allocation3 + $0x10] sm:$0xff] (!%p1826_p11), %vm353_vm0, %v2274_v1  ;;  %373 = vst.msk [vmem:[#allocation3 + $0x18] sm:$0xff] (!%p1826_p11), %vm353_vm0, %v2274_v1 }
  0x1f   : > { %374 = vst.msk [vmem:[#allocation3 + $0x20] sm:$0xff] (!%p1826_p11), %vm353_vm0, %v2274_v1  ;;  %375 = vst.msk [vmem:[#allocation3 + $0x28] sm:$0xff] (!%p1826_p11), %vm353_vm0, %v2274_v1 }
  0x20   : > { %376 = vst.msk [vmem:[#allocation3 + $0x30] sm:$0xff] %vm353_vm0, %v2274_v1  ;;  %377 = vst.msk [vmem:[#allocation3 + $0x38] sm:$0xff] %vm353_vm0, %v2274_v1 }
  0x21   : > { %378 = vst.msk [vmem:[#allocation3 + $0x40] sm:$0xff] %vm353_vm0, %v2274_v1  ;;  %379 = vst.msk [vmem:[#allocation3 + $0x48] sm:$0xff] %vm353_vm0, %v2274_v1 }
  0x22   : > { %380 = vst.msk [vmem:[#allocation3 + $0x50] sm:$0xff] %vm353_vm0, %v2274_v1  ;;  %381 = vst.msk [vmem:[#allocation3 + $0x58] sm:$0xff] %vm353_vm0, %v2274_v1 }
  0x23   : > { %382 = vst.msk [vmem:[#allocation3 + $0x60] sm:$0xff] %vm353_vm0, %v2274_v1  ;;  %383 = vst.msk [vmem:[#allocation3 + $0x68] sm:$0xff] %vm353_vm0, %v2274_v1 }
  0x24   : > { %384 = vst.msk [vmem:[#allocation3 + $0x70] sm:$0xff] %vm353_vm0, %v2274_v1  ;;  %385 = vst.msk [vmem:[#allocation3 + $0x78] sm:$0xff] %vm353_vm0, %v2274_v1 }
  0x25   : > { %387 = vst.msk [vmem:[#allocation4] sm:$0xff] %vm386_vm1, %v2274_v1  ;;  %388 = vst.msk [vmem:[#allocation4 + $0x8] sm:$0xff] %vm386_vm1, %v2274_v1 }
  0x26   : > { %389 = vst.msk [vmem:[#allocation4 + $0x10] sm:$0xff] %vm386_vm1, %v2274_v1  ;;  %390 = vst.msk [vmem:[#allocation4 + $0x18] sm:$0xff] %vm386_vm1, %v2274_v1 }
  0x27   : > { %391 = vst.msk [vmem:[#allocation4 + $0x20] sm:$0xff] %vm386_vm1, %v2274_v1  ;;  %392 = vst.msk [vmem:[#allocation4 + $0x28] sm:$0xff] %vm386_vm1, %v2274_v1 }
  0x28   : > { %393 = vst.msk [vmem:[#allocation4 + $0x30] sm:$0xff] %vm386_vm1, %v2274_v1  ;;  %394 = vst.msk [vmem:[#allocation4 + $0x38] sm:$0xff] %vm386_vm1, %v2274_v1 }
  0x29   : > { %395 = vst.msk [vmem:[#allocation4 + $0x40] sm:$0xff] %vm386_vm1, %v2274_v1  ;;  %396 = vst.msk [vmem:[#allocation4 + $0x48] sm:$0xff] %vm386_vm1, %v2274_v1 }
  0x2a   : > { %397 = vst.msk [vmem:[#allocation4 + $0x50] sm:$0xff] %vm386_vm1, %v2274_v1  ;;  %398 = vst.msk [vmem:[#allocation4 + $0x58] sm:$0xff] %vm386_vm1, %v2274_v1 }
  0x2b   : > { %399 = vst.msk [vmem:[#allocation4 + $0x60] sm:$0xff] %vm386_vm1, %v2274_v1  ;;  %400 = vst.msk [vmem:[#allocation4 + $0x68] sm:$0xff] %vm386_vm1, %v2274_v1 }
  0x2c   : > { %401 = vst.msk [vmem:[#allocation4 + $0x70] sm:$0xff] %vm386_vm1, %v2274_v1  ;;  %402 = vst.msk [vmem:[#allocation4 + $0x78] sm:$0xff] %vm386_vm1, %v2274_v1 }
  0x2d PF: > { %s1827_s23 = sshll.u32 %s2239_s12, 7  ;;  %s1828_s24 = sshll.u32 %s2243_s13, 7 }
  0x2e   : > { %s405_s26 = sadd.s32 127, %s1828_s24 }
  0x2f   : > { %p1829_p12 = scmp.gt.s32.totalorder %s1827_s23, %s405_s26 }
  0x30   : > { %v2079_v2 = vld [vmem:[%s2374_s28] sm:$0xff] (!%p1829_p12)   ;;  %vm538_vm2 = vcmask (!%p1829_p12), 523264   ;;  %v2080_v3 = vld [vmem:[%s2374_s28 + $0x8] sm:$0xff] (!%p1829_p12)   ;;  %v2081_v5 = vld [vmem:[%s2374_s28 + $0x10] sm:$0xff] (!%p1829_p12)   ;;  %v684_v26 = vlaneseq (!%p1829_p12)  ;;  %v2481_v30 = vstv (!%p1829_p12), %s1828_s24 }
  0x31   : > { %409 = sbr.rel (%p1829_p12) target bundleno = 874 (0x36a), region = 40  ;;  %1993 = vmatprep.subr.msk.bf16.mxu0 (!%p1829_p12), %vm538_vm2, %v2079_v2  ;;  %v564_v4 = vsel (!%p1829_p12), %vm538_vm2, %v2079_v2, 0  ;;  %v567_v6 = vsel (!%p1829_p12), %vm538_vm2, %v2080_v3, 0  ;;  %v2087_v7 = vld [vmem:[%s2364_s7] sm:$0xff] (!%p1829_p12)   ;;  %v570_v8 = vsel (!%p1829_p12), %vm538_vm2, %v2081_v5, 0  ;;  %v2082_v9 = vld [vmem:[%s2374_s28 + $0x18] sm:$0xff] (!%p1829_p12)   ;;  %v720_v31 = vstv (!%p1829_p12), %s1827_s23 }
  0x32   : > { %1930 = vmatpush3.bf16.xpose.msra.mxu0 (!%p1829_p12), %v564_v4  ;;  %1945 = vmatprep.mubr.msk.bf16.mxu0 (!%p1829_p12), %vm538_vm2, %v2087_v7  ;;  %v573_v10 = vsel (!%p1829_p12), %vm538_vm2, %v2082_v9, 0  ;;  %v2083_v11 = vld [vmem:[%s2374_s28 + $0x20] sm:$0xff] (!%p1829_p12)   ;;  %v2084_v13 = vld [vmem:[%s2374_s28 + $0x28] sm:$0xff] (!%p1829_p12)   ;;  %v2085_v15 = vld [vmem:[%s2374_s28 + $0x30] sm:$0xff] (!%p1829_p12)   ;;  %v2476_v27 = vshrl.u32 (!%p1829_p12), %v684_v26, 7  ;;  %v719_v29 = vand.u32 (!%p1829_p12), 127, %v684_v26 }
  0x33   : > { %1994 = vmatprep.subr.msk.bf16.mxu0 (!%p1829_p12), %vm538_vm2, %v2080_v3  ;;  %v576_v12 = vsel (!%p1829_p12), %vm538_vm2, %v2083_v11, 0  ;;  %v579_v14 = vsel (!%p1829_p12), %vm538_vm2, %v2084_v13, 0  ;;  %v582_v16 = vsel (!%p1829_p12), %vm538_vm2, %v2085_v15, 0  ;;  %v2086_v17 = vld [vmem:[%s2374_s28 + $0x38] sm:$0xff] (!%p1829_p12)   ;;  %v2088_v19 = vld [vmem:[%s2364_s7 + $0x8] sm:$0xff] (!%p1829_p12)   ;;  %v2089_v20 = vld [vmem:[%s2364_s7 + $0x10] sm:$0xff] (!%p1829_p12)  }
  0x34   : > { %v585_v18 = vsel (!%p1829_p12), %vm538_vm2, %v2086_v17, 0  ;;  %v2090_v21 = vld [vmem:[%s2364_s7 + $0x18] sm:$0xff] (!%p1829_p12)   ;;  %v2091_v22 = vld [vmem:[%s2364_s7 + $0x20] sm:$0xff] (!%p1829_p12)   ;;  %v2092_v23 = vld [vmem:[%s2364_s7 + $0x28] sm:$0xff] (!%p1829_p12)   ;;  %v687_v28 = vadd.s32 (!%p1829_p12), 16, %v2476_v27  ;;  %v2486_v33 = vadd.s32 (!%p1829_p12), %v720_v31, %v719_v29  ;;  %v688_v34 = vadd.s32 (!%p1829_p12), 24, %v2476_v27 }
  0x35   : > { %v2093_v24 = vld [vmem:[%s2364_s7 + $0x30] sm:$0xff] (!%p1829_p12)   ;;  %v2094_v25 = vld [vmem:[%s2364_s7 + $0x38] sm:$0xff] (!%p1829_p12)   ;;  %v702_v35 = vadd.s32 (!%p1829_p12), %v2481_v30, %v2476_v27  ;;  %v686_v36 = vadd.s32 (!%p1829_p12), 8, %v2476_v27  ;;  %v689_v39 = vadd.s32 (!%p1829_p12), 32, %v2476_v27  ;;  %v692_v41 = vadd.s32 (!%p1829_p12), 56, %v2476_v27 }
  0x36   : > { %v704_v32 = vadd.s32 (!%p1829_p12), %v2481_v30, %v687_v28  ;;  %v705_v37 = vadd.s32 (!%p1829_p12), %v2481_v30, %v688_v34  ;;  %v691_v48 = vadd.s32 (!%p1829_p12), 48, %v2476_v27  ;;  %v690_v50 = vadd.s32 (!%p1829_p12), 40, %v2476_v27  ;;  %v2096_v34 = vld [vmem:[%s2379_s5 + $0x8] sm:$0xff] (!%p1829_p12)  }
  0x37   : > { %vm722_vm4 = vcmp.le.s32.totalorder (!%p1829_p12), %v2486_v33, %v702_v35  ;;  %v703_v38 = vadd.s32 (!%p1829_p12), %v2481_v30, %v686_v36  ;;  %v706_v47 = vadd.s32 (!%p1829_p12), %v2481_v30, %v689_v39  ;;  %v709_v49 = vadd.s32 (!%p1829_p12), %v2481_v30, %v692_v41  ;;  %v2586_v35 = vld [vmem:[#allocation2] sm:$0xff] (!%p1829_p12)  ;;  %v2599_v41 = vld [vmem:[#allocation2 + $0x8] sm:$0xff] (!%p1829_p12) }
  0x38   : > { %vm724_vm3 = vcmp.le.s32.totalorder %v2486_v33, %v704_v32  ;;  %vm725_vm5 = vcmp.le.s32.totalorder %v2486_v33, %v705_v37  ;;  %v708_v53 = vadd.s32 %v2481_v30, %v691_v48  ;;  %v693_v54 = vadd.s32 64, %v2476_v27  ;;  %v2095_v32 = vld [vmem:[%s2379_s5] sm:$0xff]  }
  0x39   : > { %vm723_vm6 = vcmp.le.s32.totalorder %v2486_v33, %v703_v38  ;;  %vm726_vm7 = vcmp.le.s32.totalorder %v2486_v33, %v706_v47  ;;  %vm729_vm8 = vcmp.le.s32.totalorder %v2486_v33, %v709_v49  ;;  %v707_v56 = vadd.s32 %v2481_v30, %v690_v50  ;;  %1961 = vmatprep.subr.bf16.mxu1 %v2095_v32  ;;  %v2614_v49 = vld [vmem:[#allocation2 + $0x20] sm:$0xff]  ;;  %v2098_v50 = vld [vmem:[%s2379_s5 + $0x18] sm:$0xff]  }
  0x3a   : > { %1932 = vmatpush3.bf16.xpose.msra.mxu0 %v567_v6  ;;  %v696_v57 = vadd.s32 88, %v2476_v27  ;;  %v695_v59 = vadd.s32 80, %v2476_v27  ;;  %v694_v62 = vadd.s32 72, %v2476_v27  ;;  %vm728_vm9 = vcmp.le.s32.totalorder %v2486_v33, %v708_v53  ;;  %1962 = vmatpush3.bf16.msra.mxu1 %v2095_v32  ;;  %v2619_v53 = vld [vmem:[#allocation2 + $0x38] sm:$0xff] }
  0x3b   : > { %1995 = vmatprep.subr.msk.bf16.mxu0 %vm538_vm2, %v2081_v5  ;;  %v710_v1 = vadd.s32 %v2481_v30, %v693_v54  ;;  %vm727_vm10 = vcmp.le.s32.totalorder %v2486_v33, %v707_v56  ;;  %v697_v7 = vadd.s32 96, %v2476_v27  ;;  %1963 = vmatprep.subr.bf16.mxu1 %v2096_v34 }
  0x3c   : > { %v713_v2 = vadd.s32 %v2481_v30, %v696_v57  ;;  %v712_v3 = vadd.s32 %v2481_v30, %v695_v59  ;;  %v711_v5 = vadd.s32 %v2481_v30, %v694_v62  ;;  %v2099_v59 = vld [vmem:[%s2379_s5 + $0x20] sm:$0xff]  }
  0x3d   : > { %vm730_vm11 = vcmp.le.s32.totalorder %v2486_v33, %v710_v1 }
  0x3e   : > { %vm733_vm12 = vcmp.le.s32.totalorder %v2486_v33, %v713_v2  ;;  %vm732_vm13 = vcmp.le.s32.totalorder %v2486_v33, %v712_v3  ;;  %vm731_vm14 = vcmp.le.s32.totalorder %v2486_v33, %v711_v5  ;;  %1964 = vmatpush3.bf16.msra.mxu1 %v2096_v34  ;;  %v2643_v3 = vld [vmem:[#allocation2 + $0x40] sm:$0xff]  ;;  %v2100_v5 = vld [vmem:[%s2379_s5 + $0x28] sm:$0xff]  }
  0x42   : > { %1934 = vmatpush3.bf16.xpose.msra.mxu0 %v570_v8 }
  0x43   : > { %1996 = vmatprep.subr.msk.bf16.mxu0 %vm538_vm2, %v2082_v9  ;;  %v700_v9 = vadd.s32 120, %v2476_v27 }
  0x4a   : > { %1936 = vmatpush3.bf16.xpose.msra.mxu0 %v573_v10 }
  0x4b   : > { %1997 = vmatprep.subr.msk.bf16.mxu0 %vm538_vm2, %v2083_v11  ;;  %v699_v11 = vadd.s32 112, %v2476_v27 }
  0x52   : > { %1938 = vmatpush3.bf16.xpose.msra.mxu0 %v576_v12  ;;  %v2275_v12 = vmov 0  }
  0x53   : > { %1998 = vmatprep.subr.msk.bf16.mxu0 %vm538_vm2, %v2084_v13  ;;  %2078 = vset.pattern.permute.xlu1 %v2275_v12 }
  0x54   : > { %2077 = vset.pattern.permute.xlu0 %v2275_v12  ;;  %v2659_v12 = vld [vmem:[#allocation2 + $0x50] sm:$0xff] }
  0x5a   : > { %1940 = vmatpush3.bf16.xpose.msra.mxu0 %v579_v14 }
  0x5b   : > { %1999 = vmatprep.subr.msk.bf16.mxu0 %vm538_vm2, %v2085_v15  ;;  %v698_v15 = vadd.s32 104, %v2476_v27 }
  0x62   : > { %1942 = vmatpush3.bf16.xpose.msra.mxu0 %v582_v16 }
  0x63   : > { %2000 = vmatprep.subr.msk.bf16.mxu0 %vm538_vm2, %v2086_v17 }
  0x6a   : > { %1944 = vmatpush3.bf16.xpose.msra.mxu0 %v585_v18  ;;  %v714_v18 = vadd.s32 %v2481_v30, %v697_v7  ;;  %v2649_v7 = vld [vmem:[#allocation2 + $0x58] sm:$0xff] }
  0x6c   : > { %vm734_vm15 = vcmp.le.s32.totalorder %v2486_v33, %v714_v18 }
  0x71   : > { %1946 = vmatmul.mubr.msk.bf16.vlgmr.msra.gmra.mrb[0].mxu0 %vm538_vm2, %v2088_v19 }
  0x72   : > { %1949 = vmatprep.mubr.msk.bf16.mxu0 %vm538_vm2, %v2089_v20  ;;  %v717_v20 = vadd.s32 %v2481_v30, %v700_v9 }
  0x74   : > { %vm737_vm0 = vcmp.le.s32.totalorder %v2486_v33, %v717_v20 }
  0x79   : > { %1950 = vmatmul.mubr.msk.bf16.gmra.mrb[4].mxu0 %vm538_vm2, %v2090_v21 }
  0x7a   : > { %1953 = vmatprep.mubr.msk.bf16.mxu0 %vm538_vm2, %v2091_v22  ;;  %v716_v22 = vadd.s32 %v2481_v30, %v699_v11 }
  0x7c   : > { %vm736_vm1 = vcmp.le.s32.totalorder %v2486_v33, %v716_v22 }
  0x81   : > { %1954 = vmatmul.mubr.msk.bf16.gmra.mrb[8].mxu0 %vm538_vm2, %v2092_v23  ;;  %v715_v23 = vadd.s32 %v2481_v30, %v698_v15  ;;  %v2665_v15 = vld [vmem:[#allocation2 + $0x48] sm:$0xff] }
  0x82   : > { %1957 = vmatprep.mubr.msk.bf16.mxu0 %vm538_vm2, %v2093_v24 }
  0x89   : > { %1958 = vmatmul.mubr.msk.bf16.gmra.mrb[12].mxu0 %vm538_vm2, %v2094_v25 }
 0x144   : > { %v1947_v40 = vpop.f32.mrb[0].mxu0 }
 0x145   : > { %v621_v42 = vpop.f32.mrb[1].mxu0  ;;  %v2498_v43 = vsel %vm724_vm3, %v1947_v40, -1e+30  ;;  %vm735_vm3 = vcmp.le.s32.totalorder %v2486_v33, %v715_v23  ;;  %v2584_v33 = vld [vmem:[#allocation2 + $0x10] sm:$0xff]  ;;  %v2594_v40 = vld [vmem:[#allocation2 + $0x18] sm:$0xff] }
 0x146   : > { %774 = vmax.xlane.f32.xlu1 %v2498_v43  ;;  %v1948_v44 = vpop.f32.mrb[2].mxu0  ;;  %v2501_v45 = vsel %vm722_vm4, %v621_v42, -1e+30  ;;  %vm1074_vm4 = vcmask 7168   ;;  %v2097_v42 = vld [vmem:[%s2379_s5 + $0x10] sm:$0xff]  }
 0x147   : > { %770 = vmax.xlane.f32.xlu0 %v2501_v45  ;;  %v624_v46 = vpop.f32.mrb[3].mxu0  ;;  %v2510_v51 = vsel %vm725_vm5, %v1948_v44, -1e+30  ;;  %1965 = vmatprep.subr.bf16.mxu1 %v2097_v42 }
 0x148   : > { %v2513_v52 = vsel %vm723_vm6, %v624_v46, -1e+30  ;;  %1966 = vmatpush3.bf16.msra.mxu1 %v2097_v42  ;;  %v767_v42 = vld [vmem:[#allocation2 + $0x68] sm:$0xff] }
 0x149   : > { %1967 = vmatprep.subr.bf16.mxu1 %v2098_v50 }
 0x14a   : > { %776 = vmax.xlane.f32.xlu1 %v2510_v51 }
 0x14b   : > { %772 = vmax.xlane.f32.xlu0 %v2513_v52 }
 0x14c   : > { %v1951_v55 = vpop.f32.mrb[4].mxu0  ;;  %1968 = vmatpush3.bf16.msra.mxu1 %v2098_v50 }
 0x14d   : > { %v637_v58 = vpop.f32.mrb[5].mxu0  ;;  %v2535_v4 = vsel %vm728_vm9, %v1951_v55, -1e+30  ;;  %1969 = vmatprep.subr.bf16.mxu1 %v2099_v59 }
 0x14e   : > { %v1952_v60 = vpop.f32.mrb[6].mxu0  ;;  %v2523_v61 = vsel %vm726_vm7, %v637_v58, -1e+30  ;;  %v2628_v58 = vld [vmem:[#allocation2 + $0x30] sm:$0xff] }
 0x14f   : > { %778 = vmax.xlane.f32.xlu0 %v2523_v61  ;;  %v640_v63 = vpop.f32.mrb[7].mxu0  ;;  %v2527_v0 = vsel %vm729_vm8, %v1952_v60, -1e+30  ;;  %v2633_v60 = vld [vmem:[#allocation2 + $0x28] sm:$0xff] }
 0x150   : > { %784 = vmax.xlane.f32.xlu1 %v2527_v0  ;;  %v2539_v6 = vsel %vm727_vm10, %v640_v63, -1e+30  ;;  %1970 = vmatpush3.bf16.msra.mxu1 %v2099_v59 }
 0x151   : > { %1971 = vmatprep.subr.bf16.mxu1 %v2100_v5 }
 0x153   : > { %782 = vmax.xlane.f32.xlu0 %v2535_v4 }
 0x154   : > { %780 = vmax.xlane.f32.xlu1 %v2539_v6  ;;  %v1955_v8 = vpop.f32.mrb[8].mxu0  ;;  %1972 = vmatpush3.bf16.msra.mxu1 %v2100_v5 }
 0x155   : > { %v653_v10 = vpop.f32.mrb[9].mxu0  ;;  %v2557_v19 = vsel %vm732_vm13, %v1955_v8, -1e+30 }
 0x156   : > { %v1956_v13 = vpop.f32.mrb[10].mxu0  ;;  %v2548_v14 = vsel %vm730_vm11, %v653_v10, -1e+30 }
 0x157   : > { %v2552_v16 = vsel %vm733_vm12, %v1956_v13, -1e+30  ;;  %786 = vmax.xlane.f32.xlu0 %v2548_v14  ;;  %v656_v17 = vpop.f32.mrb[11].mxu0  ;;  %v2101_v13 = vld [vmem:[%s2379_s5 + $0x30] sm:$0xff]  }
 0x158   : > { %792 = vmax.xlane.f32.xlu1 %v2552_v16  ;;  %v2560_v21 = vsel %vm731_vm14, %v656_v17, -1e+30  ;;  %1973 = vmatprep.subr.bf16.mxu1 %v2101_v13 }
 0x159   : > { %1974 = vmatpush3.bf16.msra.mxu1 %v2101_v13 }
 0x15b   : > { %790 = vmax.xlane.f32.xlu0 %v2557_v19 }
 0x15c   : > { %788 = vmax.xlane.f32.xlu1 %v2560_v21  ;;  %v1959_v24 = vpop.f32.mrb[12].mxu0 }
 0x15d   : > { %v669_v25 = vpop.f32.mrb[13].mxu0  ;;  %v2576_v30 = vsel %vm736_vm1, %v1959_v24, -1e+30  ;;  %v2677_v24 = vld [vmem:[#allocation2 + $0x60] sm:$0xff] }
 0x15e   : > { %v1960_v26 = vpop.f32.mrb[14].mxu0  ;;  %v2569_v27 = vsel %vm734_vm15, %v669_v25, -1e+30  ;;  %v2102_v25 = vld [vmem:[%s2379_s5 + $0x38] sm:$0xff]  }
 0x15f   : > { %v2572_v28 = vsel %vm737_vm0, %v1960_v26, -1e+30  ;;  %794 = vmax.xlane.f32.xlu0 %v2569_v27  ;;  %v672_v29 = vpop.f32.mrb[15].mxu0  ;;  %v2683_v26 = vld [vmem:[#allocation2 + $0x78] sm:$0xff]  ;;  %1975 = vmatprep.subr.bf16.mxu1 %v2102_v25 }
 0x160   : > { %800 = vmax.xlane.f32.xlu1 %v2572_v28  ;;  %v2578_v31 = vsel %vm735_vm3, %v672_v29, -1e+30  ;;  %1976 = vmatpush3.bf16.msra.mxu1 %v2102_v25 }
 0x163   : > { %798 = vmax.xlane.f32.xlu0 %v2576_v30 }
 0x164   : > { %796 = vmax.xlane.f32.xlu1 %v2578_v31 }
 0x1d3   : > { %v775_v36 = vpop.xlane.xlu1 %774 }
 0x1d4   : > { %v2589_v37 = vmax.f32 %v2584_v33, %v775_v36  ;;  %v771_v38 = vpop.xlane.xlu0 %770 }
 0x1d5   : > { %v2592_v39 = vmax.f32 %v2586_v35, %v771_v38 }
 0x1d6   : > { %1390 = vst.msk [vmem:[#allocation2 + $0x10] sm:$0xff] %vm1074_vm4, %v2589_v37  ;;  %878 = vperm.xlu1 %2078, %v2589_v37  }
 0x1d7   : > { %1388 = vst.msk [vmem:[#allocation2] sm:$0xff] %vm1074_vm4, %v2592_v39  ;;  %v777_v44 = vpop.xlane.xlu1 %776  ;;  %868 = vperm.xlu0 %2077, %v2592_v39   ;;  %v818_v18 = vsub.f32 %v2586_v35, %v2592_v39  ;;  %v2696_v39 = vld [vmem:[#allocation2 + $0x70] sm:$0xff] }
 0x1d8   : > { %v2606_v46 = vmax.f32 %v2594_v40, %v777_v44  ;;  %v773_v47 = vpop.xlane.xlu0 %772 }
 0x1d9   : > { %v2609_v48 = vmax.f32 %v2599_v41, %v773_v47  ;;  %v834_v32 = vmul.f32 1.442695, %v818_v18 }
 0x1da   : > { %1391 = vst.msk [vmem:[#allocation2 + $0x18] sm:$0xff] %vm1074_vm4, %v2606_v46  ;;  %883 = vperm.xlu1 %2078, %v2606_v46   ;;  %v821_v34 = vsub.f32 %v2594_v40, %v2606_v46 }
 0x1db   : > { %1389 = vst.msk [vmem:[#allocation2 + $0x8] sm:$0xff] %vm1074_vm4, %v2609_v48  ;;  %v819_v44 = vsub.f32 %v2599_v41, %v2609_v48  ;;  %2103 = vpow2.f32 %v834_v32 }
 0x1dc   : > { %v779_v54 = vpop.xlane.xlu0 %778  ;;  %v840_v47 = vmul.f32 1.442695, %v821_v34 }
 0x1dd   : > { %v2622_v55 = vmax.f32 %v2614_v49, %v779_v54  ;;  %v785_v56 = vpop.xlane.xlu1 %784 }
 0x1de   : > { %v2625_v57 = vmax.f32 %v2619_v53, %v785_v56  ;;  %873 = vperm.xlu1 %2078, %v2609_v48   ;;  %v820_v48 = vsub.f32 %v2584_v33, %v2589_v37  ;;  %2105 = vpow2.f32 %v840_v47 }
 0x1df   : > { %1392 = vst.msk [vmem:[#allocation2 + $0x20] sm:$0xff] %vm1074_vm4, %v2622_v55  ;;  %v822_v5 = vsub.f32 %v2614_v49, %v2622_v55 }
 0x1e0   : > { %1395 = vst.msk [vmem:[#allocation2 + $0x38] sm:$0xff] %vm1074_vm4, %v2625_v57  ;;  %v783_v62 = vpop.xlane.xlu0 %782 }
 0x1e1   : > { %v2638_v63 = vmax.f32 %v2628_v58, %v783_v62  ;;  %v781_v1 = vpop.xlane.xlu1 %780  ;;  %v836_v62 = vmul.f32 1.442695, %v819_v44 }
 0x1e2   : > { %v2641_v2 = vmax.f32 %v2633_v60, %v781_v1 }
 0x1e3   : > { %1394 = vst.msk [vmem:[#allocation2 + $0x30] sm:$0xff] %vm1074_vm4, %v2638_v63  ;;  %898 = vperm.xlu1 %2078, %v2638_v63   ;;  %2107 = vpow2.f32 %v836_v62 }
 0x1e4   : > { %1393 = vst.msk [vmem:[#allocation2 + $0x28] sm:$0xff] %vm1074_vm4, %v2641_v2  ;;  %v787_v8 = vpop.xlane.xlu0 %786  ;;  %v823_v50 = vsub.f32 %v2633_v60, %v2641_v2  ;;  %v825_v60 = vsub.f32 %v2619_v53, %v2625_v57  ;;  %v842_v53 = vmul.f32 1.442695, %v822_v5 }
 0x1e5   : > { %v793_v9 = vpop.xlane.xlu1 %792  ;;  %v2654_v10 = vmax.f32 %v2643_v3, %v787_v8  ;;  %v2729_v37 = vpop.eup %2103 }
 0x1e6   : > { %v2657_v11 = vmax.f32 %v2649_v7, %v793_v9  ;;  %v844_v1 = vmul.f32 1.442695, %v823_v50  ;;  %v848_v8 = vmul.f32 1.442695, %v825_v60 }
 0x1e7   : > { %1396 = vst.msk [vmem:[#allocation2 + $0x40] sm:$0xff] %vm1074_vm4, %v2654_v10  ;;  %888 = vperm.xlu1 %2078, %v2622_v55  }
 0x1e8   : > { %1399 = vst.msk [vmem:[#allocation2 + $0x58] sm:$0xff] %vm1074_vm4, %v2657_v11  ;;  %v791_v17 = vpop.xlane.xlu0 %790  ;;  %2109 = vpow2.f32 %v844_v1  ;;  %v829_v33 = vsub.f32 %v2649_v7, %v2657_v11  ;;  %v2737_v9 = vpop.eup %2105 }
 0x1e9   : > { %v789_v20 = vpop.xlane.xlu1 %788  ;;  %v2672_v22 = vmax.f32 %v2659_v12, %v791_v17 }
 0x1ea   : > { %v2675_v23 = vmax.f32 %v2665_v15, %v789_v20  ;;  %v856_v49 = vmul.f32 1.442695, %v829_v33 }
 0x1eb   : > { %1398 = vst.msk [vmem:[#allocation2 + $0x50] sm:$0xff] %vm1074_vm4, %v2672_v22  ;;  %893 = vperm.xlu1 %2078, %v2641_v2   ;;  %v838_v2 = vmul.f32 1.442695, %v820_v48 }
 0x1ec   : > { %1397 = vst.msk [vmem:[#allocation2 + $0x48] sm:$0xff] %vm1074_vm4, %v2675_v23  ;;  %913 = vperm.xlu0 %2077, %v2675_v23   ;;  %v795_v29 = vpop.xlane.xlu0 %794  ;;  %v827_v55 = vsub.f32 %v2665_v15, %v2675_v23  ;;  %v826_v15 = vsub.f32 %v2643_v3, %v2654_v10 }
 0x1ed   : > { %v801_v35 = vpop.xlane.xlu1 %800  ;;  %v2691_v36 = vmax.f32 %v2677_v24, %v795_v29  ;;  %2111 = vpow2.f32 %v838_v2  ;;  %v2743_v13 = vpop.eup %2107 }
 0x1ee   : > { %v2694_v38 = vmax.f32 %v2683_v26, %v801_v35  ;;  %2113 = vpow2.f32 %v848_v8  ;;  %v850_v23 = vmul.f32 1.442695, %v826_v15 }
 0x1ef   : > { %1400 = vst.msk [vmem:[#allocation2 + $0x60] sm:$0xff] %vm1074_vm4, %v2691_v36  ;;  %903 = vperm.xlu1 %2078, %v2625_v57   ;;  %v824_v57 = vsub.f32 %v2628_v58, %v2638_v63  ;;  %2115 = vpow2.f32 %v842_v53  ;;  %v852_v58 = vmul.f32 1.442695, %v827_v55  ;;  %v830_v25 = vsub.f32 %v2677_v24, %v2691_v36 }
 0x1f0   : > { %v833_v40 = vsub.f32 %v2683_v26, %v2694_v38  ;;  %1403 = vst.msk [vmem:[#allocation2 + $0x78] sm:$0xff] %vm1074_vm4, %v2694_v38  ;;  %923 = vperm.xlu0 %2077, %v2657_v11   ;;  %v799_v46 = vpop.xlane.xlu0 %798  ;;  %v828_v11 = vsub.f32 %v2659_v12, %v2672_v22  ;;  %2117 = vpow2.f32 %v856_v49 }
 0x1f1   : > { %v797_v54 = vpop.xlane.xlu1 %796  ;;  %v2711_v56 = vmax.f32 %v2696_v39, %v799_v46  ;;  %v846_v7 = vmul.f32 1.442695, %v824_v57  ;;  %v858_v29 = vmul.f32 1.442695, %v830_v25 }
 0x1f2   : > { %v815_v59 = vmax.f32 %v767_v42, %v797_v54  ;;  %v2745_v17 = vpop.eup %2109  ;;  %v854_v18 = vmul.f32 1.442695, %v828_v11 }
 0x1f3   : > { %v832_v41 = vsub.f32 %v2696_v39, %v2711_v56  ;;  %1402 = vst.msk [vmem:[#allocation2 + $0x70] sm:$0xff] %vm1074_vm4, %v2711_v56  ;;  %908 = vperm.xlu1 %2078, %v2654_v10   ;;  %2119 = vpow2.f32 %v846_v7 }
 0x1f4   : > { %1401 = vst.msk [vmem:[#allocation2 + $0x68] sm:$0xff] %vm1074_vm4, %v815_v59  ;;  %933 = vperm.xlu0 %2077, %v815_v59   ;;  %v831_v63 = vsub.f32 %v767_v42, %v815_v59  ;;  %2121 = vpow2.f32 %v852_v58 }
 0x1f5   : > { %2123 = vpow2.f32 %v854_v18 }
 0x1f6   : > { %v860_v12 = vmul.f32 1.442695, %v831_v63 }
 0x1f7   : > { %918 = vperm.xlu1 %2078, %v2672_v22   ;;  %v2751_v20 = vpop.eup %2111 }
 0x1f8   : > { %943 = vperm.xlu0 %2077, %v2694_v38   ;;  %v2753_v22 = vpop.eup %2113  ;;  %2125 = vpow2.f32 %v860_v12 }
 0x1f9   : > { %v2759_v3 = vpop.eup %2115  ;;  %2127 = vpow2.f32 %v850_v23 }
 0x1fa   : > { %v2761_v10 = vpop.eup %2117  ;;  %2129 = vpow2.f32 %v858_v29 }
 0x1fb   : > { %928 = vperm.xlu1 %2078, %v2691_v36  }
 0x1fc   : > { %1109 = vperm.xlu0 %2077, %v2729_v37  }
 0x1fd   : > { %v2765_v32 = vpop.eup %2119 }
 0x1fe   : > { %v2767_v34 = vpop.eup %2121 }
 0x1ff   : > { %938 = vperm.xlu1 %2078, %v2711_v56   ;;  %v2771_v24 = vpop.eup %2123 }
 0x200   : > { %1124 = vperm.xlu0 %2077, %v2737_v9  }
 0x202   : > { %v2773_v35 = vpop.eup %2125 }
 0x203   : > { %1114 = vperm.xlu1 %2078, %v2743_v13   ;;  %v2777_v36 = vpop.eup %2127 }
 0x204   : > { %1134 = vperm.xlu0 %2077, %v2745_v17   ;;  %v2780_v42 = vpop.eup %2129 }
 0x207   : > { %1119 = vperm.xlu1 %2078, %v2751_v20  }
 0x208   : > { %1144 = vperm.xlu0 %2077, %v2753_v22  }
 0x20b   : > { %1129 = vperm.xlu1 %2078, %v2759_v3  }
 0x20c   : > { %1164 = vperm.xlu0 %2077, %v2761_v10  }
 0x20f   : > { %1139 = vperm.xlu1 %2078, %v2765_v32  }
 0x210   : > { %1154 = vperm.xlu0 %2077, %v2767_v34  }
 0x213   : > { %1159 = vperm.xlu1 %2078, %v2771_v24  }
 0x214   : > { %1174 = vperm.xlu0 %2077, %v2773_v35  }
 0x217   : > { %1149 = vperm.xlu1 %2078, %v2777_v36  }
 0x21b   : > { %1169 = vperm.xlu1 %2078, %v2780_v42  }
 0x255   : > { %v879_v44 = vpop.permute.xlu1 %878 }
 0x256   : > { %v948_v46 = vsub.f32 %v2498_v43, %v879_v44  ;;  %v869_v47 = vpop.permute.xlu0 %868 }
 0x257   : > { %v946_v50 = vsub.f32 %v2501_v45, %v869_v47 }
 0x258   : > { %v966_v54 = vmul.f32 1.442695, %v948_v46 }
 0x259   : > { %v962_v59 = vmul.f32 1.442695, %v946_v50  ;;  %v884_v48 = vpop.permute.xlu1 %883 }
 0x25a   : > { %2131 = vpow2.f32 %v966_v54  ;;  %v949_v62 = vsub.f32 %v2510_v51, %v884_v48 }
 0x25b   : > { %2133 = vpow2.f32 %v962_v59 }
 0x25c   : > { %v968_v60 = vmul.f32 1.442695, %v949_v62 }
 0x25d   : > { %v874_v1 = vpop.permute.xlu1 %873 }
 0x25e   : > { %2135 = vpow2.f32 %v968_v60  ;;  %v947_v2 = vsub.f32 %v2513_v52, %v874_v1 }
 0x260   : > { %v964_v5 = vmul.f32 1.442695, %v947_v2 }
 0x262   : > { %2137 = vpow2.f32 %v964_v5  ;;  %v899_v8 = vpop.permute.xlu1 %898 }
 0x263   : > { %v952_v43 = vsub.f32 %v2535_v4, %v899_v8 }
 0x264   : > { %v2132_v33 = vpop.eup %2131 }
 0x265   : > { %v2134_v53 = vpop.eup %2133  ;;  %v974_v45 = vmul.f32 1.442695, %v952_v43  ;;  %1030 = vadd.xlane.f32.xlu0 %v2132_v33 }
 0x266   : > { %1026 = vadd.xlane.f32.xlu1 %v2134_v53  ;;  %v889_v57 = vpop.permute.xlu1 %888 }
 0x267   : > { %2139 = vpow2.f32 %v974_v45  ;;  %v950_v51 = vsub.f32 %v2523_v61, %v889_v57 }
 0x268   : > { %v2136_v49 = vpop.eup %2135 }
 0x269   : > { %v970_v55 = vmul.f32 1.442695, %v950_v51  ;;  %v1204_v12 = vpack.c.bf16 %v2136_v49, %v2132_v33 }
 0x26a   : > { %1032 = vadd.xlane.f32.xlu1 %v2136_v49  ;;  %v894_v7 = vpop.permute.xlu1 %893 }
 0x26b   : > { %2141 = vpow2.f32 %v970_v55  ;;  %v951_v52 = vsub.f32 %v2539_v6, %v894_v7  ;;  %v914_v11 = vpop.permute.xlu0 %913 }
 0x26c   : > { %v2138_v58 = vpop.eup %2137  ;;  %v955_v15 = vsub.f32 %v2560_v21, %v914_v11 }
 0x26d   : > { %v972_v63 = vmul.f32 1.442695, %v951_v52  ;;  %1028 = vadd.xlane.f32.xlu0 %v2138_v58  ;;  %v1203_v4 = vpack.c.bf16 %v2138_v58, %v2134_v53 }
 0x26e   : > { %v904_v18 = vpop.permute.xlu1 %903  ;;  %v980_v44 = vmul.f32 1.442695, %v955_v15 }
 0x26f   : > { %2143 = vpow2.f32 %v972_v63  ;;  %v953_v23 = vsub.f32 %v2527_v0, %v904_v18  ;;  %v924_v61 = vpop.permute.xlu0 %923  ;;  %1977 = vmatprep.mubr.bf16.mxu1 %v1203_v4  ;;  %v862_v18 = vmul.f32 1.442695, %v832_v41 }
 0x270   : > { %1978 = vmatmul.mubr.bf16.vlgmr.msra.gmra.mrb[0].mxu1 %v1204_v12  ;;  %v957_v6 = vsub.f32 %v2552_v16, %v924_v61  ;;  %v864_v12 = vmul.f32 1.442695, %v833_v40 }
 0x271   : > { %v2140_v25 = vpop.eup %2139  ;;  %v976_v29 = vmul.f32 1.442695, %v953_v23 }
 0x272   : > { %1038 = vadd.xlane.f32.xlu0 %v2140_v25  ;;  %v909_v46 = vpop.permute.xlu1 %908  ;;  %v984_v59 = vmul.f32 1.442695, %v957_v6 }
 0x273   : > { %2145 = vpow2.f32 %v976_v29  ;;  %v954_v47 = vsub.f32 %v2548_v14, %v909_v46  ;;  %v934_v50 = vpop.permute.xlu0 %933 }
 0x274   : > { %2147 = vpow2.f32 %v980_v44  ;;  %v959_v0 = vsub.f32 %v2578_v31, %v934_v50 }
 0x275   : > { %v2142_v21 = vpop.eup %2141  ;;  %v978_v54 = vmul.f32 1.442695, %v954_v47 }
 0x276   : > { %1034 = vadd.xlane.f32.xlu0 %v2142_v21  ;;  %v919_v48 = vpop.permute.xlu1 %918  ;;  %v988_v2 = vmul.f32 1.442695, %v959_v0 }
 0x277   : > { %2149 = vpow2.f32 %v978_v54  ;;  %v956_v62 = vsub.f32 %v2557_v19, %v919_v48  ;;  %v944_v60 = vpop.permute.xlu0 %943 }
 0x278   : > { %2151 = vpow2.f32 %v984_v59  ;;  %v961_v5 = vsub.f32 %v2572_v28, %v944_v60  ;;  %v994_v59 = vld [vmem:[#allocation3] sm:$0xff] }
 0x279   : > { %v2144_v1 = vpop.eup %2143  ;;  %v982_v16 = vmul.f32 1.442695, %v956_v62  ;;  %v1010_v62 = vmul.f32 %v2729_v37, %v994_v59  ;;  %v1000_v37 = vld [vmem:[#allocation3 + $0x30] sm:$0xff] }
 0x27a   : > { %v929_v14 = vpop.permute.xlu1 %928  ;;  %v1205_v8 = vpack.c.bf16 %v2144_v1, %v2142_v21  ;;  %v992_v53 = vmul.f32 1.442695, %v961_v5  ;;  %v996_v21 = vld [vmem:[#allocation3 + $0x10] sm:$0xff] }
 0x27b   : > { %2153 = vpow2.f32 %v982_v16  ;;  %v958_v43 = vsub.f32 %v2569_v27, %v929_v14  ;;  %v1012_v0 = vmul.f32 %v2751_v20, %v996_v21  ;;  %v997_v16 = vld [vmem:[#allocation3 + $0x18] sm:$0xff]  ;;  %v995_v14 = vld [vmem:[#allocation3 + $0x8] sm:$0xff] }
 0x27c   : > { %1981 = vmatprep.mubr.bf16.mxu1 %v1205_v8  ;;  %2155 = vpow2.f32 %v988_v2  ;;  %v1013_v5 = vmul.f32 %v2737_v9, %v997_v16 }
 0x27d   : > { %v2146_v33 = vpop.eup %2145  ;;  %v986_v31 = vmul.f32 1.442695, %v958_v43 }
 0x27e   : > { %1040 = vadd.xlane.f32.xlu1 %v2146_v33  ;;  %v939_v45 = vpop.permute.xlu1 %938  ;;  %v1206_v19 = vpack.c.bf16 %v2146_v33, %v2140_v25  ;;  %v2148_v51 = vpop.eup %2147  ;;  %v1011_v33 = vmul.f32 %v2743_v13, %v995_v14  ;;  %v1001_v13 = vld [vmem:[#allocation3 + $0x38] sm:$0xff]  ;;  %v1006_v14 = vld [vmem:[#allocation3 + $0x60] sm:$0xff] }
 0x27f   : > { %2157 = vpow2.f32 %v986_v31  ;;  %v960_v57 = vsub.f32 %v2576_v30, %v939_v45  ;;  %v2811_v25 = vpop.permute.xlu0 %1109 }
 0x280   : > { %1982 = vmatmul.mubr.bf16.gmra.mrb[4].mxu1 %v1206_v19  ;;  %2159 = vpow2.f32 %v992_v53  ;;  %v1016_v53 = vmul.f32 %v2765_v32, %v1000_v37  ;;  %v998_v19 = vld [vmem:[#allocation3 + $0x20] sm:$0xff] }
 0x281   : > { %v2150_v49 = vpop.eup %2149  ;;  %v990_v28 = vmul.f32 1.442695, %v960_v57  ;;  %v1014_v9 = vmul.f32 %v2759_v3, %v998_v19  ;;  %v1092_v19 = vld [vmem:[#allocation4 + $0x8] sm:$0xff] }
 0x282   : > { %1036 = vadd.xlane.f32.xlu1 %v2144_v1  ;;  %v1207_v55 = vpack.c.bf16 %v2148_v51, %v2150_v49  ;;  %v2152_v27 = vpop.eup %2151  ;;  %v2813_v29 = vpop.permute.xlu1 %1114 }
 0x283   : > { %2161 = vpow2.f32 %v990_v28  ;;  %v2815_v39 = vpop.permute.xlu0 %1124  ;;  %v1017_v28 = vmul.f32 %v2753_v22, %v1001_v13  ;;  %v1002_v22 = vld [vmem:[#allocation3 + $0x40] sm:$0xff]  ;;  %v1188_v13 = vmul.f32 %v2813_v29, %v1092_v19 }
 0x284   : > { %1985 = vmatprep.mubr.bf16.mxu1 %v1207_v55  ;;  %2163 = vpow2.f32 %v862_v18  ;;  %v1003_v18 = vld [vmem:[#allocation3 + $0x48] sm:$0xff] }
 0x285   : > { %v2154_v7 = vpop.eup %2153  ;;  %2165 = vpow2.f32 %v864_v12  ;;  %v1019_v59 = vmul.f32 %v2767_v34, %v1003_v18 }
 0x286   : > { %1048 = vadd.xlane.f32.xlu1 %v2152_v27  ;;  %1046 = vadd.xlane.f32.xlu0 %v2154_v7  ;;  %v1208_v52 = vpack.c.bf16 %v2152_v27, %v2154_v7  ;;  %v2156_v11 = vpop.eup %2155  ;;  %v2817_v56 = vpop.permute.xlu1 %1119  ;;  %v999_v27 = vld [vmem:[#allocation3 + $0x28] sm:$0xff] }
 0x287   : > { %v2819_v41 = vpop.permute.xlu0 %1134  ;;  %v1015_v32 = vmul.f32 %v2745_v17, %v999_v27  ;;  %v1018_v17 = vmul.f32 %v2777_v36, %v1002_v22  ;;  %v1007_v36 = vld [vmem:[#allocation3 + $0x68] sm:$0xff] }
 0x288   : > { %1986 = vmatmul.mubr.bf16.gmra.mrb[8].mxu1 %v1208_v52 }
 0x289   : > { %v2158_v58 = vpop.eup %2157 }
 0x28a   : > { %1044 = vadd.xlane.f32.xlu1 %v2148_v51  ;;  %1042 = vadd.xlane.f32.xlu0 %v2150_v49  ;;  %v1209_v30 = vpack.c.bf16 %v2156_v11, %v2158_v58  ;;  %v2160_v63 = vpop.eup %2159  ;;  %v2821_v26 = vpop.permute.xlu1 %1129 }
 0x28b   : > { %v2823_v38 = vpop.permute.xlu0 %1144 }
 0x28c   : > { %1989 = vmatprep.mubr.bf16.mxu1 %v1209_v30 }
 0x28d   : > { %v2162_v4 = vpop.eup %2161 }
 0x28e   : > { %1056 = vadd.xlane.f32.xlu1 %v2160_v63  ;;  %1054 = vadd.xlane.f32.xlu0 %v2162_v4  ;;  %v1210_v15 = vpack.c.bf16 %v2160_v63, %v2162_v4  ;;  %v2805_v23 = vpop.eup %2163  ;;  %v2825_v40 = vpop.permute.xlu1 %1139 }
 0x28f   : > { %v2808_v61 = vpop.eup %2165  ;;  %v2827_v44 = vpop.permute.xlu0 %1164 }
 0x290   : > { %1990 = vmatmul.mubr.bf16.gmra.mrb[12].mxu1 %v1210_v15 }
 0x292   : > { %1052 = vadd.xlane.f32.xlu1 %v2156_v11  ;;  %1050 = vadd.xlane.f32.xlu0 %v2158_v58  ;;  %v2829_v6 = vpop.permute.xlu1 %1159  ;;  %v1004_v11 = vld [vmem:[#allocation3 + $0x50] sm:$0xff]  ;;  %v1005_v58 = vld [vmem:[#allocation3 + $0x58] sm:$0xff] }
 0x293   : > { %v2831_v46 = vpop.permute.xlu0 %1154  ;;  %v1020_v3 = vmul.f32 %v2771_v24, %v1004_v11  ;;  %v1021_v63 = vmul.f32 %v2761_v10, %v1005_v58  ;;  %v1009_v24 = vld [vmem:[#allocation3 + $0x78] sm:$0xff] }
 0x294   : > { %v1025_v16 = vmul.f32 %v2808_v61, %v1009_v24 }
 0x296   : > { %v2833_v47 = vpop.permute.xlu1 %1149 }
 0x297   : > { %v2835_v50 = vpop.permute.xlu0 %1174 }
 0x29a   : > { %v2837_v54 = vpop.permute.xlu1 %1169 }
 0x2a3   : > { %1179 = vperm.xlu1 %2078, %v2805_v23  }
 0x2a8   : > { %1184 = vperm.xlu0 %2077, %v2808_v61   ;;  %v1093_v61 = vld [vmem:[#allocation4 + $0x10] sm:$0xff] }
 0x2f2   : > { %v1031_v48 = vpop.xlane.xlu0 %1030 }
 0x2f3   : > { %v1060_v60 = vadd.f32 %v1031_v48, %v1012_v0  ;;  %v1027_v1 = vpop.xlane.xlu1 %1026 }
 0x2f4   : > { %v1058_v2 = vadd.f32 %v1027_v1, %v1010_v62  ;;  %v1008_v62 = vld [vmem:[#allocation3 + $0x70] sm:$0xff] }
 0x2f5   : > { %1077 = vst.msk [vmem:[#allocation3 + $0x10] sm:$0xff] %vm1074_vm4, %v1060_v60  ;;  %v1024_v1 = vmul.f32 %v2805_v23, %v1008_v62 }
 0x2f6   : > { %1075 = vst.msk [vmem:[#allocation3] sm:$0xff] %vm1074_vm4, %v1058_v2 }
 0x2f7   : > { %v1033_v8 = vpop.xlane.xlu1 %1032 }
 0x2f8   : > { %v1061_v43 = vadd.f32 %v1033_v8, %v1013_v5 }
 0x2fa   : > { %1078 = vst.msk [vmem:[#allocation3 + $0x18] sm:$0xff] %vm1074_vm4, %v1061_v43  ;;  %v1029_v20 = vpop.xlane.xlu0 %1028  ;;  %v1022_v43 = vmul.f32 %v2780_v42, %v1006_v14 }
 0x2fb   : > { %v1059_v31 = vadd.f32 %v1029_v20, %v1011_v33  ;;  %v1023_v33 = vmul.f32 %v2773_v35, %v1007_v36  ;;  %v1103_v36 = vld [vmem:[#allocation4 + $0x60] sm:$0xff] }
 0x2fd   : > { %1076 = vst.msk [vmem:[#allocation3 + $0x8] sm:$0xff] %vm1074_vm4, %v1059_v31 }
 0x2ff   : > { %v1039_v45 = vpop.xlane.xlu0 %1038 }
 0x300   : > { %v1064_v57 = vadd.f32 %v1039_v45, %v1016_v53  ;;  %v1091_v53 = vld [vmem:[#allocation4] sm:$0xff]  ;;  %v1094_v45 = vld [vmem:[#allocation4 + $0x18] sm:$0xff] }
 0x301   : > { %v1190_v42 = vmul.f32 %v2815_v39, %v1094_v45  ;;  %v1098_v39 = vld [vmem:[#allocation4 + $0x38] sm:$0xff] }
 0x302   : > { %1081 = vst.msk [vmem:[#allocation3 + $0x30] sm:$0xff] %vm1074_vm4, %v1064_v57  ;;  %v1189_v57 = vmul.f32 %v2817_v56, %v1093_v61  ;;  %v1095_v56 = vld [vmem:[#allocation4 + $0x20] sm:$0xff] }
 0x303   : > { %v1035_v51 = vpop.xlane.xlu0 %1034  ;;  %v1191_v29 = vmul.f32 %v2821_v26, %v1095_v56  ;;  %v1102_v26 = vld [vmem:[#allocation4 + $0x58] sm:$0xff] }
 0x304   : > { %v1062_v49 = vadd.f32 %v1035_v51, %v1014_v9  ;;  %v1187_v9 = vmul.f32 %v2811_v25, %v1091_v53  ;;  %v1097_v25 = vld [vmem:[#allocation4 + $0x30] sm:$0xff] }
 0x305   : > { %v1193_v11 = vmul.f32 %v2825_v40, %v1097_v25  ;;  %v1099_v40 = vld [vmem:[#allocation4 + $0x40] sm:$0xff] }
 0x306   : > { %1079 = vst.msk [vmem:[#allocation3 + $0x20] sm:$0xff] %vm1074_vm4, %v1062_v49 }
 0x30b   : > { %v1041_v55 = vpop.xlane.xlu1 %1040 }
 0x30c   : > { %v1065_v7 = vadd.f32 %v1041_v55, %v1017_v28 }
 0x30e   : > { %1082 = vst.msk [vmem:[#allocation3 + $0x38] sm:$0xff] %vm1074_vm4, %v1065_v7 }
 0x30f   : > { %v1037_v52 = vpop.xlane.xlu1 %1036 }
 0x310   : > { %v1063_v30 = vadd.f32 %v1037_v52, %v1015_v32  ;;  %v1096_v52 = vld [vmem:[#allocation4 + $0x28] sm:$0xff] }
 0x312   : > { %1080 = vst.msk [vmem:[#allocation3 + $0x28] sm:$0xff] %vm1074_vm4, %v1063_v30  ;;  %v1194_v30 = vmul.f32 %v2823_v38, %v1098_v39  ;;  %v1100_v38 = vld [vmem:[#allocation4 + $0x48] sm:$0xff] }
 0x313   : > { %v1047_v4 = vpop.xlane.xlu0 %1046  ;;  %v1049_v15 = vpop.xlane.xlu1 %1048 }
 0x314   : > { %v1068_v12 = vadd.f32 %v1047_v4, %v1020_v3  ;;  %v1069_v21 = vadd.f32 %v1049_v15, %v1021_v63  ;;  %v1192_v4 = vmul.f32 %v2819_v41, %v1096_v52  ;;  %v1195_v41 = vmul.f32 %v2833_v47, %v1099_v40  ;;  %v1106_v47 = vld [vmem:[#allocation4 + $0x78] sm:$0xff] }
 0x316   : > { %1085 = vst.msk [vmem:[#allocation3 + $0x50] sm:$0xff] %vm1074_vm4, %v1068_v12  ;;  %1086 = vst.msk [vmem:[#allocation3 + $0x58] sm:$0xff] %vm1074_vm4, %v1069_v21  ;;  %v1101_v21 = vld [vmem:[#allocation4 + $0x50] sm:$0xff] }
 0x317   : > { %v1043_v0 = vpop.xlane.xlu0 %1042  ;;  %v1045_v48 = vpop.xlane.xlu1 %1044 }
 0x318   : > { %v1066_v60 = vadd.f32 %v1043_v0, %v1018_v17  ;;  %v1067_v10 = vadd.f32 %v1045_v48, %v1019_v59  ;;  %v1197_v59 = vmul.f32 %v2829_v6, %v1101_v21  ;;  %v1198_v48 = vmul.f32 %v2827_v44, %v1102_v26 }
 0x31a   : > { %1083 = vst.msk [vmem:[#allocation3 + $0x40] sm:$0xff] %vm1074_vm4, %v1066_v60  ;;  %1084 = vst.msk [vmem:[#allocation3 + $0x48] sm:$0xff] %vm1074_vm4, %v1067_v10  ;;  %v1196_v60 = vmul.f32 %v2831_v46, %v1100_v38 }
 0x31b   : > { %v1055_v2 = vpop.xlane.xlu0 %1054  ;;  %v1057_v5 = vpop.xlane.xlu1 %1056 }
 0x31c   : > { %v1072_v8 = vadd.f32 %v1055_v2, %v1024_v1  ;;  %v1073_v34 = vadd.f32 %v1057_v5, %v1025_v16  ;;  %v1105_v5 = vld [vmem:[#allocation4 + $0x70] sm:$0xff] }
 0x31e   : > { %1089 = vst.msk [vmem:[#allocation3 + $0x70] sm:$0xff] %vm1074_vm4, %v1072_v8  ;;  %1090 = vst.msk [vmem:[#allocation3 + $0x78] sm:$0xff] %vm1074_vm4, %v1073_v34  ;;  %v1104_v8 = vld [vmem:[#allocation4 + $0x68] sm:$0xff]  ;;  %v1199_v34 = vmul.f32 %v2837_v54, %v1103_v36 }
 0x31f   : > { %v1051_v20 = vpop.xlane.xlu0 %1050  ;;  %v1053_v31 = vpop.xlane.xlu1 %1052 }
 0x320   : > { %v1070_v37 = vadd.f32 %v1051_v20, %v1022_v43  ;;  %v1071_v23 = vadd.f32 %v1053_v31, %v1023_v33 }
 0x322   : > { %1087 = vst.msk [vmem:[#allocation3 + $0x60] sm:$0xff] %vm1074_vm4, %v1070_v37  ;;  %1088 = vst.msk [vmem:[#allocation3 + $0x68] sm:$0xff] %vm1074_vm4, %v1071_v23  ;;  %v1200_v37 = vmul.f32 %v2835_v50, %v1104_v8 }
 0x323   : > { %v1180_v14 = vpop.permute.xlu1 %1179 }
 0x324   : > { %v1201_v46 = vmul.f32 %v1180_v14, %v1105_v5 }
 0x327   : > { %v1185_v44 = vpop.permute.xlu0 %1184 }
 0x328   : > { %v1202_v33 = vmul.f32 %v1185_v44, %v1106_v47 }
 0x343   : > { %v1979_v51 = vpop.f32.mrb[0].mxu1 }
 0x344   : > { %v1358_v35 = vadd.f32 %v1979_v51, %v1189_v57  ;;  %v1293_v49 = vpop.f32.mrb[1].mxu1 }
 0x345   : > { %v1356_v28 = vadd.f32 %v1293_v49, %v1187_v9  ;;  %v1980_v55 = vpop.f32.mrb[2].mxu1 }
 0x346   : > { %1374 = vst.msk [vmem:[#allocation4 + $0x10] sm:$0xff] %vm538_vm2, %v1358_v35  ;;  %v1359_v27 = vadd.f32 %v1980_v55, %v1190_v42  ;;  %v1296_v7 = vpop.f32.mrb[3].mxu1 }
 0x347   : > { %1372 = vst.msk [vmem:[#allocation4] sm:$0xff] %vm538_vm2, %v1356_v28  ;;  %v1357_v32 = vadd.f32 %v1296_v7, %v1188_v13 }
 0x348   : > { %1375 = vst.msk [vmem:[#allocation4 + $0x18] sm:$0xff] %vm538_vm2, %v1359_v27 }
 0x349   : > { %1373 = vst.msk [vmem:[#allocation4 + $0x8] sm:$0xff] %vm538_vm2, %v1357_v32 }
 0x353   : > { %v1983_v58 = vpop.f32.mrb[4].mxu1 }
 0x354   : > { %v1362_v3 = vadd.f32 %v1983_v58, %v1193_v11  ;;  %v1309_v63 = vpop.f32.mrb[5].mxu1 }
 0x355   : > { %v1360_v15 = vadd.f32 %v1309_v63, %v1191_v29  ;;  %v1984_v22 = vpop.f32.mrb[6].mxu1 }
 0x356   : > { %1378 = vst.msk [vmem:[#allocation4 + $0x30] sm:$0xff] %vm538_vm2, %v1362_v3  ;;  %v1363_v18 = vadd.f32 %v1984_v22, %v1194_v30  ;;  %v1312_v12 = vpop.f32.mrb[7].mxu1 }
 0x357   : > { %1376 = vst.msk [vmem:[#allocation4 + $0x20] sm:$0xff] %vm538_vm2, %v1360_v15  ;;  %v1361_v17 = vadd.f32 %v1312_v12, %v1192_v4 }
 0x358   : > { %1379 = vst.msk [vmem:[#allocation4 + $0x38] sm:$0xff] %vm538_vm2, %v1363_v18 }
 0x359   : > { %1377 = vst.msk [vmem:[#allocation4 + $0x28] sm:$0xff] %vm538_vm2, %v1361_v17 }
 0x35b   : > { %v1987_v0 = vpop.f32.mrb[8].mxu1 }
 0x35c   : > { %v1366_v62 = vadd.f32 %v1987_v0, %v1197_v59  ;;  %v1325_v24 = vpop.f32.mrb[9].mxu1 }
 0x35d   : > { %v1364_v10 = vadd.f32 %v1325_v24, %v1195_v41  ;;  %v1988_v1 = vpop.f32.mrb[10].mxu1 }
 0x35e   : > { %1382 = vst.msk [vmem:[#allocation4 + $0x50] sm:$0xff] %vm538_vm2, %v1366_v62  ;;  %v1367_v16 = vadd.f32 %v1988_v1, %v1198_v48  ;;  %v1328_v2 = vpop.f32.mrb[11].mxu1 }
 0x35f   : > { %1380 = vst.msk [vmem:[#allocation4 + $0x40] sm:$0xff] %vm538_vm2, %v1364_v10  ;;  %v1365_v6 = vadd.f32 %v1328_v2, %v1196_v60 }
 0x360   : > { %1383 = vst.msk [vmem:[#allocation4 + $0x58] sm:$0xff] %vm538_vm2, %v1367_v16 }
 0x361   : > { %1381 = vst.msk [vmem:[#allocation4 + $0x48] sm:$0xff] %vm538_vm2, %v1365_v6 }
 0x363   : > { %v1991_v43 = vpop.f32.mrb[12].mxu1 }
 0x364   : > { %v1370_v20 = vadd.f32 %v1991_v43, %v1201_v46  ;;  %v1341_v31 = vpop.f32.mrb[13].mxu1 }
 0x365   : > { %v1368_v23 = vadd.f32 %v1341_v31, %v1199_v34  ;;  %v1992_v61 = vpop.f32.mrb[14].mxu1 }
 0x366   : > { %1386 = vst.msk [vmem:[#allocation4 + $0x70] sm:$0xff] %vm538_vm2, %v1370_v20  ;;  %v1371_v53 = vadd.f32 %v1992_v61, %v1202_v33  ;;  %v1344_v45 = vpop.f32.mrb[15].mxu1 }
 0x367   : > { %1384 = vst.msk [vmem:[#allocation4 + $0x60] sm:$0xff] %vm538_vm2, %v1368_v23  ;;  %v1369_v19 = vadd.f32 %v1344_v45, %v1200_v37 }
 0x368   : > { %1387 = vst.msk [vmem:[#allocation4 + $0x78] sm:$0xff] %vm538_vm2, %v1371_v53 }
 0x369   : > { %1385 = vst.msk [vmem:[#allocation4 + $0x68] sm:$0xff] %vm538_vm2, %v1369_v19 }
 0x36a PF: > { %p1862_p13 = scmp.ne.s32.totalorder %s2239_s12, 1 }
 0x36b   : > { %v1410_v54 = vld [vmem:[#allocation3 + $0x10] sm:$0xff] (!%p1862_p13)  ;;  %v1408_v57 = vld [vmem:[#allocation3] sm:$0xff] (!%p1862_p13)  ;;  %v1411_v50 = vld [vmem:[#allocation3 + $0x18] sm:$0xff] (!%p1862_p13)  ;;  %v2276_v9 = vmov (!%p1862_p13), 0   ;;  %vm1616_vm2 = vcmask (!%p1862_p13), 519168  }
 0x36c   : > { %1407 = sbr.rel (%p1862_p13) target bundleno = 1049 (0x419), region = 44  ;;  %2168 = vset.pattern.permute.xlu1 (!%p1862_p13), %v2276_v9  ;;  %2167 = vset.pattern.permute.xlu0 (!%p1862_p13), %v2276_v9  ;;  %2169 = vrcp.f32 (!%p1862_p13), %v1410_v54  ;;  %v1409_v51 = vld [vmem:[#allocation3 + $0x8] sm:$0xff] (!%p1862_p13)  ;;  %v1412_v35 = vld [vmem:[#allocation3 + $0x20] sm:$0xff] (!%p1862_p13)  ;;  %v1415_v49 = vld [vmem:[#allocation3 + $0x38] sm:$0xff] (!%p1862_p13) }
 0x36d   : > { %2171 = vrcp.f32 (!%p1862_p13), %v1408_v57  ;;  %v1413_v42 = vld [vmem:[#allocation3 + $0x28] sm:$0xff] (!%p1862_p13)  ;;  %v1414_v13 = vld [vmem:[#allocation3 + $0x30] sm:$0xff] (!%p1862_p13)  ;;  %v1416_v32 = vld [vmem:[#allocation3 + $0x40] sm:$0xff] (!%p1862_p13) }
 0x36e   : > { %2173 = vrcp.f32 (!%p1862_p13), %v1411_v50  ;;  %v1417_v27 = vld [vmem:[#allocation3 + $0x48] sm:$0xff] (!%p1862_p13)  ;;  %v1419_v56 = vld [vmem:[#allocation3 + $0x58] sm:$0xff] (!%p1862_p13)  ;;  %v1418_v52 = vld [vmem:[#allocation3 + $0x50] sm:$0xff] (!%p1862_p13) }
 0x36f   : > { %2175 = vrcp.f32 (!%p1862_p13), %v1409_v51  ;;  %v1421_v29 = vld [vmem:[#allocation3 + $0x68] sm:$0xff] (!%p1862_p13)  ;;  %v1420_v30 = vld [vmem:[#allocation3 + $0x60] sm:$0xff] (!%p1862_p13)  ;;  %v1423_v63 = vld [vmem:[#allocation3 + $0x78] sm:$0xff] (!%p1862_p13) }
 0x370   : > { %2177 = vrcp.f32 (!%p1862_p13), %v1413_v42  ;;  %v1422_v15 = vld [vmem:[#allocation3 + $0x70] sm:$0xff] (!%p1862_p13)  ;;  %v1440_v59 = vld [vmem:[#allocation4] sm:$0xff] (!%p1862_p13)  ;;  %v1443_v24 = vld [vmem:[#allocation4 + $0x18] sm:$0xff] (!%p1862_p13) }
 0x371   : > { %2179 = vrcp.f32 (!%p1862_p13), %v1412_v35  ;;  %v1442_v38 = vld [vmem:[#allocation4 + $0x10] sm:$0xff] (!%p1862_p13)  ;;  %v1441_v10 = vld [vmem:[#allocation4 + $0x8] sm:$0xff] (!%p1862_p13)  ;;  %v1444_v47 = vld [vmem:[#allocation4 + $0x20] sm:$0xff] (!%p1862_p13) }
 0x372   : > { %2181 = vrcp.f32 (!%p1862_p13), %v1415_v49  ;;  %v1445_v6 = vld [vmem:[#allocation4 + $0x28] sm:$0xff] (!%p1862_p13)  ;;  %v1447_v33 = vld [vmem:[#allocation4 + $0x38] sm:$0xff] (!%p1862_p13)  ;;  %v1446_v31 = vld [vmem:[#allocation4 + $0x30] sm:$0xff] (!%p1862_p13) }
 0x373   : > { %2183 = vrcp.f32 %v1414_v13  ;;  %v1449_v19 = vld [vmem:[#allocation4 + $0x48] sm:$0xff]  ;;  %v1448_v57 = vld [vmem:[#allocation4 + $0x40] sm:$0xff]  ;;  %v1451_v49 = vld [vmem:[#allocation4 + $0x58] sm:$0xff] }
 0x374   : > { %2185 = vrcp.f32 %v1417_v27 }
 0x375   : > { %2187 = vrcp.f32 %v1416_v32 }
 0x376   : > { %v2170_v28 = vpop.eup %2169  ;;  %2189 = vrcp.f32 %v1419_v56  ;;  %v1453_v56 = vld [vmem:[#allocation4 + $0x68] sm:$0xff] }
 0x377   : > { %v2172_v55 = vpop.eup %2171  ;;  %1468 = vperm.xlu1 %2168, %v2170_v28   ;;  %2191 = vrcp.f32 %v1418_v52  ;;  %v1450_v28 = vld [vmem:[#allocation4 + $0x50] sm:$0xff]  ;;  %v1452_v52 = vld [vmem:[#allocation4 + $0x60] sm:$0xff] }
 0x378   : > { %v2174_v7 = vpop.eup %2173  ;;  %1458 = vperm.xlu0 %2167, %v2172_v55   ;;  %2193 = vrcp.f32 %v1421_v29 }
 0x379   : > { %v2176_v25 = vpop.eup %2175  ;;  %2195 = vrcp.f32 %v1420_v30 }
 0x37a   : > { %v2178_v39 = vpop.eup %2177  ;;  %2197 = vrcp.f32 %v1423_v63  ;;  %v1455_v63 = vld [vmem:[#allocation4 + $0x78] sm:$0xff] }
 0x37b   : > { %1473 = vperm.xlu1 %2168, %v2174_v7   ;;  %v2180_v11 = vpop.eup %2179  ;;  %2199 = vrcp.f32 %v1422_v15  ;;  %v1454_v15 = vld [vmem:[#allocation4 + $0x70] sm:$0xff] }
 0x37c   : > { %1463 = vperm.xlu0 %2167, %v2176_v25   ;;  %v2182_v58 = vpop.eup %2181 }
 0x37d   : > { %v2184_v3 = vpop.eup %2183 }
 0x37e   : > { %v2186_v4 = vpop.eup %2185 }
 0x37f   : > { %1483 = vperm.xlu1 %2168, %v2178_v39   ;;  %v2188_v22 = vpop.eup %2187 }
 0x380   : > { %1478 = vperm.xlu0 %2167, %v2180_v11   ;;  %v2190_v18 = vpop.eup %2189 }
 0x381   : > { %v2192_v12 = vpop.eup %2191 }
 0x382   : > { %v2194_v21 = vpop.eup %2193 }
 0x383   : > { %1493 = vperm.xlu1 %2168, %v2182_v58   ;;  %v2196_v17 = vpop.eup %2195 }
 0x384   : > { %1488 = vperm.xlu0 %2167, %v2184_v3   ;;  %v2198_v40 = vpop.eup %2197 }
 0x385   : > { %v2200_v26 = vpop.eup %2199 }
 0x387   : > { %1503 = vperm.xlu1 %2168, %v2186_v4  }
 0x388   : > { %1498 = vperm.xlu0 %2167, %v2188_v22  }
 0x38b   : > { %1513 = vperm.xlu1 %2168, %v2190_v18  }
 0x38c   : > { %1508 = vperm.xlu0 %2167, %v2192_v12  }
 0x38f   : > { %1523 = vperm.xlu1 %2168, %v2194_v21  }
 0x390   : > { %1518 = vperm.xlu0 %2167, %v2196_v17  }
 0x393   : > { %1533 = vperm.xlu1 %2168, %v2198_v40  }
 0x394   : > { %1528 = vperm.xlu0 %2167, %v2200_v26  }
 0x3f6   : > { %v1469_v41 = vpop.permute.xlu1 %1468 }
 0x3f7   : > { %v1538_v0 = vmul.f32 %v1469_v41, %v1442_v38  ;;  %v1459_v48 = vpop.permute.xlu0 %1458 }
 0x3f8   : > { %v1536_v62 = vmul.f32 %v1459_v48, %v1440_v59 }
 0x3f9   : > { %v1883_v60 = vpack.c.bf16 %v1538_v0, %v1538_v0 }
 0x3fa   : > { %v1881_v1 = vpack.c.bf16 %v1536_v62, %v1536_v62  ;;  %v1474_v16 = vpop.permute.xlu1 %1473 }
 0x3fb   : > { %1619 = vst.msk [vmem:[%s2369_s10 + $0x8] sm:$0xf] %vm1616_vm2, %v1883_v60  ;;  %v1539_v2 = vmul.f32 %v1474_v16, %v1443_v24  ;;  %v1464_v5 = vpop.permute.xlu0 %1463 }
 0x3fc   : > { %1617 = vst.msk [vmem:[%s2369_s10] sm:$0xf] %vm1616_vm2, %v1881_v1  ;;  %v1537_v14 = vmul.f32 %v1464_v5, %v1441_v10 }
 0x3fd   : > { %v1884_v36 = vpack.c.bf16 %v1539_v2, %v1539_v2 }
 0x3fe   : > { %v1882_v44 = vpack.c.bf16 %v1537_v14, %v1537_v14  ;;  %v1484_v8 = vpop.permute.xlu1 %1483 }
 0x3ff   : > { %1620 = vst.msk [vmem:[%s2369_s10 + $0xc] sm:$0xf] %vm1616_vm2, %v1884_v36  ;;  %v1541_v46 = vmul.f32 %v1484_v8, %v1445_v6  ;;  %v1479_v34 = vpop.permute.xlu0 %1478 }
 0x400   : > { %1618 = vst.msk [vmem:[%s2369_s10 + $0x4] sm:$0xf] %vm1616_vm2, %v1882_v44  ;;  %v1540_v43 = vmul.f32 %v1479_v34, %v1444_v47 }
 0x401   : > { %v1886_v20 = vpack.c.bf16 %v1541_v46, %v1541_v46 }
 0x402   : > { %v1885_v37 = vpack.c.bf16 %v1540_v43, %v1540_v43  ;;  %v1494_v23 = vpop.permute.xlu1 %1493 }
 0x403   : > { %1622 = vst.msk [vmem:[%s2369_s10 + $0x14] sm:$0xf] %vm1616_vm2, %v1886_v20  ;;  %v1543_v61 = vmul.f32 %v1494_v23, %v1447_v33  ;;  %v1489_v53 = vpop.permute.xlu0 %1488 }
 0x404   : > { %1621 = vst.msk [vmem:[%s2369_s10 + $0x10] sm:$0xf] %vm1616_vm2, %v1885_v37  ;;  %v1542_v45 = vmul.f32 %v1489_v53, %v1446_v31 }
 0x405   : > { %v1888_v54 = vpack.c.bf16 %v1543_v61, %v1543_v61 }
 0x406   : > { %v1887_v50 = vpack.c.bf16 %v1542_v45, %v1542_v45  ;;  %v1504_v9 = vpop.permute.xlu1 %1503 }
 0x407   : > { %1624 = vst.msk [vmem:[%s2369_s10 + $0x1c] sm:$0xf] %vm1616_vm2, %v1888_v54  ;;  %v1545_v51 = vmul.f32 %v1504_v9, %v1449_v19  ;;  %v1499_v42 = vpop.permute.xlu0 %1498 }
 0x408   : > { %1623 = vst.msk [vmem:[%s2369_s10 + $0x18] sm:$0xf] %vm1616_vm2, %v1887_v50  ;;  %v1544_v35 = vmul.f32 %v1499_v42, %v1448_v57 }
 0x409   : > { %v1890_v13 = vpack.c.bf16 %v1545_v51, %v1545_v51 }
 0x40a   : > { %v1889_v55 = vpack.c.bf16 %v1544_v35, %v1544_v35  ;;  %v1514_v27 = vpop.permute.xlu1 %1513 }
 0x40b   : > { %1626 = vst.msk [vmem:[%s2369_s10 + $0x24] sm:$0xf] %vm1616_vm2, %v1890_v13  ;;  %v1547_v7 = vmul.f32 %v1514_v27, %v1451_v49  ;;  %v1509_v32 = vpop.permute.xlu0 %1508 }
 0x40c   : > { %1625 = vst.msk [vmem:[%s2369_s10 + $0x20] sm:$0xf] %vm1616_vm2, %v1889_v55  ;;  %v1546_v25 = vmul.f32 %v1509_v32, %v1450_v28 }
 0x40d   : > { %v1892_v39 = vpack.c.bf16 %v1547_v7, %v1547_v7 }
 0x40e   : > { %v1891_v11 = vpack.c.bf16 %v1546_v25, %v1546_v25  ;;  %v1524_v29 = vpop.permute.xlu1 %1523 }
 0x40f   : > { %1628 = vst.msk [vmem:[%s2369_s10 + $0x2c] sm:$0xf] %vm1616_vm2, %v1892_v39  ;;  %v1549_v58 = vmul.f32 %v1524_v29, %v1453_v56  ;;  %v1519_v30 = vpop.permute.xlu0 %1518 }
 0x410   : > { %1627 = vst.msk [vmem:[%s2369_s10 + $0x28] sm:$0xf] %vm1616_vm2, %v1891_v11  ;;  %v1548_v3 = vmul.f32 %v1519_v30, %v1452_v52 }
 0x411   : > { %v1894_v4 = vpack.c.bf16 %v1549_v58, %v1549_v58 }
 0x412   : > { %v1893_v22 = vpack.c.bf16 %v1548_v3, %v1548_v3  ;;  %v1534_v18 = vpop.permute.xlu1 %1533 }
 0x413   : > { %1630 = vst.msk [vmem:[%s2369_s10 + $0x34] sm:$0xf] %vm1616_vm2, %v1894_v4  ;;  %v1551_v12 = vmul.f32 %v1534_v18, %v1455_v63  ;;  %v1529_v21 = vpop.permute.xlu0 %1528 }
 0x414   : > { %1629 = vst.msk [vmem:[%s2369_s10 + $0x30] sm:$0xf] %vm1616_vm2, %v1893_v22  ;;  %v1550_v17 = vmul.f32 %v1529_v21, %v1454_v15 }
 0x415   : > { %v1896_v40 = vpack.c.bf16 %v1551_v12, %v1551_v12 }
 0x416   : > { %v1895_v26 = vpack.c.bf16 %v1550_v17, %v1550_v17 }
 0x417   : > { %1632 = vst.msk [vmem:[%s2369_s10 + $0x3c] sm:$0xf] %vm1616_vm2, %v1896_v40 }
 0x418   : > { %1631 = vst.msk [vmem:[%s2369_s10 + $0x38] sm:$0xf] %vm1616_vm2, %v1895_v26 }
 0x419 PF: > { %s13_s20 = sadd.s32 1, %s2271_s20   ;;  %s2967_s27 = sld [smem:[#allocation5_spill]] }
 0x41a   : > { %p10_p0 = scmp.ge.s32.totalorder %s13_s20, 34   ;;  %s2968_s29 = sld [smem:[#allocation6_spill]] }
 0x41b   : > { %s2969_s12 = smov %s2255_s16  ;;  %s2970_s13 = smov %s2259_s17 }
 0x41c   : > { %s2971_s14 = smov %s2263_s18  ;;  %s2972_s15 = smov %s2267_s19 }
 0x41d   : > { %s2973_s16 = smov %s2978_s21  ;;  %s2974_s17 = smov %s2982_s22 }
 0x41e   :  { %12 = sbr.rel (!%p10_p0) target bundleno = 5 (0x5), region = 80 }
 0x41f   : > { %s2975_s18 = smov %s2967_s27 }
 0x420   : > { %s2976_s19 = smov %s2968_s29 }

</bundles_post_ra>
